<compile_context>
chip_gen: v5e
topology: v5e:2x2
jax: 0.10.0
libtpu: 0.0.40
codegen_flags: <defaults>
</compile_context>

<pallas_src>
import jax
import jax.numpy as jnp
from jax.experimental import pallas as pl
from jax.experimental.pallas import tpu as pltpu

C_OUT = 128          # conv out_channels
KSIZE = 3            # conv kernel_size
NUM_CLASSES = 2
LANE = 128
SUBLANE = 8


def _round_up(x, m):
    return ((x + m - 1) // m) * m


def textcnn_kernel(x_ref, wcat_ref, bconv_ref, wflat_ref, bfc_ref, out_ref, flat_ref):
    """Whole forward (conv -> relu -> maxpool -> fc1) in one kernel invocation.

    x_ref    : (S*B_pad, E_pad)     bf16  time-major embedded tokens (row = s*B_pad + b)
    wcat_ref : (E_pad, 3*C)         bf16  conv taps [W0 | W1 | W2], Wk[e, o] = conv_w[o, e, k]
    bconv_ref: (1, C)               f32   conv bias
    wflat_ref: (P_out*C, N_pad)     f32   fc1 weights, row j*C + c  <->  fc_w[:, c*P_out + j]
    bfc_ref  : (1, N_pad)           f32   fc1 bias (zero padded)
    out_ref  : (B_pad, N_pad)       f32   logits (lane-dense; wrapper slices [:, :2])
    flat_ref : (B_pad, P_out*C)     f32   VMEM scratch: pooled activations, flattened
    """
    b_pad, _ = out_ref.shape
    c = bconv_ref.shape[1]
    sb, _ = x_ref.shape
    s = sb // b_pad
    l_out = s - KSIZE + 1
    p_out = l_out // 2

    # --- 1. One fused MXU pass: all timesteps x all 3 conv taps ----------------------
    #     (S*B_pad, E_pad) @ (E_pad, 3C) -> (S*B_pad, 3C), f32 accumulation.
    proj = jnp.dot(x_ref[...], wcat_ref[...], preferred_element_type=jnp.float32)
    proj = proj.reshape(s, b_pad, KSIZE * c)         # leading-axis split: layout-preserving

    # --- 2. Valid conv (k=3) + bias + ReLU, vectorized over the whole sequence -------
    bconv = bconv_ref[...]                            # (1, C) broadcasts against (L, B, C)
    conv = jnp.maximum(
        proj[0:l_out, :, 0:c]
        + proj[1:l_out + 1, :, c:2 * c]
        + proj[2:l_out + 2, :, 2 * c:3 * c]
        + bconv,
        0.0)                                          # (L_out, B_pad, C)

    # --- 3. MaxPool1d(kernel_size=2) over adjacent conv positions --------------------
    conv_pairs = conv[:2 * p_out].reshape(p_out, 2, b_pad, c)   # layout-preserving split
    pooled = jnp.maximum(conv_pairs[:, 0], conv_pairs[:, 1])    # (P_out, B_pad, C)

    # --- 4. Flatten in PyTorch x.view() order (lane offset j*C + c), one FC matmul ---
    for j in range(p_out):                            # static, 128-aligned single-vreg stores
        flat_ref[:, j * c:(j + 1) * c] = pooled[j]
    out_ref[...] = (
        jnp.dot(flat_ref[...], wflat_ref[...], preferred_element_type=jnp.float32)
        + bfc_ref[...])


@jax.jit
def text_cnn_forward(tokens, params):
    """tokens: int32 (B, S); returns (B, 2) float32 logits matching PyTorch TextCNN."""
    emb = params["embedding"]          # (V, E)
    conv_w = params["conv_w"]          # (C, E, K)   PyTorch Conv1d layout
    conv_b = params["conv_b"]          # (C,)
    fc_w = params["fc_w"]              # (2, C * P_out)
    fc_b = params["fc_b"]              # (2,)

    B, S = tokens.shape
    E = emb.shape[1]
    l_out = S - KSIZE + 1
    p_out = l_out // 2
    fc_in = C_OUT * p_out
    assert fc_w.shape[1] == fc_in, "fc1 size must match seq_len (spec uses 100)"

    b_pad = _round_up(max(B, SUBLANE), SUBLANE)
    e_pad = _round_up(E, LANE)
    n_pad = LANE

    # --- glue: embedding gather straight into time-major layout, pad, fold S into rows
    x = jnp.take(emb, tokens.T, axis=0)                                  # (S, B, E)
    x = jnp.pad(x, ((0, 0), (0, b_pad - B), (0, e_pad - E)))
    x = x.reshape(S * b_pad, e_pad).astype(jnp.bfloat16)                 # (S*B_pad, E_pad)

    # conv taps: Wk[e, o] = conv_w[o, e, k], E zero-padded, concatenated along out lanes
    taps = [jnp.pad(conv_w[:, :, k].T, ((0, e_pad - E), (0, 0))) for k in range(KSIZE)]
    wcat = jnp.concatenate(taps, axis=1).astype(jnp.bfloat16)            # (e_pad, 3C)
    bconv = conv_b.reshape(1, C_OUT).astype(jnp.float32)

    # fc1 weight: row index j*C + c must match fc_w[:, c*P_out + j] (PyTorch flatten order)
    wflat = fc_w.reshape(NUM_CLASSES, C_OUT, p_out)                      # [n, c, j]
    wflat = jnp.transpose(wflat, (2, 1, 0)).reshape(fc_in, NUM_CLASSES)  # [j*C + c, n]
    wflat = jnp.pad(wflat, ((0, 0), (0, n_pad - NUM_CLASSES))).astype(jnp.float32)
    bfc = jnp.pad(fc_b, (0, n_pad - NUM_CLASSES)).reshape(1, n_pad).astype(jnp.float32)

    out = pl.pallas_call(
        textcnn_kernel,
        out_shape=jax.ShapeDtypeStruct((b_pad, n_pad), jnp.float32),
        grid_spec=pltpu.PrefetchScalarGridSpec(
            num_scalar_prefetch=0,
            grid=(1,),
            in_specs=[
                pl.BlockSpec((S * b_pad, e_pad), lambda i: (0, 0)),          # x slab
                pl.BlockSpec((e_pad, KSIZE * C_OUT), lambda i: (0, 0)),      # conv taps
                pl.BlockSpec((1, C_OUT), lambda i: (0, 0)),                  # conv bias
                pl.BlockSpec((fc_in, n_pad), lambda i: (0, 0)),              # fc1 weights
                pl.BlockSpec((1, n_pad), lambda i: (0, 0)),                  # fc1 bias
            ],
            out_specs=pl.BlockSpec((b_pad, n_pad), lambda i: (0, 0)),
            scratch_shapes=[pltpu.VMEM((b_pad, fc_in), jnp.float32)],        # flat pooled
        ),
        compiler_params=pltpu.CompilerParams(
            dimension_semantics=("arbitrary",),
            vmem_limit_bytes=32 * 1024 * 1024),
    )(x, wcat, bconv, wflat, bfc)

    return out[:B, :NUM_CLASSES]


def reference_forward(tokens, params):
    """Pure-JAX f32 reference mirroring the PyTorch TextCNN forward."""
    emb = params["embedding"]
    conv_w, conv_b = params["conv_w"], params["conv_b"]
    fc_w, fc_b = params["fc_w"], params["fc_b"]

    x = jnp.take(emb, tokens, axis=0)                        # (B, S, E)
    B, S, _ = x.shape
    l_out = S - KSIZE + 1
    conv = conv_b[None, None, :] + sum(
        jnp.einsum("ble,oe->blo", x[:, k:k + l_out, :], conv_w[:, :, k])
        for k in range(KSIZE))                               # (B, L, C)
    conv = jnp.maximum(conv, 0.0)
    p_out = l_out // 2
    pooled = jnp.maximum(conv[:, 0:2 * p_out:2, :],
                         conv[:, 1:2 * p_out:2, :])          # (B, P, C)
    flat = jnp.transpose(pooled, (0, 2, 1)).reshape(B, -1)   # torch flatten order c*P + j
    return flat @ fc_w.T + fc_b


def init_params(key, vocab_size, embedding_dim, seq_len):
    l_out = seq_len - KSIZE + 1
    p_out = l_out // 2
    fc_in = C_OUT * p_out
    ks = jax.random.split(key, 5)
    s_conv = 1.0 / jnp.sqrt(embedding_dim * KSIZE)
    s_fc = 1.0 / jnp.sqrt(fc_in)
    return {
        "embedding": jax.random.normal(ks[0], (vocab_size, embedding_dim), jnp.float32),
        "conv_w": jax.random.uniform(ks[1], (C_OUT, embedding_dim, KSIZE),
                                     jnp.float32, -s_conv, s_conv),
        "conv_b": jax.random.uniform(ks[2], (C_OUT,), jnp.float32, -s_conv, s_conv),
        "fc_w": jax.random.uniform(ks[3], (NUM_CLASSES, fc_in), jnp.float32, -s_fc, s_fc),
        "fc_b": jax.random.uniform(ks[4], (NUM_CLASSES,), jnp.float32, -s_fc, s_fc),
    }


if __name__ == "__main__":
    key = jax.random.PRNGKey(0)
    k_param, k_tok = jax.random.split(key)

    VOCAB = 50
    EMB = 100      # module default embedding_dim
    B, S = 2, 100  # fc1 in the spec hard-codes seq_len = 100 (128 * ((100-3+1)//2))

    params = init_params(k_param, VOCAB, EMB, S)
    tokens = jax.random.randint(k_tok, (B, S), 0, VOCAB, dtype=jnp.int32)

    out = text_cnn_forward(tokens, params)
    out = jax.block_until_ready(out)

    ref = reference_forward(tokens, params)
    assert out.shape == (B, NUM_CLASSES)
    # bf16 conv operands with f32 accumulation (FC path kept f32) vs f32 reference
    assert jnp.allclose(out, ref, atol=5e-2, rtol=5e-2), (out, ref)

    print("KERNEL_OK")
</pallas_src>

<mosaic_0001>
module attributes {stable_mosaic.version = 11 : i64} {
  func.func @textcnn_kernel(%arg0: i32, %arg1: memref<800x128xbf16, #tpu.memory_space<vmem>>, %arg2: memref<128x384xbf16, #tpu.memory_space<vmem>>, %arg3: memref<1x128xf32, #tpu.memory_space<vmem>>, %arg4: memref<6272x128xf32, #tpu.memory_space<vmem>>, %arg5: memref<1x128xf32, #tpu.memory_space<vmem>>, %arg6: memref<8x128xf32, #tpu.memory_space<vmem>>, %arg7: memref<8x6272xf32, #tpu.memory_space<vmem>>) attributes {dimension_semantics = [#tpu.dimension_semantics<arbitrary>], iteration_bounds = array<i64: 1>, scalar_prefetch = 0 : i64, scratch_operands = 1 : i64, tpu.core_type = #tpu.core_type<tc>, window_params = [{pipeline_mode = #tpu.pipeline_mode<synchronous>, transform_indices = @transform_0, window_bounds = array<i64: 800, 128>}, {pipeline_mode = #tpu.pipeline_mode<synchronous>, transform_indices = @transform_1, window_bounds = array<i64: 128, 384>}, {pipeline_mode = #tpu.pipeline_mode<synchronous>, transform_indices = @transform_2, window_bounds = array<i64: 1, 128>}, {pipeline_mode = #tpu.pipeline_mode<synchronous>, transform_indices = @transform_3, window_bounds = array<i64: 6272, 128>}, {pipeline_mode = #tpu.pipeline_mode<synchronous>, transform_indices = @transform_4, window_bounds = array<i64: 1, 128>}, {pipeline_mode = #tpu.pipeline_mode<synchronous>, transform_indices = @transform_5, window_bounds = array<i64: 8, 128>}]} {
    %c0 = arith.constant 0 : index
    %c0_0 = arith.constant 0 : index
    %0 = vector.load %arg1[%c0, %c0_0] : memref<800x128xbf16, #tpu.memory_space<vmem>>, vector<800x128xbf16>
    %c0_1 = arith.constant 0 : index
    %c0_2 = arith.constant 0 : index
    %1 = vector.load %arg2[%c0_1, %c0_2] : memref<128x384xbf16, #tpu.memory_space<vmem>>, vector<128x384xbf16>
    %cst = arith.constant dense<0.000000e+00> : vector<800x384xf32>
    %2 = tpu.matmul %0, %1, %cst {dimension_numbers = #tpu.dot_dimension_numbers<[1], [0], [0], [1], [0, 0, 1, 1], [], []>} : vector<800x128xbf16>, vector<128x384xbf16>, vector<800x384xf32> -> vector<800x384xf32>
    %3 = vector.shape_cast %2 : vector<800x384xf32> to vector<100x8x384xf32>
    %c0_3 = arith.constant 0 : index
    %c0_4 = arith.constant 0 : index
    %4 = vector.load %arg3[%c0_3, %c0_4] : memref<1x128xf32, #tpu.memory_space<vmem>>, vector<1x128xf32>
    %5 = vector.extract_strided_slice %3 {offsets = [0, 0, 0], sizes = [98, 8, 128], strides = [1, 1, 1]} : vector<100x8x384xf32> to vector<98x8x128xf32>
    %6 = vector.extract_strided_slice %3 {offsets = [1, 0, 128], sizes = [98, 8, 128], strides = [1, 1, 1]} : vector<100x8x384xf32> to vector<98x8x128xf32>
    %7 = arith.addf %5, %6 : vector<98x8x128xf32>
    %8 = vector.extract_strided_slice %3 {offsets = [2, 0, 256], sizes = [98, 8, 128], strides = [1, 1, 1]} : vector<100x8x384xf32> to vector<98x8x128xf32>
    %9 = arith.addf %7, %8 : vector<98x8x128xf32>
    %10 = vector.shape_cast %4 : vector<1x128xf32> to vector<1x1x128xf32>
    %11 = vector.broadcast %10 : vector<1x1x128xf32> to vector<98x8x128xf32>
    %12 = arith.addf %9, %11 : vector<98x8x128xf32>
    %cst_5 = arith.constant 0.000000e+00 : f32
    %13 = vector.broadcast %cst_5 : f32 to vector<98x8x128xf32>
    %14 = arith.maximumf %12, %13 : vector<98x8x128xf32>
    %15 = vector.shape_cast %14 : vector<98x8x128xf32> to vector<49x2x8x128xf32>
    %16 = vector.extract_strided_slice %15 {offsets = [0, 0, 0, 0], sizes = [49, 1, 8, 128], strides = [1, 1, 1, 1]} : vector<49x2x8x128xf32> to vector<49x1x8x128xf32>
    %17 = vector.shape_cast %16 : vector<49x1x8x128xf32> to vector<49x8x128xf32>
    %18 = vector.extract_strided_slice %15 {offsets = [0, 1, 0, 0], sizes = [49, 1, 8, 128], strides = [1, 1, 1, 1]} : vector<49x2x8x128xf32> to vector<49x1x8x128xf32>
    %19 = vector.shape_cast %18 : vector<49x1x8x128xf32> to vector<49x8x128xf32>
    %20 = arith.maximumf %17, %19 : vector<49x8x128xf32>
    %21 = vector.extract_strided_slice %20 {offsets = [0, 0, 0], sizes = [1, 8, 128], strides = [1, 1, 1]} : vector<49x8x128xf32> to vector<1x8x128xf32>
    %22 = vector.shape_cast %21 : vector<1x8x128xf32> to vector<8x128xf32>
    %c0_6 = arith.constant 0 : index
    %c0_7 = arith.constant 0 : index
    %23 = vector.load %arg7[%c0_6, %c0_7] : memref<8x6272xf32, #tpu.memory_space<vmem>>, vector<8x128xf32>
    tpu.vector_store %arg7[%c0_6, %c0_7], %22 {strides = array<i32>} : memref<8x6272xf32, #tpu.memory_space<vmem>>, vector<8x128xf32>,
    %24 = vector.extract_strided_slice %20 {offsets = [1, 0, 0], sizes = [1, 8, 128], strides = [1, 1, 1]} : vector<49x8x128xf32> to vector<1x8x128xf32>
    %25 = vector.shape_cast %24 : vector<1x8x128xf32> to vector<8x128xf32>
    %c0_8 = arith.constant 0 : index
    %c128 = arith.constant 128 : index
    %26 = vector.load %arg7[%c0_8, %c128] : memref<8x6272xf32, #tpu.memory_space<vmem>>, vector<8x128xf32>
    tpu.vector_store %arg7[%c0_8, %c128], %25 {strides = array<i32>} : memref<8x6272xf32, #tpu.memory_space<vmem>>, vector<8x128xf32>,
    %27 = vector.extract_strided_slice %20 {offsets = [2, 0, 0], sizes = [1, 8, 128], strides = [1, 1, 1]} : vector<49x8x128xf32> to vector<1x8x128xf32>
    %28 = vector.shape_cast %27 : vector<1x8x128xf32> to vector<8x128xf32>
    %c0_9 = arith.constant 0 : index
    %c256 = arith.constant 256 : index
    %29 = vector.load %arg7[%c0_9, %c256] : memref<8x6272xf32, #tpu.memory_space<vmem>>, vector<8x128xf32>
    tpu.vector_store %arg7[%c0_9, %c256], %28 {strides = array<i32>} : memref<8x6272xf32, #tpu.memory_space<vmem>>, vector<8x128xf32>,
    %30 = vector.extract_strided_slice %20 {offsets = [3, 0, 0], sizes = [1, 8, 128], strides = [1, 1, 1]} : vector<49x8x128xf32> to vector<1x8x128xf32>
    %31 = vector.shape_cast %30 : vector<1x8x128xf32> to vector<8x128xf32>
    %c0_10 = arith.constant 0 : index
    %c384 = arith.constant 384 : index
    %32 = vector.load %arg7[%c0_10, %c384] : memref<8x6272xf32, #tpu.memory_space<vmem>>, vector<8x128xf32>
    tpu.vector_store %arg7[%c0_10, %c384], %31 {strides = array<i32>} : memref<8x6272xf32, #tpu.memory_space<vmem>>, vector<8x128xf32>,
    %33 = vector.extract_strided_slice %20 {offsets = [4, 0, 0], sizes = [1, 8, 128], strides = [1, 1, 1]} : vector<49x8x128xf32> to vector<1x8x128xf32>
    %34 = vector.shape_cast %33 : vector<1x8x128xf32> to vector<8x128xf32>
    %c0_11 = arith.constant 0 : index
    %c512 = arith.constant 512 : index
    %35 = vector.load %arg7[%c0_11, %c512] : memref<8x6272xf32, #tpu.memory_space<vmem>>, vector<8x128xf32>
    tpu.vector_store %arg7[%c0_11, %c512], %34 {strides = array<i32>} : memref<8x6272xf32, #tpu.memory_space<vmem>>, vector<8x128xf32>,
    %36 = vector.extract_strided_slice %20 {offsets = [5, 0, 0], sizes = [1, 8, 128], strides = [1, 1, 1]} : vector<49x8x128xf32> to vector<1x8x128xf32>
    %37 = vector.shape_cast %36 : vector<1x8x128xf32> to vector<8x128xf32>
    %c0_12 = arith.constant 0 : index
    %c640 = arith.constant 640 : index
    %38 = vector.load %arg7[%c0_12, %c640] : memref<8x6272xf32, #tpu.memory_space<vmem>>, vector<8x128xf32>
    tpu.vector_store %arg7[%c0_12, %c640], %37 {strides = array<i32>} : memref<8x6272xf32, #tpu.memory_space<vmem>>, vector<8x128xf32>,
    %39 = vector.extract_strided_slice %20 {offsets = [6, 0, 0], sizes = [1, 8, 128], strides = [1, 1, 1]} : vector<49x8x128xf32> to vector<1x8x128xf32>
    %40 = vector.shape_cast %39 : vector<1x8x128xf32> to vector<8x128xf32>
    %c0_13 = arith.constant 0 : index
    %c768 = arith.constant 768 : index
    %41 = vector.load %arg7[%c0_13, %c768] : memref<8x6272xf32, #tpu.memory_space<vmem>>, vector<8x128xf32>
    tpu.vector_store %arg7[%c0_13, %c768], %40 {strides = array<i32>} : memref<8x6272xf32, #tpu.memory_space<vmem>>, vector<8x128xf32>,
    %42 = vector.extract_strided_slice %20 {offsets = [7, 0, 0], sizes = [1, 8, 128], strides = [1, 1, 1]} : vector<49x8x128xf32> to vector<1x8x128xf32>
    %43 = vector.shape_cast %42 : vector<1x8x128xf32> to vector<8x128xf32>
    %c0_14 = arith.constant 0 : index
    %c896 = arith.constant 896 : index
    %44 = vector.load %arg7[%c0_14, %c896] : memref<8x6272xf32, #tpu.memory_space<vmem>>, vector<8x128xf32>
    tpu.vector_store %arg7[%c0_14, %c896], %43 {strides = array<i32>} : memref<8x6272xf32, #tpu.memory_space<vmem>>, vector<8x128xf32>,
    %45 = vector.extract_strided_slice %20 {offsets = [8, 0, 0], sizes = [1, 8, 128], strides = [1, 1, 1]} : vector<49x8x128xf32> to vector<1x8x128xf32>
    %46 = vector.shape_cast %45 : vector<1x8x128xf32> to vector<8x128xf32>
    %c0_15 = arith.constant 0 : index
    %c1024 = arith.constant 1024 : index
    %47 = vector.load %arg7[%c0_15, %c1024] : memref<8x6272xf32, #tpu.memory_space<vmem>>, vector<8x128xf32>
    tpu.vector_store %arg7[%c0_15, %c1024], %46 {strides = array<i32>} : memref<8x6272xf32, #tpu.memory_space<vmem>>, vector<8x128xf32>,
    %48 = vector.extract_strided_slice %20 {offsets = [9, 0, 0], sizes = [1, 8, 128], strides = [1, 1, 1]} : vector<49x8x128xf32> to vector<1x8x128xf32>
    %49 = vector.shape_cast %48 : vector<1x8x128xf32> to vector<8x128xf32>
    %c0_16 = arith.constant 0 : index
    %c1152 = arith.constant 1152 : index
    %50 = vector.load %arg7[%c0_16, %c1152] : memref<8x6272xf32, #tpu.memory_space<vmem>>, vector<8x128xf32>
    tpu.vector_store %arg7[%c0_16, %c1152], %49 {strides = array<i32>} : memref<8x6272xf32, #tpu.memory_space<vmem>>, vector<8x128xf32>,
    %51 = vector.extract_strided_slice %20 {offsets = [10, 0, 0], sizes = [1, 8, 128], strides = [1, 1, 1]} : vector<49x8x128xf32> to vector<1x8x128xf32>
    %52 = vector.shape_cast %51 : vector<1x8x128xf32> to vector<8x128xf32>
    %c0_17 = arith.constant 0 : index
    %c1280 = arith.constant 1280 : index
    %53 = vector.load %arg7[%c0_17, %c1280] : memref<8x6272xf32, #tpu.memory_space<vmem>>, vector<8x128xf32>
    tpu.vector_store %arg7[%c0_17, %c1280], %52 {strides = array<i32>} : memref<8x6272xf32, #tpu.memory_space<vmem>>, vector<8x128xf32>,
    %54 = vector.extract_strided_slice %20 {offsets = [11, 0, 0], sizes = [1, 8, 128], strides = [1, 1, 1]} : vector<49x8x128xf32> to vector<1x8x128xf32>
    %55 = vector.shape_cast %54 : vector<1x8x128xf32> to vector<8x128xf32>
    %c0_18 = arith.constant 0 : index
    %c1408 = arith.constant 1408 : index
    %56 = vector.load %arg7[%c0_18, %c1408] : memref<8x6272xf32, #tpu.memory_space<vmem>>, vector<8x128xf32>
    tpu.vector_store %arg7[%c0_18, %c1408], %55 {strides = array<i32>} : memref<8x6272xf32, #tpu.memory_space<vmem>>, vector<8x128xf32>,
    %57 = vector.extract_strided_slice %20 {offsets = [12, 0, 0], sizes = [1, 8, 128], strides = [1, 1, 1]} : vector<49x8x128xf32> to vector<1x8x128xf32>
    %58 = vector.shape_cast %57 : vector<1x8x128xf32> to vector<8x128xf32>
    %c0_19 = arith.constant 0 : index
    %c1536 = arith.constant 1536 : index
    %59 = vector.load %arg7[%c0_19, %c1536] : memref<8x6272xf32, #tpu.memory_space<vmem>>, vector<8x128xf32>
    tpu.vector_store %arg7[%c0_19, %c1536], %58 {strides = array<i32>} : memref<8x6272xf32, #tpu.memory_space<vmem>>, vector<8x128xf32>,
    %60 = vector.extract_strided_slice %20 {offsets = [13, 0, 0], sizes = [1, 8, 128], strides = [1, 1, 1]} : vector<49x8x128xf32> to vector<1x8x128xf32>
    %61 = vector.shape_cast %60 : vector<1x8x128xf32> to vector<8x128xf32>
    %c0_20 = arith.constant 0 : index
    %c1664 = arith.constant 1664 : index
    %62 = vector.load %arg7[%c0_20, %c1664] : memref<8x6272xf32, #tpu.memory_space<vmem>>, vector<8x128xf32>
    tpu.vector_store %arg7[%c0_20, %c1664], %61 {strides = array<i32>} : memref<8x6272xf32, #tpu.memory_space<vmem>>, vector<8x128xf32>,
    %63 = vector.extract_strided_slice %20 {offsets = [14, 0, 0], sizes = [1, 8, 128], strides = [1, 1, 1]} : vector<49x8x128xf32> to vector<1x8x128xf32>
    %64 = vector.shape_cast %63 : vector<1x8x128xf32> to vector<8x128xf32>
    %c0_21 = arith.constant 0 : index
    %c1792 = arith.constant 1792 : index
    %65 = vector.load %arg7[%c0_21, %c1792] : memref<8x6272xf32, #tpu.memory_space<vmem>>, vector<8x128xf32>
    tpu.vector_store %arg7[%c0_21, %c1792], %64 {strides = array<i32>} : memref<8x6272xf32, #tpu.memory_space<vmem>>, vector<8x128xf32>,
    %66 = vector.extract_strided_slice %20 {offsets = [15, 0, 0], sizes = [1, 8, 128], strides = [1, 1, 1]} : vector<49x8x128xf32> to vector<1x8x128xf32>
    %67 = vector.shape_cast %66 : vector<1x8x128xf32> to vector<8x128xf32>
    %c0_22 = arith.constant 0 : index
    %c1920 = arith.constant 1920 : index
    %68 = vector.load %arg7[%c0_22, %c1920] : memref<8x6272xf32, #tpu.memory_space<vmem>>, vector<8x128xf32>
    tpu.vector_store %arg7[%c0_22, %c1920], %67 {strides = array<i32>} : memref<8x6272xf32, #tpu.memory_space<vmem>>, vector<8x128xf32>,
    %69 = vector.extract_strided_slice %20 {offsets = [16, 0, 0], sizes = [1, 8, 128], strides = [1, 1, 1]} : vector<49x8x128xf32> to vector<1x8x128xf32>
    %70 = vector.shape_cast %69 : vector<1x8x128xf32> to vector<8x128xf32>
    %c0_23 = arith.constant 0 : index
    %c2048 = arith.constant 2048 : index
    %71 = vector.load %arg7[%c0_23, %c2048] : memref<8x6272xf32, #tpu.memory_space<vmem>>, vector<8x128xf32>
    tpu.vector_store %arg7[%c0_23, %c2048], %70 {strides = array<i32>} : memref<8x6272xf32, #tpu.memory_space<vmem>>, vector<8x128xf32>,
    %72 = vector.extract_strided_slice %20 {offsets = [17, 0, 0], sizes = [1, 8, 128], strides = [1, 1, 1]} : vector<49x8x128xf32> to vector<1x8x128xf32>
    %73 = vector.shape_cast %72 : vector<1x8x128xf32> to vector<8x128xf32>
    %c0_24 = arith.constant 0 : index
    %c2176 = arith.constant 2176 : index
    %74 = vector.load %arg7[%c0_24, %c2176] : memref<8x6272xf32, #tpu.memory_space<vmem>>, vector<8x128xf32>
    tpu.vector_store %arg7[%c0_24, %c2176], %73 {strides = array<i32>} : memref<8x6272xf32, #tpu.memory_space<vmem>>, vector<8x128xf32>,
    %75 = vector.extract_strided_slice %20 {offsets = [18, 0, 0], sizes = [1, 8, 128], strides = [1, 1, 1]} : vector<49x8x128xf32> to vector<1x8x128xf32>
    %76 = vector.shape_cast %75 : vector<1x8x128xf32> to vector<8x128xf32>
    %c0_25 = arith.constant 0 : index
    %c2304 = arith.constant 2304 : index
    %77 = vector.load %arg7[%c0_25, %c2304] : memref<8x6272xf32, #tpu.memory_space<vmem>>, vector<8x128xf32>
    tpu.vector_store %arg7[%c0_25, %c2304], %76 {strides = array<i32>} : memref<8x6272xf32, #tpu.memory_space<vmem>>, vector<8x128xf32>,
    %78 = vector.extract_strided_slice %20 {offsets = [19, 0, 0], sizes = [1, 8, 128], strides = [1, 1, 1]} : vector<49x8x128xf32> to vector<1x8x128xf32>
    %79 = vector.shape_cast %78 : vector<1x8x128xf32> to vector<8x128xf32>
    %c0_26 = arith.constant 0 : index
    %c2432 = arith.constant 2432 : index
    %80 = vector.load %arg7[%c0_26, %c2432] : memref<8x6272xf32, #tpu.memory_space<vmem>>, vector<8x128xf32>
    tpu.vector_store %arg7[%c0_26, %c2432], %79 {strides = array<i32>} : memref<8x6272xf32, #tpu.memory_space<vmem>>, vector<8x128xf32>,
    %81 = vector.extract_strided_slice %20 {offsets = [20, 0, 0], sizes = [1, 8, 128], strides = [1, 1, 1]} : vector<49x8x128xf32> to vector<1x8x128xf32>
    %82 = vector.shape_cast %81 : vector<1x8x128xf32> to vector<8x128xf32>
    %c0_27 = arith.constant 0 : index
    %c2560 = arith.constant 2560 : index
    %83 = vector.load %arg7[%c0_27, %c2560] : memref<8x6272xf32, #tpu.memory_space<vmem>>, vector<8x128xf32>
    tpu.vector_store %arg7[%c0_27, %c2560], %82 {strides = array<i32>} : memref<8x6272xf32, #tpu.memory_space<vmem>>, vector<8x128xf32>,
    %84 = vector.extract_strided_slice %20 {offsets = [21, 0, 0], sizes = [1, 8, 128], strides = [1, 1, 1]} : vector<49x8x128xf32> to vector<1x8x128xf32>
    %85 = vector.shape_cast %84 : vector<1x8x128xf32> to vector<8x128xf32>
    %c0_28 = arith.constant 0 : index
    %c2688 = arith.constant 2688 : index
    %86 = vector.load %arg7[%c0_28, %c2688] : memref<8x6272xf32, #tpu.memory_space<vmem>>, vector<8x128xf32>
    tpu.vector_store %arg7[%c0_28, %c2688], %85 {strides = array<i32>} : memref<8x6272xf32, #tpu.memory_space<vmem>>, vector<8x128xf32>,
    %87 = vector.extract_strided_slice %20 {offsets = [22, 0, 0], sizes = [1, 8, 128], strides = [1, 1, 1]} : vector<49x8x128xf32> to vector<1x8x128xf32>
    %88 = vector.shape_cast %87 : vector<1x8x128xf32> to vector<8x128xf32>
    %c0_29 = arith.constant 0 : index
    %c2816 = arith.constant 2816 : index
    %89 = vector.load %arg7[%c0_29, %c2816] : memref<8x6272xf32, #tpu.memory_space<vmem>>, vector<8x128xf32>
    tpu.vector_store %arg7[%c0_29, %c2816], %88 {strides = array<i32>} : memref<8x6272xf32, #tpu.memory_space<vmem>>, vector<8x128xf32>,
    %90 = vector.extract_strided_slice %20 {offsets = [23, 0, 0], sizes = [1, 8, 128], strides = [1, 1, 1]} : vector<49x8x128xf32> to vector<1x8x128xf32>
    %91 = vector.shape_cast %90 : vector<1x8x128xf32> to vector<8x128xf32>
    %c0_30 = arith.constant 0 : index
    %c2944 = arith.constant 2944 : index
    %92 = vector.load %arg7[%c0_30, %c2944] : memref<8x6272xf32, #tpu.memory_space<vmem>>, vector<8x128xf32>
    tpu.vector_store %arg7[%c0_30, %c2944], %91 {strides = array<i32>} : memref<8x6272xf32, #tpu.memory_space<vmem>>, vector<8x128xf32>,
    %93 = vector.extract_strided_slice %20 {offsets = [24, 0, 0], sizes = [1, 8, 128], strides = [1, 1, 1]} : vector<49x8x128xf32> to vector<1x8x128xf32>
    %94 = vector.shape_cast %93 : vector<1x8x128xf32> to vector<8x128xf32>
    %c0_31 = arith.constant 0 : index
    %c3072 = arith.constant 3072 : index
    %95 = vector.load %arg7[%c0_31, %c3072] : memref<8x6272xf32, #tpu.memory_space<vmem>>, vector<8x128xf32>
    tpu.vector_store %arg7[%c0_31, %c3072], %94 {strides = array<i32>} : memref<8x6272xf32, #tpu.memory_space<vmem>>, vector<8x128xf32>,
    %96 = vector.extract_strided_slice %20 {offsets = [25, 0, 0], sizes = [1, 8, 128], strides = [1, 1, 1]} : vector<49x8x128xf32> to vector<1x8x128xf32>
    %97 = vector.shape_cast %96 : vector<1x8x128xf32> to vector<8x128xf32>
    %c0_32 = arith.constant 0 : index
    %c3200 = arith.constant 3200 : index
    %98 = vector.load %arg7[%c0_32, %c3200] : memref<8x6272xf32, #tpu.memory_space<vmem>>, vector<8x128xf32>
    tpu.vector_store %arg7[%c0_32, %c3200], %97 {strides = array<i32>} : memref<8x6272xf32, #tpu.memory_space<vmem>>, vector<8x128xf32>,
    %99 = vector.extract_strided_slice %20 {offsets = [26, 0, 0], sizes = [1, 8, 128], strides = [1, 1, 1]} : vector<49x8x128xf32> to vector<1x8x128xf32>
    %100 = vector.shape_cast %99 : vector<1x8x128xf32> to vector<8x128xf32>
    %c0_33 = arith.constant 0 : index
    %c3328 = arith.constant 3328 : index
    %101 = vector.load %arg7[%c0_33, %c3328] : memref<8x6272xf32, #tpu.memory_space<vmem>>, vector<8x128xf32>
    tpu.vector_store %arg7[%c0_33, %c3328], %100 {strides = array<i32>} : memref<8x6272xf32, #tpu.memory_space<vmem>>, vector<8x128xf32>,
    %102 = vector.extract_strided_slice %20 {offsets = [27, 0, 0], sizes = [1, 8, 128], strides = [1, 1, 1]} : vector<49x8x128xf32> to vector<1x8x128xf32>
    %103 = vector.shape_cast %102 : vector<1x8x128xf32> to vector<8x128xf32>
    %c0_34 = arith.constant 0 : index
    %c3456 = arith.constant 3456 : index
    %104 = vector.load %arg7[%c0_34, %c3456] : memref<8x6272xf32, #tpu.memory_space<vmem>>, vector<8x128xf32>
    tpu.vector_store %arg7[%c0_34, %c3456], %103 {strides = array<i32>} : memref<8x6272xf32, #tpu.memory_space<vmem>>, vector<8x128xf32>,
    %105 = vector.extract_strided_slice %20 {offsets = [28, 0, 0], sizes = [1, 8, 128], strides = [1, 1, 1]} : vector<49x8x128xf32> to vector<1x8x128xf32>
    %106 = vector.shape_cast %105 : vector<1x8x128xf32> to vector<8x128xf32>
    %c0_35 = arith.constant 0 : index
    %c3584 = arith.constant 3584 : index
    %107 = vector.load %arg7[%c0_35, %c3584] : memref<8x6272xf32, #tpu.memory_space<vmem>>, vector<8x128xf32>
    tpu.vector_store %arg7[%c0_35, %c3584], %106 {strides = array<i32>} : memref<8x6272xf32, #tpu.memory_space<vmem>>, vector<8x128xf32>,
    %108 = vector.extract_strided_slice %20 {offsets = [29, 0, 0], sizes = [1, 8, 128], strides = [1, 1, 1]} : vector<49x8x128xf32> to vector<1x8x128xf32>
    %109 = vector.shape_cast %108 : vector<1x8x128xf32> to vector<8x128xf32>
    %c0_36 = arith.constant 0 : index
    %c3712 = arith.constant 3712 : index
    %110 = vector.load %arg7[%c0_36, %c3712] : memref<8x6272xf32, #tpu.memory_space<vmem>>, vector<8x128xf32>
    tpu.vector_store %arg7[%c0_36, %c3712], %109 {strides = array<i32>} : memref<8x6272xf32, #tpu.memory_space<vmem>>, vector<8x128xf32>,
    %111 = vector.extract_strided_slice %20 {offsets = [30, 0, 0], sizes = [1, 8, 128], strides = [1, 1, 1]} : vector<49x8x128xf32> to vector<1x8x128xf32>
    %112 = vector.shape_cast %111 : vector<1x8x128xf32> to vector<8x128xf32>
    %c0_37 = arith.constant 0 : index
    %c3840 = arith.constant 3840 : index
    %113 = vector.load %arg7[%c0_37, %c3840] : memref<8x6272xf32, #tpu.memory_space<vmem>>, vector<8x128xf32>
    tpu.vector_store %arg7[%c0_37, %c3840], %112 {strides = array<i32>} : memref<8x6272xf32, #tpu.memory_space<vmem>>, vector<8x128xf32>,
    %114 = vector.extract_strided_slice %20 {offsets = [31, 0, 0], sizes = [1, 8, 128], strides = [1, 1, 1]} : vector<49x8x128xf32> to vector<1x8x128xf32>
    %115 = vector.shape_cast %114 : vector<1x8x128xf32> to vector<8x128xf32>
    %c0_38 = arith.constant 0 : index
    %c3968 = arith.constant 3968 : index
    %116 = vector.load %arg7[%c0_38, %c3968] : memref<8x6272xf32, #tpu.memory_space<vmem>>, vector<8x128xf32>
    tpu.vector_store %arg7[%c0_38, %c3968], %115 {strides = array<i32>} : memref<8x6272xf32, #tpu.memory_space<vmem>>, vector<8x128xf32>,
    %117 = vector.extract_strided_slice %20 {offsets = [32, 0, 0], sizes = [1, 8, 128], strides = [1, 1, 1]} : vector<49x8x128xf32> to vector<1x8x128xf32>
    %118 = vector.shape_cast %117 : vector<1x8x128xf32> to vector<8x128xf32>
    %c0_39 = arith.constant 0 : index
    %c4096 = arith.constant 4096 : index
    %119 = vector.load %arg7[%c0_39, %c4096] : memref<8x6272xf32, #tpu.memory_space<vmem>>, vector<8x128xf32>
    tpu.vector_store %arg7[%c0_39, %c4096], %118 {strides = array<i32>} : memref<8x6272xf32, #tpu.memory_space<vmem>>, vector<8x128xf32>,
    %120 = vector.extract_strided_slice %20 {offsets = [33, 0, 0], sizes = [1, 8, 128], strides = [1, 1, 1]} : vector<49x8x128xf32> to vector<1x8x128xf32>
    %121 = vector.shape_cast %120 : vector<1x8x128xf32> to vector<8x128xf32>
    %c0_40 = arith.constant 0 : index
    %c4224 = arith.constant 4224 : index
    %122 = vector.load %arg7[%c0_40, %c4224] : memref<8x6272xf32, #tpu.memory_space<vmem>>, vector<8x128xf32>
    tpu.vector_store %arg7[%c0_40, %c4224], %121 {strides = array<i32>} : memref<8x6272xf32, #tpu.memory_space<vmem>>, vector<8x128xf32>,
    %123 = vector.extract_strided_slice %20 {offsets = [34, 0, 0], sizes = [1, 8, 128], strides = [1, 1, 1]} : vector<49x8x128xf32> to vector<1x8x128xf32>
    %124 = vector.shape_cast %123 : vector<1x8x128xf32> to vector<8x128xf32>
    %c0_41 = arith.constant 0 : index
    %c4352 = arith.constant 4352 : index
    %125 = vector.load %arg7[%c0_41, %c4352] : memref<8x6272xf32, #tpu.memory_space<vmem>>, vector<8x128xf32>
    tpu.vector_store %arg7[%c0_41, %c4352], %124 {strides = array<i32>} : memref<8x6272xf32, #tpu.memory_space<vmem>>, vector<8x128xf32>,
    %126 = vector.extract_strided_slice %20 {offsets = [35, 0, 0], sizes = [1, 8, 128], strides = [1, 1, 1]} : vector<49x8x128xf32> to vector<1x8x128xf32>
    %127 = vector.shape_cast %126 : vector<1x8x128xf32> to vector<8x128xf32>
    %c0_42 = arith.constant 0 : index
    %c4480 = arith.constant 4480 : index
    %128 = vector.load %arg7[%c0_42, %c4480] : memref<8x6272xf32, #tpu.memory_space<vmem>>, vector<8x128xf32>
    tpu.vector_store %arg7[%c0_42, %c4480], %127 {strides = array<i32>} : memref<8x6272xf32, #tpu.memory_space<vmem>>, vector<8x128xf32>,
    %129 = vector.extract_strided_slice %20 {offsets = [36, 0, 0], sizes = [1, 8, 128], strides = [1, 1, 1]} : vector<49x8x128xf32> to vector<1x8x128xf32>
    %130 = vector.shape_cast %129 : vector<1x8x128xf32> to vector<8x128xf32>
    %c0_43 = arith.constant 0 : index
    %c4608 = arith.constant 4608 : index
    %131 = vector.load %arg7[%c0_43, %c4608] : memref<8x6272xf32, #tpu.memory_space<vmem>>, vector<8x128xf32>
    tpu.vector_store %arg7[%c0_43, %c4608], %130 {strides = array<i32>} : memref<8x6272xf32, #tpu.memory_space<vmem>>, vector<8x128xf32>,
    %132 = vector.extract_strided_slice %20 {offsets = [37, 0, 0], sizes = [1, 8, 128], strides = [1, 1, 1]} : vector<49x8x128xf32> to vector<1x8x128xf32>
    %133 = vector.shape_cast %132 : vector<1x8x128xf32> to vector<8x128xf32>
    %c0_44 = arith.constant 0 : index
    %c4736 = arith.constant 4736 : index
    %134 = vector.load %arg7[%c0_44, %c4736] : memref<8x6272xf32, #tpu.memory_space<vmem>>, vector<8x128xf32>
    tpu.vector_store %arg7[%c0_44, %c4736], %133 {strides = array<i32>} : memref<8x6272xf32, #tpu.memory_space<vmem>>, vector<8x128xf32>,
    %135 = vector.extract_strided_slice %20 {offsets = [38, 0, 0], sizes = [1, 8, 128], strides = [1, 1, 1]} : vector<49x8x128xf32> to vector<1x8x128xf32>
    %136 = vector.shape_cast %135 : vector<1x8x128xf32> to vector<8x128xf32>
    %c0_45 = arith.constant 0 : index
    %c4864 = arith.constant 4864 : index
    %137 = vector.load %arg7[%c0_45, %c4864] : memref<8x6272xf32, #tpu.memory_space<vmem>>, vector<8x128xf32>
    tpu.vector_store %arg7[%c0_45, %c4864], %136 {strides = array<i32>} : memref<8x6272xf32, #tpu.memory_space<vmem>>, vector<8x128xf32>,
    %138 = vector.extract_strided_slice %20 {offsets = [39, 0, 0], sizes = [1, 8, 128], strides = [1, 1, 1]} : vector<49x8x128xf32> to vector<1x8x128xf32>
    %139 = vector.shape_cast %138 : vector<1x8x128xf32> to vector<8x128xf32>
    %c0_46 = arith.constant 0 : index
    %c4992 = arith.constant 4992 : index
    %140 = vector.load %arg7[%c0_46, %c4992] : memref<8x6272xf32, #tpu.memory_space<vmem>>, vector<8x128xf32>
    tpu.vector_store %arg7[%c0_46, %c4992], %139 {strides = array<i32>} : memref<8x6272xf32, #tpu.memory_space<vmem>>, vector<8x128xf32>,
    %141 = vector.extract_strided_slice %20 {offsets = [40, 0, 0], sizes = [1, 8, 128], strides = [1, 1, 1]} : vector<49x8x128xf32> to vector<1x8x128xf32>
    %142 = vector.shape_cast %141 : vector<1x8x128xf32> to vector<8x128xf32>
    %c0_47 = arith.constant 0 : index
    %c5120 = arith.constant 5120 : index
    %143 = vector.load %arg7[%c0_47, %c5120] : memref<8x6272xf32, #tpu.memory_space<vmem>>, vector<8x128xf32>
    tpu.vector_store %arg7[%c0_47, %c5120], %142 {strides = array<i32>} : memref<8x6272xf32, #tpu.memory_space<vmem>>, vector<8x128xf32>,
    %144 = vector.extract_strided_slice %20 {offsets = [41, 0, 0], sizes = [1, 8, 128], strides = [1, 1, 1]} : vector<49x8x128xf32> to vector<1x8x128xf32>
    %145 = vector.shape_cast %144 : vector<1x8x128xf32> to vector<8x128xf32>
    %c0_48 = arith.constant 0 : index
    %c5248 = arith.constant 5248 : index
    %146 = vector.load %arg7[%c0_48, %c5248] : memref<8x6272xf32, #tpu.memory_space<vmem>>, vector<8x128xf32>
    tpu.vector_store %arg7[%c0_48, %c5248], %145 {strides = array<i32>} : memref<8x6272xf32, #tpu.memory_space<vmem>>, vector<8x128xf32>,
    %147 = vector.extract_strided_slice %20 {offsets = [42, 0, 0], sizes = [1, 8, 128], strides = [1, 1, 1]} : vector<49x8x128xf32> to vector<1x8x128xf32>
    %148 = vector.shape_cast %147 : vector<1x8x128xf32> to vector<8x128xf32>
    %c0_49 = arith.constant 0 : index
    %c5376 = arith.constant 5376 : index
    %149 = vector.load %arg7[%c0_49, %c5376] : memref<8x6272xf32, #tpu.memory_space<vmem>>, vector<8x128xf32>
    tpu.vector_store %arg7[%c0_49, %c5376], %148 {strides = array<i32>} : memref<8x6272xf32, #tpu.memory_space<vmem>>, vector<8x128xf32>,
    %150 = vector.extract_strided_slice %20 {offsets = [43, 0, 0], sizes = [1, 8, 128], strides = [1, 1, 1]} : vector<49x8x128xf32> to vector<1x8x128xf32>
    %151 = vector.shape_cast %150 : vector<1x8x128xf32> to vector<8x128xf32>
    %c0_50 = arith.constant 0 : index
    %c5504 = arith.constant 5504 : index
    %152 = vector.load %arg7[%c0_50, %c5504] : memref<8x6272xf32, #tpu.memory_space<vmem>>, vector<8x128xf32>
    tpu.vector_store %arg7[%c0_50, %c5504], %151 {strides = array<i32>} : memref<8x6272xf32, #tpu.memory_space<vmem>>, vector<8x128xf32>,
    %153 = vector.extract_strided_slice %20 {offsets = [44, 0, 0], sizes = [1, 8, 128], strides = [1, 1, 1]} : vector<49x8x128xf32> to vector<1x8x128xf32>
    %154 = vector.shape_cast %153 : vector<1x8x128xf32> to vector<8x128xf32>
    %c0_51 = arith.constant 0 : index
    %c5632 = arith.constant 5632 : index
    %155 = vector.load %arg7[%c0_51, %c5632] : memref<8x6272xf32, #tpu.memory_space<vmem>>, vector<8x128xf32>
    tpu.vector_store %arg7[%c0_51, %c5632], %154 {strides = array<i32>} : memref<8x6272xf32, #tpu.memory_space<vmem>>, vector<8x128xf32>,
    %156 = vector.extract_strided_slice %20 {offsets = [45, 0, 0], sizes = [1, 8, 128], strides = [1, 1, 1]} : vector<49x8x128xf32> to vector<1x8x128xf32>
    %157 = vector.shape_cast %156 : vector<1x8x128xf32> to vector<8x128xf32>
    %c0_52 = arith.constant 0 : index
    %c5760 = arith.constant 5760 : index
    %158 = vector.load %arg7[%c0_52, %c5760] : memref<8x6272xf32, #tpu.memory_space<vmem>>, vector<8x128xf32>
    tpu.vector_store %arg7[%c0_52, %c5760], %157 {strides = array<i32>} : memref<8x6272xf32, #tpu.memory_space<vmem>>, vector<8x128xf32>,
    %159 = vector.extract_strided_slice %20 {offsets = [46, 0, 0], sizes = [1, 8, 128], strides = [1, 1, 1]} : vector<49x8x128xf32> to vector<1x8x128xf32>
    %160 = vector.shape_cast %159 : vector<1x8x128xf32> to vector<8x128xf32>
    %c0_53 = arith.constant 0 : index
    %c5888 = arith.constant 5888 : index
    %161 = vector.load %arg7[%c0_53, %c5888] : memref<8x6272xf32, #tpu.memory_space<vmem>>, vector<8x128xf32>
    tpu.vector_store %arg7[%c0_53, %c5888], %160 {strides = array<i32>} : memref<8x6272xf32, #tpu.memory_space<vmem>>, vector<8x128xf32>,
    %162 = vector.extract_strided_slice %20 {offsets = [47, 0, 0], sizes = [1, 8, 128], strides = [1, 1, 1]} : vector<49x8x128xf32> to vector<1x8x128xf32>
    %163 = vector.shape_cast %162 : vector<1x8x128xf32> to vector<8x128xf32>
    %c0_54 = arith.constant 0 : index
    %c6016 = arith.constant 6016 : index
    %164 = vector.load %arg7[%c0_54, %c6016] : memref<8x6272xf32, #tpu.memory_space<vmem>>, vector<8x128xf32>
    tpu.vector_store %arg7[%c0_54, %c6016], %163 {strides = array<i32>} : memref<8x6272xf32, #tpu.memory_space<vmem>>, vector<8x128xf32>,
    %165 = vector.extract_strided_slice %20 {offsets = [48, 0, 0], sizes = [1, 8, 128], strides = [1, 1, 1]} : vector<49x8x128xf32> to vector<1x8x128xf32>
    %166 = vector.shape_cast %165 : vector<1x8x128xf32> to vector<8x128xf32>
    %c0_55 = arith.constant 0 : index
    %c6144 = arith.constant 6144 : index
    %167 = vector.load %arg7[%c0_55, %c6144] : memref<8x6272xf32, #tpu.memory_space<vmem>>, vector<8x128xf32>
    tpu.vector_store %arg7[%c0_55, %c6144], %166 {strides = array<i32>} : memref<8x6272xf32, #tpu.memory_space<vmem>>, vector<8x128xf32>,
    %c0_56 = arith.constant 0 : index
    %c0_57 = arith.constant 0 : index
    %168 = vector.load %arg7[%c0_56, %c0_57] : memref<8x6272xf32, #tpu.memory_space<vmem>>, vector<8x6272xf32>
    %c0_58 = arith.constant 0 : index
    %c0_59 = arith.constant 0 : index
    %169 = vector.load %arg4[%c0_58, %c0_59] : memref<6272x128xf32, #tpu.memory_space<vmem>>, vector<6272x128xf32>
    %cst_60 = arith.constant dense<0.000000e+00> : vector<8x128xf32>
    %170 = tpu.matmul %168, %169, %cst_60 {dimension_numbers = #tpu.dot_dimension_numbers<[1], [0], [0], [1], [0, 0, 1, 1], [], []>} : vector<8x6272xf32>, vector<6272x128xf32>, vector<8x128xf32> -> vector<8x128xf32>
    %c0_61 = arith.constant 0 : index
    %c0_62 = arith.constant 0 : index
    %171 = vector.load %arg5[%c0_61, %c0_62] : memref<1x128xf32, #tpu.memory_space<vmem>>, vector<1x128xf32>
    %172 = vector.broadcast %171 : vector<1x128xf32> to vector<8x128xf32>
    %173 = arith.addf %170, %172 : vector<8x128xf32>
    %c0_63 = arith.constant 0 : index
    %c0_64 = arith.constant 0 : index
    %174 = vector.load %arg6[%c0_63, %c0_64] : memref<8x128xf32, #tpu.memory_space<vmem>>, vector<8x128xf32>
    tpu.vector_store %arg6[%c0_63, %c0_64], %173 {strides = array<i32>} : memref<8x128xf32, #tpu.memory_space<vmem>>, vector<8x128xf32>,
    return
  }
  func.func @transform_0(%arg0: i32) -> (i32, i32) {
    %c0_i32 = arith.constant 0 : i32
    %c0_i32_0 = arith.constant 0 : i32
    %c0_i32_1 = arith.constant 0 : i32
    return %c0_i32, %c0_i32_0 : i32, i32
  }
  func.func @transform_1(%arg0: i32) -> (i32, i32) {
    %c0_i32 = arith.constant 0 : i32
    %c0_i32_0 = arith.constant 0 : i32
    %c0_i32_1 = arith.constant 0 : i32
    return %c0_i32, %c0_i32_0 : i32, i32
  }
  func.func @transform_2(%arg0: i32) -> (i32, i32) {
    %c0_i32 = arith.constant 0 : i32
    %c0_i32_0 = arith.constant 0 : i32
    %c0_i32_1 = arith.constant 0 : i32
    return %c0_i32, %c0_i32_0 : i32, i32
  }
  func.func @transform_3(%arg0: i32) -> (i32, i32) {
    %c0_i32 = arith.constant 0 : i32
    %c0_i32_0 = arith.constant 0 : i32
    %c0_i32_1 = arith.constant 0 : i32
    return %c0_i32, %c0_i32_0 : i32, i32
  }
  func.func @transform_4(%arg0: i32) -> (i32, i32) {
    %c0_i32 = arith.constant 0 : i32
    %c0_i32_0 = arith.constant 0 : i32
    %c0_i32_1 = arith.constant 0 : i32
    return %c0_i32, %c0_i32_0 : i32, i32
  }
  func.func @transform_5(%arg0: i32) -> (i32, i32) {
    %c0_i32 = arith.constant 0 : i32
    %c0_i32_0 = arith.constant 0 : i32
    %c0_i32_1 = arith.constant 0 : i32
    return %c0_i32, %c0_i32_0 : i32, i32
  }
}

</mosaic_0001>

<bundles_post_ra>
// kernel: text_cnn_forward.1
= control target key start
LH: loop header
LB: loop body
LE: loop exit
PB: predicated region body
PF: predicated region fallthrough
CT: control target
= control target key end

     0   :  { %s7075_s1 = inlined_call_operand.vmem [shape: bf16[128,384], index: 1, kind: input, shape index: {}]   ;;  %s7076_s0 = inlined_call_operand.vmem [shape: bf16[800,128], index: 0, kind: input, shape index: {}]   ;;  %s7077_s2 = inlined_call_operand.vmem [shape: f32[1,128], index: 2, kind: input, shape index: {}]   ;;  %s7078_s3 = inlined_call_operand.vmem [shape: f32[6272,128], index: 3, kind: input, shape index: {}]   ;;  %s7079_s4 = inlined_call_operand.vmem [shape: f32[1,128], index: 4, kind: input, shape index: {}]   ;;  %s7080_s5 = inlined_call_operand.vmem [shape: f32[8,128], index: 5, kind: output, shape index: {}]  }
   0x1   :  { %v3953_v0 = vld [vmem:[%s7075_s1 + $0xa8] sm:$0xf]  ;;  %v4035_v1 = vld [vmem:[%s7075_s1 + $0xb0] sm:$0xf0]  ;;  %v4034_v2 = vld [vmem:[%s7075_s1 + $0xac] sm:$0xf] }
   0x2   :  { %v3954_v3 = vor.u32 %v4035_v1, %v3953_v0  ;;  %v3955_v4 = vld [vmem:[%s7075_s1 + $0xb4] sm:$0xf0]  ;;  %v3961_v5 = vld [vmem:[%s7075_s1 + $0xb0] sm:$0xf]  ;;  %v4036_v6 = vld [vmem:[%s7075_s1 + $0xb8] sm:$0xf0] }
   0x3   :  { %v3958_v7 = vor.u32 %v4034_v2, %v3955_v4  ;;  %v3962_v8 = vor.u32 %v4036_v6, %v3961_v5  ;;  %v3941_v9 = vld [vmem:[%s7075_s1 + $0x90] sm:$0xf]  ;;  %v4032_v10 = vld [vmem:[%s7075_s1 + $0x98] sm:$0xf0]  ;;  %v4031_v11 = vld [vmem:[%s7075_s1 + $0x94] sm:$0xf] }
   0x4   :  { %580 = vmatpush.bf16.msra.mxu0 %v3954_v3  ;;  %v3942_v12 = vor.u32 %v4032_v10, %v3941_v9  ;;  %v3943_v13 = vld [vmem:[%s7075_s1 + $0x9c] sm:$0xf0]  ;;  %v3949_v14 = vld [vmem:[%s7075_s1 + $0x98] sm:$0xf]  ;;  %v4033_v15 = vld [vmem:[%s7075_s1 + $0xa0] sm:$0xf0] }
   0x5   :  { %837 = vmatpush.bf16.msra.mxu1 %v3958_v7  ;;  %1094 = vmatpush.bf16.msra.mxu2 %v3962_v8  ;;  %v3946_v16 = vor.u32 %v4031_v11, %v3943_v13  ;;  %v3950_v17 = vor.u32 %v4033_v15, %v3949_v14  ;;  %v3929_v18 = vld [vmem:[%s7075_s1 + $0x78] sm:$0xf]  ;;  %v4029_v19 = vld [vmem:[%s7075_s1 + $0x80] sm:$0xf0]  ;;  %v4028_v20 = vld [vmem:[%s7075_s1 + $0x7c] sm:$0xf] }
   0x6   :  { %v3931_v21 = vld [vmem:[%s7075_s1 + $0x84] sm:$0xf0]  ;;  %v3937_v22 = vld [vmem:[%s7075_s1 + $0x80] sm:$0xf]  ;;  %v4030_v23 = vld [vmem:[%s7075_s1 + $0x88] sm:$0xf0]  ;;  %v3930_v24 = vor.u32 %v4029_v19, %v3929_v18 }
   0x7   :  { %v3934_v25 = vor.u32 %v4028_v20, %v3931_v21  ;;  %v3938_v26 = vor.u32 %v4030_v23, %v3937_v22  ;;  %v3917_v27 = vld [vmem:[%s7075_s1 + $0x60] sm:$0xf]  ;;  %v4026_v28 = vld [vmem:[%s7075_s1 + $0x68] sm:$0xf0]  ;;  %v4025_v29 = vld [vmem:[%s7075_s1 + $0x64] sm:$0xf] }
   0x8   :  { %581 = vmatpush.bf16.msra.mxu0 %v3942_v12  ;;  %v3919_v30 = vld [vmem:[%s7075_s1 + $0x6c] sm:$0xf0]  ;;  %v3925_v31 = vld [vmem:[%s7075_s1 + $0x68] sm:$0xf]  ;;  %v4027_v32 = vld [vmem:[%s7075_s1 + $0x70] sm:$0xf0]  ;;  %v3918_v33 = vor.u32 %v4026_v28, %v3917_v27 }
   0x9   :  { %838 = vmatpush.bf16.msra.mxu1 %v3946_v16  ;;  %1095 = vmatpush.bf16.msra.mxu2 %v3950_v17  ;;  %v3922_v34 = vor.u32 %v4025_v29, %v3919_v30  ;;  %v3926_v35 = vor.u32 %v4027_v32, %v3925_v31  ;;  %v3905_v36 = vld [vmem:[%s7075_s1 + $0x48] sm:$0xf]  ;;  %v4023_v37 = vld [vmem:[%s7075_s1 + $0x50] sm:$0xf0]  ;;  %v4022_v38 = vld [vmem:[%s7075_s1 + $0x4c] sm:$0xf] }
   0xa   :  { %v3907_v39 = vld [vmem:[%s7075_s1 + $0x54] sm:$0xf0]  ;;  %v3913_v40 = vld [vmem:[%s7075_s1 + $0x50] sm:$0xf]  ;;  %v4024_v41 = vld [vmem:[%s7075_s1 + $0x58] sm:$0xf0]  ;;  %v3906_v42 = vor.u32 %v4023_v37, %v3905_v36 }
   0xb   :  { %v3910_v43 = vor.u32 %v4022_v38, %v3907_v39  ;;  %v3914_v44 = vor.u32 %v4024_v41, %v3913_v40  ;;  %v3893_v45 = vld [vmem:[%s7075_s1 + $0x30] sm:$0xf]  ;;  %v4020_v46 = vld [vmem:[%s7075_s1 + $0x38] sm:$0xf0]  ;;  %v4019_v47 = vld [vmem:[%s7075_s1 + $0x34] sm:$0xf] }
   0xc   :  { %582 = vmatpush.bf16.msra.mxu0 %v3930_v24  ;;  %v3895_v48 = vld [vmem:[%s7075_s1 + $0x3c] sm:$0xf0]  ;;  %v3901_v49 = vld [vmem:[%s7075_s1 + $0x38] sm:$0xf]  ;;  %v4021_v50 = vld [vmem:[%s7075_s1 + $0x40] sm:$0xf0]  ;;  %v3894_v51 = vor.u32 %v4020_v46, %v3893_v45 }
   0xd   :  { %839 = vmatpush.bf16.msra.mxu1 %v3934_v25  ;;  %1096 = vmatpush.bf16.msra.mxu2 %v3938_v26  ;;  %v3898_v52 = vor.u32 %v4019_v47, %v3895_v48  ;;  %v3902_v53 = vor.u32 %v4021_v50, %v3901_v49  ;;  %v3881_v54 = vld [vmem:[%s7075_s1 + $0x18] sm:$0xf]  ;;  %v4017_v55 = vld [vmem:[%s7075_s1 + $0x20] sm:$0xf0]  ;;  %v4016_v56 = vld [vmem:[%s7075_s1 + $0x1c] sm:$0xf] }
   0xe   :  { %v3883_v57 = vld [vmem:[%s7075_s1 + $0x24] sm:$0xf0]  ;;  %v3889_v58 = vld [vmem:[%s7075_s1 + $0x20] sm:$0xf]  ;;  %v4018_v59 = vld [vmem:[%s7075_s1 + $0x28] sm:$0xf0]  ;;  %v3882_v60 = vor.u32 %v4017_v55, %v3881_v54 }
   0xf   :  { %v3886_v61 = vor.u32 %v4016_v56, %v3883_v57  ;;  %v3890_v62 = vor.u32 %v4018_v59, %v3889_v58  ;;  %v3869_v63 = vld [vmem:[%s7075_s1] sm:$0xf]  ;;  %v4014_v0 = vld [vmem:[%s7075_s1 + $0x8] sm:$0xf0]  ;;  %v4013_v1 = vld [vmem:[%s7075_s1 + $0x4] sm:$0xf] }
  0x10   :  { %583 = vmatpush.bf16.msra.mxu0 %v3918_v33  ;;  %v3871_v2 = vld [vmem:[%s7075_s1 + $0xc] sm:$0xf0]  ;;  %v3877_v3 = vld [vmem:[%s7075_s1 + $0x8] sm:$0xf]  ;;  %v4015_v4 = vld [vmem:[%s7075_s1 + $0x10] sm:$0xf0]  ;;  %v3870_v5 = vor.u32 %v4014_v0, %v3869_v63 }
  0x11   :  { %840 = vmatpush.bf16.msra.mxu1 %v3922_v34  ;;  %1097 = vmatpush.bf16.msra.mxu2 %v3926_v35  ;;  %v3874_v6 = vor.u32 %v4013_v1, %v3871_v2  ;;  %v3878_v7 = vor.u32 %v4015_v4, %v3877_v3  ;;  %v3963_v8 = vld [vmem:[%s7076_s0] sm:$0xff]  ;;  %v3964_v9 = vld [vmem:[%s7076_s0 + $0x8] sm:$0xff]  ;;  %v3965_v10 = vld [vmem:[%s7076_s0 + $0x10] sm:$0xff] }
  0x12   :  { %v3966_v11 = vld [vmem:[%s7076_s0 + $0x18] sm:$0xff]  ;;  %v3967_v12 = vld [vmem:[%s7076_s0 + $0x20] sm:$0xff]  ;;  %v1908_v14 = vld [vmem:[%s7078_s3 + $0x70] sm:$0xff] }
  0x13   :  { %v1909_v13 = vld [vmem:[%s7078_s3 + $0x78] sm:$0xff]  ;;  %v1907_v15 = vld [vmem:[%s7078_s3 + $0x68] sm:$0xff]  ;;  %v1906_v16 = vld [vmem:[%s7078_s3 + $0x60] sm:$0xff] }
  0x14   :  { %584 = vmatpush.bf16.msra.mxu0 %v3906_v42  ;;  %2682 = vmatpush.msra.mxu3 %v1909_v13  ;;  %v1905_v17 = vld [vmem:[%s7078_s3 + $0x58] sm:$0xff]  ;;  %v3968_v18 = vld [vmem:[%s7076_s0 + $0x28] sm:$0xff]  ;;  %v1904_v19 = vld [vmem:[%s7078_s3 + $0x50] sm:$0xff] }
  0x15   :  { %841 = vmatpush.bf16.msra.mxu1 %v3910_v43  ;;  %1098 = vmatpush.bf16.msra.mxu2 %v3914_v44  ;;  %v1903_v20 = vld [vmem:[%s7078_s3 + $0x48] sm:$0xff]  ;;  %v1902_v21 = vld [vmem:[%s7078_s3 + $0x40] sm:$0xff]  ;;  %v1901_v22 = vld [vmem:[%s7078_s3 + $0x38] sm:$0xff] }
  0x16   :  { %2683 = vmatpush.msra.mxu3 %v1908_v14  ;;  %v1900_v23 = vld [vmem:[%s7078_s3 + $0x30] sm:$0xff]  ;;  %v1899_v24 = vld [vmem:[%s7078_s3 + $0x28] sm:$0xff]  ;;  %v1898_v25 = vld [vmem:[%s7078_s3 + $0x20] sm:$0xff] }
  0x17   :  { %v3969_v26 = vld [vmem:[%s7076_s0 + $0x30] sm:$0xff]  ;;  %v1897_v27 = vld [vmem:[%s7078_s3 + $0x18] sm:$0xff]  ;;  %v1895_v29 = vld [vmem:[%s7078_s3 + $0x8] sm:$0xff] }
  0x18   :  { %585 = vmatpush.bf16.msra.mxu0 %v3894_v51  ;;  %2684 = vmatpush.msra.mxu3 %v1907_v15  ;;  %v1896_v28 = vld [vmem:[%s7078_s3 + $0x10] sm:$0xff]  ;;  %v1894_v30 = vld [vmem:[%s7078_s3] sm:$0xff]  ;;  %v1925_v31 = vld [vmem:[%s7078_s3 + $0xf8] sm:$0xff] }
  0x19   :  { %842 = vmatpush.bf16.msra.mxu1 %v3898_v52  ;;  %1099 = vmatpush.bf16.msra.mxu2 %v3902_v53  ;;  %v1924_v32 = vld [vmem:[%s7078_s3 + $0xf0] sm:$0xff]  ;;  %v1923_v33 = vld [vmem:[%s7078_s3 + $0xe8] sm:$0xff]  ;;  %v1922_v34 = vld [vmem:[%s7078_s3 + $0xe0] sm:$0xff] }
  0x1a   :  { %2685 = vmatpush.msra.mxu3 %v1906_v16  ;;  %v3970_v35 = vld [vmem:[%s7076_s0 + $0x38] sm:$0xff]  ;;  %v1920_v37 = vld [vmem:[%s7078_s3 + $0xd0] sm:$0xff]  ;;  %v1919_v38 = vld [vmem:[%s7078_s3 + $0xc8] sm:$0xff] }
  0x1b   :  { %v1921_v36 = vld [vmem:[%s7078_s3 + $0xd8] sm:$0xff]  ;;  %v1918_v39 = vld [vmem:[%s7078_s3 + $0xc0] sm:$0xff]  ;;  %v1916_v41 = vld [vmem:[%s7078_s3 + $0xb0] sm:$0xff] }
  0x1c   :  { %586 = vmatpush.bf16.msra.mxu0 %v3882_v60  ;;  %2686 = vmatpush.msra.mxu3 %v1905_v17  ;;  %v1917_v40 = vld [vmem:[%s7078_s3 + $0xb8] sm:$0xff]  ;;  %v1915_v42 = vld [vmem:[%s7078_s3 + $0xa8] sm:$0xff]  ;;  %v1914_v43 = vld [vmem:[%s7078_s3 + $0xa0] sm:$0xff] }
  0x1d   :  { %843 = vmatpush.bf16.msra.mxu1 %v3886_v61  ;;  %1100 = vmatpush.bf16.msra.mxu2 %v3890_v62  ;;  %v3971_v44 = vld [vmem:[%s7076_s0 + $0x40] sm:$0xff]  ;;  %v1913_v46 = vld [vmem:[%s7078_s3 + $0x98] sm:$0xff]  ;;  %v1912_v48 = vld [vmem:[%s7078_s3 + $0x90] sm:$0xff] }
  0x1e   :  { %2687 = vmatpush.msra.mxu3 %v1904_v19  ;;  %v1911_v49 = vld [vmem:[%s7078_s3 + $0x88] sm:$0xff]  ;;  %v1910_v50 = vld [vmem:[%s7078_s3 + $0x80] sm:$0xff]  ;;  %v3973_v2 = vld [vmem:[%s7076_s0 + $0x50] sm:$0xff] }
  0x1f   :  { %v3972_v55 = vld [vmem:[%s7076_s0 + $0x48] sm:$0xff]  ;;  %v4346_v63 = vld [vmem:[%s7077_s2] ss:$0 sm:$0xff]  ;;  %v2309_v13 = vld [vmem:[%s7078_s3 + $0xcf8] sm:$0xff] }
  0x20   :  { %587 = vmatpush.bf16.msra.mxu0 %v3870_v5  ;;  %2688 = vmatpush.msra.mxu3 %v1903_v20  ;;  %v2325_v15 = vld [vmem:[%s7078_s3 + $0xd78] sm:$0xff]  ;;  %v1940_v17 = vld [vmem:[%s7078_s3 + $0x170] sm:$0xff]  ;;  %v1939_v20 = vld [vmem:[%s7078_s3 + $0x168] sm:$0xff] }
  0x21   :  { %844 = vmatpush.bf16.msra.mxu1 %v3874_v6  ;;  %1101 = vmatpush.bf16.msra.mxu2 %v3878_v7 }
  0x22   :  { %2689 = vmatpush.msra.mxu3 %v1902_v21 }
  0x23   :  { %588 = vmatmul.bf16.vlgmr.msra.gmra.mxu0 %v3963_v8 }
  0x24   :  { %845 = vmatmul.bf16.vlgmr.msra.gmra.mxu1 %v3963_v8  ;;  %1102 = vmatmul.bf16.vlgmr.msra.gmra.mxu2 %v3963_v8 }
  0x25   :  { %2690 = vmatpush.msra.mxu3 %v1901_v22  ;;  %3182 = vmatpush.msrb.mxu0 %v2309_v13 }
  0x26   :  { %3202 = vmatpush.msrb.mxu1 %v2325_v15  ;;  %v1950_v15 = vld [vmem:[%s7078_s3 + $0x1c0] sm:$0xff] }
  0x27   :  { %2691 = vmatpush.msra.mxu3 %v1900_v23  ;;  %v1938_v23 = vld [vmem:[%s7078_s3 + $0x160] sm:$0xff] }
  0x29   :  { %2692 = vmatpush.msra.mxu3 %v1899_v24  ;;  %v1937_v24 = vld [vmem:[%s7078_s3 + $0x158] sm:$0xff] }
  0x2b   :  { %2693 = vmatpush.msra.mxu3 %v1898_v25 }
  0x2d   :  { %2694 = vmatpush.msra.mxu3 %v1897_v27 }
  0x2f   :  { %2695 = vmatpush.msra.mxu3 %v1896_v28 }
  0x31   :  { %2696 = vmatpush.msra.mxu3 %v1895_v29 }
  0x33   :  { %593 = vmatmul.bf16.gmra.mxu0 %v3964_v9  ;;  %2697 = vmatpush.msra.mxu3 %v1894_v30  ;;  %v1936_v30 = vld [vmem:[%s7078_s3 + $0x150] sm:$0xff] }
  0x34   :  { %849 = vmatmul.bf16.gmra.mxu1 %v3964_v9  ;;  %1105 = vmatmul.bf16.gmra.mxu2 %v3964_v9 }
  0x35   :  { %2702 = vmatpush.msrb.mxu3 %v1925_v31 }
  0x37   :  { %2703 = vmatpush.msrb.mxu3 %v1924_v32 }
  0x39   :  { %2704 = vmatpush.msrb.mxu3 %v1923_v33  ;;  %v1935_v33 = vld [vmem:[%s7078_s3 + $0x148] sm:$0xff] }
  0x3b   :  { %2705 = vmatpush.msrb.mxu3 %v1922_v34 }
  0x3d   :  { %2706 = vmatpush.msrb.mxu3 %v1921_v36  ;;  %v1934_v36 = vld [vmem:[%s7078_s3 + $0x140] sm:$0xff] }
  0x3f   :  { %2707 = vmatpush.msrb.mxu3 %v1920_v37 }
  0x41   :  { %2708 = vmatpush.msrb.mxu3 %v1919_v38 }
  0x43   :  { %598 = vmatmul.bf16.gmra.mxu0 %v3965_v10  ;;  %2709 = vmatpush.msrb.mxu3 %v1918_v39  ;;  %v1933_v39 = vld [vmem:[%s7078_s3 + $0x138] sm:$0xff] }
  0x44   :  { %854 = vmatmul.bf16.gmra.mxu1 %v3965_v10  ;;  %1110 = vmatmul.bf16.gmra.mxu2 %v3965_v10 }
  0x45   :  { %2710 = vmatpush.msrb.mxu3 %v1917_v40 }
  0x47   :  { %2711 = vmatpush.msrb.mxu3 %v1916_v41 }
  0x49   :  { %2712 = vmatpush.msrb.mxu3 %v1915_v42  ;;  %v1932_v42 = vld [vmem:[%s7078_s3 + $0x130] sm:$0xff] }
  0x4b   :  { %2713 = vmatpush.msrb.mxu3 %v1914_v43 }
  0x4d   :  { %2714 = vmatpush.msrb.mxu3 %v1913_v46 }
  0x4f   :  { %2715 = vmatpush.msrb.mxu3 %v1912_v48 }
  0x51   :  { %2716 = vmatpush.msrb.mxu3 %v1911_v49  ;;  %v1929_v49 = vld [vmem:[%s7078_s3 + $0x118] sm:$0xff] }
  0x53   :  { %603 = vmatmul.bf16.gmra.mxu0 %v3966_v11  ;;  %2717 = vmatpush.msrb.mxu3 %v1910_v50 }
  0x54   :  { %859 = vmatmul.bf16.gmra.mxu1 %v3966_v11  ;;  %1115 = vmatmul.bf16.gmra.mxu2 %v3966_v11  ;;  %v1941_v11 = vld [vmem:[%s7078_s3 + $0x178] sm:$0xff] }
  0x63   :  { %608 = vmatmul.bf16.gmra.mxu0 %v3967_v12 }
  0x64   :  { %864 = vmatmul.bf16.gmra.mxu1 %v3967_v12  ;;  %1120 = vmatmul.bf16.gmra.mxu2 %v3967_v12  ;;  %v2341_v12 = vld [vmem:[%s7078_s3 + $0xdf8] sm:$0xff] }
  0x65   :  { %3222 = vmatpush.msrb.mxu2 %v2341_v12  ;;  %v1951_v12 = vld [vmem:[%s7078_s3 + $0x1c8] sm:$0xff] }
  0x73   :  { %613 = vmatmul.bf16.gmra.mxu0 %v3968_v18 }
  0x74   :  { %869 = vmatmul.bf16.gmra.mxu1 %v3968_v18  ;;  %1125 = vmatmul.bf16.gmra.mxu2 %v3968_v18 }
  0x83   :  { %618 = vmatmul.bf16.gmra.mxu0 %v3969_v26 }
  0x84   :  { %874 = vmatmul.bf16.gmra.mxu1 %v3969_v26  ;;  %1130 = vmatmul.bf16.gmra.mxu2 %v3969_v26  ;;  %v3974_v26 = vld [vmem:[%s7076_s0 + $0x58] sm:$0xff] }
  0x93   :  { %623 = vmatmul.bf16.gmra.mxu0 %v3970_v35 }
  0x94   :  { %879 = vmatmul.bf16.gmra.mxu1 %v3970_v35  ;;  %1135 = vmatmul.bf16.gmra.mxu2 %v3970_v35 }
  0xa0   :  { %v589_v45 = vpop.f32.mrf.mxu0 }
  0xa1   :  { %v846_v47 = vpop.f32.mrf.mxu1 }
  0xa2   :  { %v1930_v47 = vld [vmem:[%s7078_s3 + $0x120] sm:$0xff] }
  0xa3   :  { %628 = vmatmul.bf16.gmra.mxu0 %v3971_v44 }
  0xa4   :  { %884 = vmatmul.bf16.gmra.mxu1 %v3971_v44  ;;  %1140 = vmatmul.bf16.gmra.mxu2 %v3971_v44 }
  0xa7   :  { %v1103_v51 = vpop.f32.mrf.mxu2 }
  0xa8   :  { %v591_v52 = vpop.f32.mrf.mxu0  ;;  %v3975_v51 = vld [vmem:[%s7076_s0 + $0x60] sm:$0xff] }
  0xa9   :  { %v847_v53 = vpop.f32.mrf.mxu1 }
  0xaa   :  { %v1352_v61 = vadd.f32 %v847_v53, %v589_v45  ;;  %v1931_v45 = vld [vmem:[%s7078_s3 + $0x128] sm:$0xff] }
  0xaf   :  { %v1104_v54 = vpop.f32.mrf.mxu2 }
  0xb0   :  { %v594_v56 = vpop.f32.mrf.mxu0  ;;  %v1928_v54 = vld [vmem:[%s7078_s3 + $0x110] sm:$0xff] }
  0xb1   :  { %v850_v57 = vpop.f32.mrf.mxu1 }
  0xb2   :  { %v1353_v0 = vadd.f32 %v850_v57, %v591_v52 }
  0xb3   :  { %633 = vmatmul.bf16.gmra.mxu0 %v3972_v55 }
  0xb4   :  { %889 = vmatmul.bf16.gmra.mxu1 %v3972_v55  ;;  %1145 = vmatmul.bf16.gmra.mxu2 %v3972_v55 }
  0xb7   :  { %v1106_v58 = vpop.f32.mrf.mxu2 }
  0xb8   :  { %v596_v59 = vpop.f32.mrf.mxu0  ;;  %v1450_v62 = vadd.f32 %v1352_v61, %v1106_v58  ;;  %v1927_v58 = vld [vmem:[%s7078_s3 + $0x108] sm:$0xff]  ;;  %v1957_v61 = vld [vmem:[%s7078_s3 + $0x1f8] sm:$0xff] }
  0xb9   :  { %v852_v60 = vpop.f32.mrf.mxu1 }
  0xba   :  { %v1551_v3 = vadd.f32 %v4346_v63, %v1450_v62  ;;  %v1354_v19 = vadd.f32 %v852_v60, %v594_v56  ;;  %v1926_v60 = vld [vmem:[%s7078_s3 + $0x100] sm:$0xff] }
  0xbc   :  { %v1649_v8 = vmax.f32 %v1551_v3, 0.0 }
  0xbf   :  { %v1108_v1 = vpop.f32.mrf.mxu2 }
  0xc0   :  { %v1451_v4 = vadd.f32 %v1353_v0, %v1108_v1  ;;  %v599_v5 = vpop.f32.mrf.mxu0  ;;  %v1956_v1 = vld [vmem:[%s7078_s3 + $0x1f0] sm:$0xff] }
  0xc1   :  { %v855_v6 = vpop.f32.mrf.mxu1 }
  0xc2   :  { %v1552_v7 = vadd.f32 %v4346_v63, %v1451_v4  ;;  %v1355_v21 = vadd.f32 %v855_v6, %v596_v59  ;;  %v1955_v4 = vld [vmem:[%s7078_s3 + $0x1e8] sm:$0xff]  ;;  %v1953_v6 = vld [vmem:[%s7078_s3 + $0x1d8] sm:$0xff] }
  0xc3   :  { %638 = vmatmul.bf16.gmra.mxu0 %v3973_v2 }
  0xc4   :  { %894 = vmatmul.bf16.gmra.mxu1 %v3973_v2  ;;  %1150 = vmatmul.bf16.gmra.mxu2 %v3973_v2  ;;  %v1650_v9 = vmax.f32 %v1552_v7, 0.0 }
  0xc6   :  { %v1747_v10 = vmax.f32 %v1649_v8, %v1650_v9  ;;  %v1952_v8 = vld [vmem:[%s7078_s3 + $0x1d0] sm:$0xff]  ;;  %v3976_v9 = vld [vmem:[%s7076_s0 + $0x68] sm:$0xff] }
  0xc7   :  { %v1111_v14 = vpop.f32.mrf.mxu2 }
  0xc8   :  { %2698 = vmatmul.f32.vlgmr.msra.gmra.mxu3 %v1747_v10  ;;  %v601_v16 = vpop.f32.mrf.mxu0  ;;  %v1452_v22 = vadd.f32 %v1354_v19, %v1111_v14 }
  0xc9   :  { %2722 = vmatpush.msra.mxu3 %v1941_v11  ;;  %v857_v18 = vpop.f32.mrf.mxu1 }
  0xca   :  { %v1553_v27 = vadd.f32 %v4346_v63, %v1452_v22  ;;  %v1356_v37 = vadd.f32 %v857_v18, %v599_v5  ;;  %v1954_v5 = vld [vmem:[%s7078_s3 + $0x1e0] sm:$0xff] }
  0xcb   :  { %2723 = vmatpush.msra.mxu3 %v1940_v17  ;;  %v2340_v17 = vld [vmem:[%s7078_s3 + $0xdf0] sm:$0xff] }
  0xcc   :  { %v1651_v34 = vmax.f32 %v1553_v27, 0.0  ;;  %3223 = vmatpush.msrb.mxu2 %v2340_v17 }
  0xcd   :  { %2724 = vmatpush.msra.mxu3 %v1939_v20 }
  0xcf   :  { %2725 = vmatpush.msra.mxu3 %v1938_v23  ;;  %v1113_v25 = vpop.f32.mrf.mxu2  ;;  %v2308_v23 = vld [vmem:[%s7078_s3 + $0xcf0] sm:$0xff] }
  0xd0   :  { %v1453_v28 = vadd.f32 %v1355_v21, %v1113_v25  ;;  %v4381_v29 = vpop.f32.mrf.mxu0  ;;  %v1948_v21 = vld [vmem:[%s7078_s3 + $0x1b0] sm:$0xff]  ;;  %v1947_v25 = vld [vmem:[%s7078_s3 + $0x1a8] sm:$0xff]  ;;  %3183 = vmatpush.msrb.mxu0 %v2308_v23 }
  0xd1   :  { %2726 = vmatpush.msra.mxu3 %v1937_v24  ;;  %v860_v31 = vpop.f32.mrf.mxu1 }
  0xd2   :  { %v1554_v32 = vadd.f32 %v4346_v63, %v1453_v28  ;;  %v1357_v46 = vadd.f32 %v860_v31, %v601_v16  ;;  %v1949_v16 = vld [vmem:[%s7078_s3 + $0x1b8] sm:$0xff] }
  0xd3   :  { %2727 = vmatpush.msra.mxu3 %v1936_v30  ;;  %643 = vmatmul.bf16.gmra.mxu0 %v3974_v26  ;;  %v2324_v30 = vld [vmem:[%s7078_s3 + $0xd70] sm:$0xff]  ;;  %v1945_v31 = vld [vmem:[%s7078_s3 + $0x198] sm:$0xff] }
  0xd4   :  { %v1652_v35 = vmax.f32 %v1554_v32, 0.0  ;;  %899 = vmatmul.bf16.gmra.mxu1 %v3974_v26  ;;  %1155 = vmatmul.bf16.gmra.mxu2 %v3974_v26 }
  0xd5   :  { %2728 = vmatpush.msra.mxu3 %v1935_v33  ;;  %3203 = vmatpush.msrb.mxu1 %v2324_v30 }
  0xd6   :  { %v1748_v38 = vmax.f32 %v1651_v34, %v1652_v35  ;;  %v1944_v35 = vld [vmem:[%s7078_s3 + $0x190] sm:$0xff] }
  0xd7   :  { %2729 = vmatpush.msra.mxu3 %v1934_v36  ;;  %v1116_v40 = vpop.f32.mrf.mxu2  ;;  %v3977_v36 = vld [vmem:[%s7076_s0 + $0x70] sm:$0xff] }
  0xd8   :  { %2718 = vmatmul.f32.vlgmr.msrb.gmra.mxu3 %v1748_v38  ;;  %v606_v41 = vpop.f32.mrf.mxu0  ;;  %v1454_v44 = vadd.f32 %v1356_v37, %v1116_v40 }
  0xd9   :  { %2730 = vmatpush.msra.mxu3 %v1933_v39  ;;  %v862_v43 = vpop.f32.mrf.mxu1  ;;  %v1943_v39 = vld [vmem:[%s7078_s3 + $0x188] sm:$0xff] }
  0xda   :  { %v1555_v48 = vadd.f32 %v4346_v63, %v1454_v44  ;;  %v1358_v13 = vadd.f32 %v862_v43, %v4381_v29  ;;  %v1946_v29 = vld [vmem:[%s7078_s3 + $0x1a0] sm:$0xff]  ;;  %v1972_v44 = vld [vmem:[%s7078_s3 + $0x270] sm:$0xff] }
  0xdb   :  { %2731 = vmatpush.msra.mxu3 %v1932_v42  ;;  %v1973_v42 = vld [vmem:[%s7078_s3 + $0x278] sm:$0xff] }
  0xdc   :  { %v1653_v56 = vmax.f32 %v1555_v48, 0.0 }
  0xdd   :  { %2732 = vmatpush.msra.mxu3 %v1931_v45 }
  0xdf   :  { %2733 = vmatpush.msra.mxu3 %v1930_v47  ;;  %v1118_v50 = vpop.f32.mrf.mxu2  ;;  %v1971_v47 = vld [vmem:[%s7078_s3 + $0x268] sm:$0xff] }
  0xe0   :  { %v1455_v52 = vadd.f32 %v1357_v46, %v1118_v50  ;;  %v4412_v53 = vpop.f32.mrf.mxu0  ;;  %v1970_v50 = vld [vmem:[%s7078_s3 + $0x260] sm:$0xff] }
  0xe1   :  { %2734 = vmatpush.msra.mxu3 %v1929_v49  ;;  %v865_v55 = vpop.f32.mrf.mxu1 }
  0xe2   :  { %v1556_v57 = vadd.f32 %v4346_v63, %v1455_v52  ;;  %v1359_v14 = vadd.f32 %v865_v55, %v606_v41  ;;  %v1942_v41 = vld [vmem:[%s7078_s3 + $0x180] sm:$0xff]  ;;  %v1969_v52 = vld [vmem:[%s7078_s3 + $0x258] sm:$0xff] }
  0xe3   :  { %2735 = vmatpush.msra.mxu3 %v1928_v54  ;;  %648 = vmatmul.bf16.gmra.mxu0 %v3975_v51 }
  0xe4   :  { %v1654_v59 = vmax.f32 %v1556_v57, 0.0  ;;  %904 = vmatmul.bf16.gmra.mxu1 %v3975_v51  ;;  %1160 = vmatmul.bf16.gmra.mxu2 %v3975_v51  ;;  %v3978_v57 = vld [vmem:[%s7076_s0 + $0x78] sm:$0xff] }
  0xe5   :  { %2736 = vmatpush.msra.mxu3 %v1927_v58 }
  0xe6   :  { %v1749_v62 = vmax.f32 %v1653_v56, %v1654_v59  ;;  %v1968_v56 = vld [vmem:[%s7078_s3 + $0x250] sm:$0xff] }
  0xe7   :  { %2737 = vmatpush.msra.mxu3 %v1926_v60  ;;  %v1121_v0 = vpop.f32.mrf.mxu2 }
  0xe8   :  { %v4430_v2 = vpop.f32.mrf.mxu0  ;;  %2738 = vmatmul.f32.vlgmr.msra.gmra.mxu3 %v1749_v62  ;;  %v1456_v18 = vadd.f32 %v1358_v13, %v1121_v0  ;;  %v1963_v13 = vld [vmem:[%s7078_s3 + $0x228] sm:$0xff] }
  0xe9   :  { %2742 = vmatpush.msrb.mxu3 %v1957_v61  ;;  %v4432_v3 = vpop.f32.mrf.mxu1  ;;  %v1967_v61 = vld [vmem:[%s7078_s3 + $0x248] sm:$0xff] }
  0xea   :  { %v1557_v27 = vadd.f32 %v4346_v63, %v1456_v18  ;;  %v1962_v18 = vld [vmem:[%s7078_s3 + $0x220] sm:$0xff] }
  0xeb   :  { %2743 = vmatpush.msrb.mxu3 %v1956_v1 }
  0xec   :  { %v1655_v32 = vmax.f32 %v1557_v27, 0.0 }
  0xed   :  { %2744 = vmatpush.msrb.mxu3 %v1955_v4  ;;  %v1360_v4 = vadd.f32 %v4432_v3, %v4412_v53 }
  0xef   :  { %2745 = vmatpush.msrb.mxu3 %v1954_v5  ;;  %v1123_v7 = vpop.f32.mrf.mxu2 }
  0xf0   :  { %v614_v10 = vpop.f32.mrf.mxu0  ;;  %v1457_v19 = vadd.f32 %v1359_v14, %v1123_v7 }
  0xf1   :  { %2746 = vmatpush.msrb.mxu3 %v1953_v6  ;;  %v4449_v11 = vpop.f32.mrf.mxu1  ;;  %v1966_v6 = vld [vmem:[%s7078_s3 + $0x240] sm:$0xff] }
  0xf2   :  { %v1558_v28 = vadd.f32 %v4346_v63, %v1457_v19  ;;  %v1361_v5 = vadd.f32 %v4449_v11, %v4430_v2  ;;  %v1961_v19 = vld [vmem:[%s7078_s3 + $0x218] sm:$0xff] }
  0xf3   :  { %2747 = vmatpush.msrb.mxu3 %v1952_v8  ;;  %653 = vmatmul.bf16.gmra.mxu0 %v3976_v9  ;;  %v1965_v8 = vld [vmem:[%s7078_s3 + $0x238] sm:$0xff] }
  0xf4   :  { %909 = vmatmul.bf16.gmra.mxu1 %v3976_v9  ;;  %1165 = vmatmul.bf16.gmra.mxu2 %v3976_v9  ;;  %v1656_v33 = vmax.f32 %v1558_v28, 0.0 }
  0xf5   :  { %2748 = vmatpush.msrb.mxu3 %v1951_v12 }
  0xf6   :  { %v1750_v40 = vmax.f32 %v1655_v32, %v1656_v33 }
  0xf7   :  { %2749 = vmatpush.msrb.mxu3 %v1950_v15  ;;  %v4464_v20 = vpop.f32.mrf.mxu2 }
  0xf8   :  { %v616_v22 = vpop.f32.mrf.mxu0  ;;  %v1458_v53 = vadd.f32 %v1360_v4, %v4464_v20 }
  0xf9   :  { %2750 = vmatpush.msrb.mxu3 %v1949_v16  ;;  %v872_v24 = vpop.f32.mrf.mxu1 }
  0xfa   :  { %v1362_v26 = vadd.f32 %v872_v24, %v614_v10  ;;  %v1964_v10 = vld [vmem:[%s7078_s3 + $0x230] sm:$0xff]  ;;  %v1559_v16 = vadd.f32 %v4346_v63, %v1458_v53  ;;  %v1979_v53 = vld [vmem:[%s7078_s3 + $0x2a8] sm:$0xff] }
  0xfb   :  { %2751 = vmatpush.msrb.mxu3 %v1948_v21  ;;  %v1960_v24 = vld [vmem:[%s7078_s3 + $0x210] sm:$0xff] }
  0xfc   :  { %v1657_v21 = vmax.f32 %v1559_v16, 0.0 }
  0xfd   :  { %2752 = vmatpush.msrb.mxu3 %v1947_v25  ;;  %v3979_v25 = vld [vmem:[%s7076_s0 + $0x80] sm:$0xff] }
  0xff   :  { %2753 = vmatpush.msrb.mxu3 %v1946_v29  ;;  %v1128_v34 = vpop.f32.mrf.mxu2  ;;  %v1959_v29 = vld [vmem:[%s7078_s3 + $0x208] sm:$0xff] }
 0x100   :  { %v619_v37 = vpop.f32.mrf.mxu0  ;;  %v1459_v3 = vadd.f32 %v1361_v5, %v1128_v34  ;;  %v1958_v34 = vld [vmem:[%s7078_s3 + $0x200] sm:$0xff] }
 0x101   :  { %2754 = vmatpush.msrb.mxu3 %v1945_v31  ;;  %v875_v38 = vpop.f32.mrf.mxu1 }
 0x102   :  { %v1363_v51 = vadd.f32 %v875_v38, %v616_v22  ;;  %v1560_v17 = vadd.f32 %v4346_v63, %v1459_v3 }
 0x103   :  { %2755 = vmatpush.msrb.mxu3 %v1944_v35  ;;  %658 = vmatmul.bf16.gmra.mxu0 %v3977_v36 }
 0x104   :  { %914 = vmatmul.bf16.gmra.mxu1 %v3977_v36  ;;  %1170 = vmatmul.bf16.gmra.mxu2 %v3977_v36  ;;  %v1658_v22 = vmax.f32 %v1560_v17, 0.0  ;;  %v1989_v36 = vld [vmem:[%s7078_s3 + $0x2f8] sm:$0xff] }
 0x105   :  { %2756 = vmatpush.msrb.mxu3 %v1943_v39  ;;  %v1988_v39 = vld [vmem:[%s7078_s3 + $0x2f0] sm:$0xff] }
 0x106   :  { %v1751_v33 = vmax.f32 %v1657_v21, %v1658_v22 }
 0x107   :  { %2757 = vmatpush.msrb.mxu3 %v1942_v41  ;;  %v1131_v43 = vpop.f32.mrf.mxu2 }
 0x108   :  { %2758 = vmatmul.f32.vlgmr.msrb.gmra.mxu3 %v1750_v40  ;;  %v621_v45 = vpop.f32.mrf.mxu0  ;;  %v1460_v48 = vadd.f32 %v1362_v26, %v1131_v43 }
 0x109   :  { %2762 = vmatpush.msra.mxu3 %v1973_v42  ;;  %v877_v46 = vpop.f32.mrf.mxu1  ;;  %v1987_v42 = vld [vmem:[%s7078_s3 + $0x2e8] sm:$0xff] }
 0x10a   :  { %v1364_v49 = vadd.f32 %v877_v46, %v619_v37  ;;  %v1561_v54 = vadd.f32 %v4346_v63, %v1460_v48  ;;  %v1986_v46 = vld [vmem:[%s7078_s3 + $0x2e0] sm:$0xff]  ;;  %v1985_v48 = vld [vmem:[%s7078_s3 + $0x2d8] sm:$0xff] }
 0x10b   :  { %2763 = vmatpush.msra.mxu3 %v1972_v44 }
 0x10c   :  { %v1659_v62 = vmax.f32 %v1561_v54, 0.0  ;;  %v3980_v54 = vld [vmem:[%s7076_s0 + $0x88] sm:$0xff] }
 0x10d   :  { %2764 = vmatpush.msra.mxu3 %v1971_v47  ;;  %v2307_v47 = vld [vmem:[%s7078_s3 + $0xce8] sm:$0xff] }
 0x10e   :  { %3184 = vmatpush.msrb.mxu0 %v2307_v47  ;;  %v1998_v47 = vld [vmem:[%s7078_s3 + $0x340] sm:$0xff] }
 0x10f   :  { %2765 = vmatpush.msra.mxu3 %v1970_v50  ;;  %v1133_v55 = vpop.f32.mrf.mxu2  ;;  %v2323_v50 = vld [vmem:[%s7078_s3 + $0xd68] sm:$0xff] }
 0x110   :  { %v1461_v58 = vadd.f32 %v1363_v51, %v1133_v55  ;;  %v624_v59 = vpop.f32.mrf.mxu0  ;;  %3204 = vmatpush.msrb.mxu1 %v2323_v50 }
 0x111   :  { %2766 = vmatpush.msra.mxu3 %v1969_v52  ;;  %v880_v60 = vpop.f32.mrf.mxu1  ;;  %v1984_v52 = vld [vmem:[%s7078_s3 + $0x2d0] sm:$0xff] }
 0x112   :  { %v1562_v0 = vadd.f32 %v4346_v63, %v1461_v58  ;;  %v1365_v1 = vadd.f32 %v880_v60, %v621_v45  ;;  %v2339_v45 = vld [vmem:[%s7078_s3 + $0xde8] sm:$0xff] }
 0x113   :  { %2767 = vmatpush.msra.mxu3 %v1968_v56  ;;  %663 = vmatmul.bf16.gmra.mxu0 %v3978_v57  ;;  %v1983_v58 = vld [vmem:[%s7078_s3 + $0x2c8] sm:$0xff] }
 0x114   :  { %v1660_v7 = vmax.f32 %v1562_v0, 0.0  ;;  %919 = vmatmul.bf16.gmra.mxu1 %v3978_v57  ;;  %1175 = vmatmul.bf16.gmra.mxu2 %v3978_v57 }
 0x115   :  { %2768 = vmatpush.msra.mxu3 %v1967_v61  ;;  %3224 = vmatpush.msrb.mxu2 %v2339_v45 }
 0x116   :  { %v4534_v9 = vmax.f32 %v1659_v62, %v1660_v7  ;;  %v1982_v62 = vld [vmem:[%s7078_s3 + $0x2c0] sm:$0xff] }
 0x117   :  { %2769 = vmatpush.msra.mxu3 %v1966_v6  ;;  %v1136_v2 = vpop.f32.mrf.mxu2  ;;  %v1980_v6 = vld [vmem:[%s7078_s3 + $0x2b0] sm:$0xff] }
 0x118   :  { %v626_v11 = vpop.f32.mrf.mxu0  ;;  %v1462_v14 = vadd.f32 %v1364_v49, %v1136_v2 }
 0x119   :  { %2770 = vmatpush.msra.mxu3 %v1965_v8  ;;  %v882_v12 = vpop.f32.mrf.mxu1 }
 0x11a   :  { %v1366_v15 = vadd.f32 %v882_v12, %v624_v59  ;;  %v1563_v20 = vadd.f32 %v4346_v63, %v1462_v14  ;;  %v1976_v14 = vld [vmem:[%s7078_s3 + $0x290] sm:$0xff] }
 0x11b   :  { %2771 = vmatpush.msra.mxu3 %v1964_v10  ;;  %v1978_v10 = vld [vmem:[%s7078_s3 + $0x2a0] sm:$0xff] }
 0x11c   :  { %v1661_v30 = vmax.f32 %v1563_v20, 0.0 }
 0x11d   :  { %2772 = vmatpush.msra.mxu3 %v1963_v13 }
 0x11f   :  { %2773 = vmatpush.msra.mxu3 %v1962_v18  ;;  %v1138_v23 = vpop.f32.mrf.mxu2 }
 0x120   :  { %v1463_v26 = vadd.f32 %v1365_v1, %v1138_v23  ;;  %v629_v27 = vpop.f32.mrf.mxu0  ;;  %v1981_v1 = vld [vmem:[%s7078_s3 + $0x2b8] sm:$0xff]  ;;  %v1974_v23 = vld [vmem:[%s7078_s3 + $0x280] sm:$0xff] }
 0x121   :  { %2774 = vmatpush.msra.mxu3 %v1961_v19  ;;  %v885_v28 = vpop.f32.mrf.mxu1  ;;  %v1975_v19 = vld [vmem:[%s7078_s3 + $0x288] sm:$0xff] }
 0x122   :  { %v1564_v31 = vadd.f32 %v4346_v63, %v1463_v26  ;;  %v1367_v32 = vadd.f32 %v885_v28, %v626_v11  ;;  %v1977_v11 = vld [vmem:[%s7078_s3 + $0x298] sm:$0xff] }
 0x123   :  { %2775 = vmatpush.msra.mxu3 %v1960_v24  ;;  %668 = vmatmul.bf16.gmra.mxu0 %v3979_v25 }
 0x124   :  { %v1662_v35 = vmax.f32 %v1564_v31, 0.0  ;;  %924 = vmatmul.bf16.gmra.mxu1 %v3979_v25  ;;  %1180 = vmatmul.bf16.gmra.mxu2 %v3979_v25  ;;  %v2005_v25 = vld [vmem:[%s7078_s3 + $0x378] sm:$0xff]  ;;  %v2003_v31 = vld [vmem:[%s7078_s3 + $0x368] sm:$0xff] }
 0x125   :  { %2776 = vmatpush.msra.mxu3 %v1959_v29 }
 0x126   :  { %v4568_v37 = vmax.f32 %v1661_v30, %v1662_v35 }
 0x127   :  { %2777 = vmatpush.msra.mxu3 %v1958_v34  ;;  %v1141_v38 = vpop.f32.mrf.mxu2  ;;  %v2002_v34 = vld [vmem:[%s7078_s3 + $0x360] sm:$0xff] }
 0x128   :  { %2778 = vmatmul.f32.vlgmr.msra.gmra.mxu3 %v1751_v33  ;;  %v631_v40 = vpop.f32.mrf.mxu0  ;;  %v1464_v43 = vadd.f32 %v1366_v15, %v1141_v38  ;;  %v3981_v15 = vld [vmem:[%s7076_s0 + $0x90] sm:$0xff] }
 0x129   :  { %2782 = vmatpush.msrb.mxu3 %v1989_v36  ;;  %v887_v41 = vpop.f32.mrf.mxu1  ;;  %v2000_v36 = vld [vmem:[%s7078_s3 + $0x350] sm:$0xff] }
 0x12a   :  { %v1368_v44 = vadd.f32 %v887_v41, %v629_v27  ;;  %v1565_v49 = vadd.f32 %v4346_v63, %v1464_v43  ;;  %v2004_v27 = vld [vmem:[%s7078_s3 + $0x370] sm:$0xff] }
 0x12b   :  { %2783 = vmatpush.msrb.mxu3 %v1988_v39  ;;  %v3982_v39 = vld [vmem:[%s7076_s0 + $0x98] sm:$0xff] }
 0x12c   :  { %v1663_v59 = vmax.f32 %v1565_v49, 0.0  ;;  %v1997_v49 = vld [vmem:[%s7078_s3 + $0x338] sm:$0xff] }
 0x12d   :  { %2784 = vmatpush.msrb.mxu3 %v1987_v42  ;;  %v1999_v42 = vld [vmem:[%s7078_s3 + $0x348] sm:$0xff] }
 0x12f   :  { %2785 = vmatpush.msrb.mxu3 %v1986_v46  ;;  %v1143_v51 = vpop.f32.mrf.mxu2 }
 0x130   :  { %v1465_v55 = vadd.f32 %v1367_v32, %v1143_v51  ;;  %v634_v56 = vpop.f32.mrf.mxu0  ;;  %v1996_v51 = vld [vmem:[%s7078_s3 + $0x330] sm:$0xff] }
 0x131   :  { %2786 = vmatpush.msrb.mxu3 %v1985_v48  ;;  %v890_v57 = vpop.f32.mrf.mxu1 }
 0x132   :  { %v1566_v60 = vadd.f32 %v4346_v63, %v1465_v55  ;;  %v1369_v61 = vadd.f32 %v890_v57, %v631_v40 }
 0x133   :  { %2787 = vmatpush.msrb.mxu3 %v1984_v52  ;;  %673 = vmatmul.bf16.gmra.mxu0 %v3980_v54 }
 0x134   :  { %v1664_v0 = vmax.f32 %v1566_v60, 0.0  ;;  %929 = vmatmul.bf16.gmra.mxu1 %v3980_v54  ;;  %1185 = vmatmul.bf16.gmra.mxu2 %v3980_v54  ;;  %v1993_v60 = vld [vmem:[%s7078_s3 + $0x318] sm:$0xff] }
 0x135   :  { %2788 = vmatpush.msrb.mxu3 %v1983_v58 }
 0x136   :  { %v4608_v4 = vmax.f32 %v1663_v59, %v1664_v0  ;;  %v1994_v59 = vld [vmem:[%s7078_s3 + $0x320] sm:$0xff] }
 0x137   :  { %2789 = vmatpush.msrb.mxu3 %v1982_v62  ;;  %v1146_v5 = vpop.f32.mrf.mxu2  ;;  %v2306_v0 = vld [vmem:[%s7078_s3 + $0xce0] sm:$0xff] }
 0x138   :  { %v636_v7 = vpop.f32.mrf.mxu0  ;;  %v1466_v3 = vadd.f32 %v1368_v44, %v1146_v5  ;;  %3185 = vmatpush.msrb.mxu0 %v2306_v0  ;;  %v2006_v0 = vld [vmem:[%s7078_s3 + $0x380] sm:$0xff] }
 0x139   :  { %2790 = vmatpush.msrb.mxu3 %v1981_v1  ;;  %v892_v8 = vpop.f32.mrf.mxu1  ;;  %v1992_v1 = vld [vmem:[%s7078_s3 + $0x310] sm:$0xff] }
 0x13a   :  { %v1370_v2 = vadd.f32 %v892_v8, %v634_v56  ;;  %v1567_v12 = vadd.f32 %v4346_v63, %v1466_v3  ;;  %v1995_v56 = vld [vmem:[%s7078_s3 + $0x328] sm:$0xff] }
 0x13b   :  { %2791 = vmatpush.msrb.mxu3 %v1980_v6  ;;  %v3983_v6 = vld [vmem:[%s7076_s0 + $0xa0] sm:$0xff]  ;;  %v1991_v3 = vld [vmem:[%s7078_s3 + $0x308] sm:$0xff] }
 0x13c   :  { %v1665_v20 = vmax.f32 %v1567_v12, 0.0 }
 0x13d   :  { %2792 = vmatpush.msrb.mxu3 %v1979_v53  ;;  %v2322_v53 = vld [vmem:[%s7078_s3 + $0xd60] sm:$0xff] }
 0x13e   :  { %3205 = vmatpush.msrb.mxu1 %v2322_v53 }
 0x13f   :  { %2793 = vmatpush.msrb.mxu3 %v1978_v10  ;;  %v1148_v13 = vpop.f32.mrf.mxu2 }
 0x140   :  { %v1467_v16 = vadd.f32 %v1369_v61, %v1148_v13  ;;  %v639_v17 = vpop.f32.mrf.mxu0  ;;  %v2338_v61 = vld [vmem:[%s7078_s3 + $0xde0] sm:$0xff] }
 0x141   :  { %2794 = vmatpush.msrb.mxu3 %v1977_v11  ;;  %v895_v18 = vpop.f32.mrf.mxu1  ;;  %3225 = vmatpush.msrb.mxu2 %v2338_v61  ;;  %v1990_v13 = vld [vmem:[%s7078_s3 + $0x300] sm:$0xff] }
 0x142   :  { %v1568_v21 = vadd.f32 %v4346_v63, %v1467_v16  ;;  %v1371_v22 = vadd.f32 %v895_v18, %v636_v7 }
 0x143   :  { %2795 = vmatpush.msrb.mxu3 %v1976_v14  ;;  %678 = vmatmul.bf16.gmra.mxu0 %v3981_v15 }
 0x144   :  { %v1666_v24 = vmax.f32 %v1568_v21, 0.0  ;;  %934 = vmatmul.bf16.gmra.mxu1 %v3981_v15  ;;  %1190 = vmatmul.bf16.gmra.mxu2 %v3981_v15  ;;  %v2021_v15 = vld [vmem:[%s7078_s3 + $0x3f8] sm:$0xff]  ;;  %v2019_v21 = vld [vmem:[%s7078_s3 + $0x3e8] sm:$0xff] }
 0x145   :  { %2796 = vmatpush.msrb.mxu3 %v1975_v19 }
 0x146   :  { %v4639_v26 = vmax.f32 %v1665_v20, %v1666_v24  ;;  %v2018_v24 = vld [vmem:[%s7078_s3 + $0x3e0] sm:$0xff] }
 0x147   :  { %2797 = vmatpush.msrb.mxu3 %v1974_v23  ;;  %v1151_v28 = vpop.f32.mrf.mxu2 }
 0x148   :  { %2798 = vmatmul.f32.vlgmr.msrb.gmra.mxu3 %v4534_v9  ;;  %v1468_v29 = vadd.f32 %v1370_v2, %v1151_v28  ;;  %v641_v30 = vpop.f32.mrf.mxu0  ;;  %v2001_v9 = vld [vmem:[%s7078_s3 + $0x358] sm:$0xff] }
 0x149   :  { %2802 = vmatpush.msra.mxu3 %v2005_v25  ;;  %v897_v32 = vpop.f32.mrf.mxu1 }
 0x14a   :  { %v1372_v33 = vadd.f32 %v897_v32, %v639_v17  ;;  %v1569_v35 = vadd.f32 %v4346_v63, %v1468_v29  ;;  %v2020_v17 = vld [vmem:[%s7078_s3 + $0x3f0] sm:$0xff]  ;;  %v3984_v29 = vld [vmem:[%s7076_s0 + $0xa8] sm:$0xff] }
 0x14b   :  { %2803 = vmatpush.msra.mxu3 %v2004_v27  ;;  %v2016_v27 = vld [vmem:[%s7078_s3 + $0x3d0] sm:$0xff]  ;;  %v2015_v32 = vld [vmem:[%s7078_s3 + $0x3c8] sm:$0xff] }
 0x14c   :  { %v1667_v44 = vmax.f32 %v1569_v35, 0.0 }
 0x14d   :  { %2804 = vmatpush.msra.mxu3 %v2003_v31 }
 0x14f   :  { %2805 = vmatpush.msra.mxu3 %v2002_v34  ;;  %v1153_v38 = vpop.f32.mrf.mxu2 }
 0x150   :  { %v1469_v40 = vadd.f32 %v1371_v22, %v1153_v38  ;;  %v644_v41 = vpop.f32.mrf.mxu0 }
 0x151   :  { %2806 = vmatpush.msra.mxu3 %v2001_v9  ;;  %v900_v43 = vpop.f32.mrf.mxu1 }
 0x152   :  { %v1570_v45 = vadd.f32 %v4346_v63, %v1469_v40  ;;  %v1373_v46 = vadd.f32 %v900_v43, %v641_v30 }
 0x153   :  { %2807 = vmatpush.msra.mxu3 %v2000_v36  ;;  %683 = vmatmul.bf16.gmra.mxu0 %v3982_v39  ;;  %v2014_v36 = vld [vmem:[%s7078_s3 + $0x3c0] sm:$0xff] }
 0x154   :  { %v1668_v48 = vmax.f32 %v1570_v45, 0.0  ;;  %939 = vmatmul.bf16.gmra.mxu1 %v3982_v39  ;;  %1195 = vmatmul.bf16.gmra.mxu2 %v3982_v39  ;;  %v2013_v39 = vld [vmem:[%s7078_s3 + $0x3b8] sm:$0xff]  ;;  %v2011_v45 = vld [vmem:[%s7078_s3 + $0x3a8] sm:$0xff] }
 0x155   :  { %2808 = vmatpush.msra.mxu3 %v1999_v42 }
 0x156   :  { %v4671_v50 = vmax.f32 %v1667_v44, %v1668_v48  ;;  %v2010_v48 = vld [vmem:[%s7078_s3 + $0x3a0] sm:$0xff] }
 0x157   :  { %2809 = vmatpush.msra.mxu3 %v1998_v47  ;;  %v1156_v52 = vpop.f32.mrf.mxu2 }
 0x158   :  { %v1470_v54 = vadd.f32 %v1372_v33, %v1156_v52  ;;  %v646_v55 = vpop.f32.mrf.mxu0  ;;  %v2008_v52 = vld [vmem:[%s7078_s3 + $0x390] sm:$0xff] }
 0x159   :  { %2810 = vmatpush.msra.mxu3 %v1997_v49  ;;  %v902_v57 = vpop.f32.mrf.mxu1  ;;  %v2009_v49 = vld [vmem:[%s7078_s3 + $0x398] sm:$0xff] }
 0x15a   :  { %v1374_v58 = vadd.f32 %v902_v57, %v644_v41  ;;  %v1571_v62 = vadd.f32 %v4346_v63, %v1470_v54  ;;  %v2012_v41 = vld [vmem:[%s7078_s3 + $0x3b0] sm:$0xff] }
 0x15b   :  { %2811 = vmatpush.msra.mxu3 %v1996_v51  ;;  %v3985_v54 = vld [vmem:[%s7076_s0 + $0xb0] sm:$0xff] }
 0x15c   :  { %v1669_v10 = vmax.f32 %v1571_v62, 0.0 }
 0x15d   :  { %2812 = vmatpush.msra.mxu3 %v1995_v56 }
 0x15f   :  { %2813 = vmatpush.msra.mxu3 %v1994_v59  ;;  %v1158_v5 = vpop.f32.mrf.mxu2 }
 0x160   :  { %v1471_v7 = vadd.f32 %v1373_v46, %v1158_v5  ;;  %v649_v8 = vpop.f32.mrf.mxu0  ;;  %v2037_v5 = vld [vmem:[%s7078_s3 + $0x478] sm:$0xff] }
 0x161   :  { %2814 = vmatpush.msra.mxu3 %v1993_v60  ;;  %v905_v2 = vpop.f32.mrf.mxu1 }
 0x162   :  { %v1572_v11 = vadd.f32 %v4346_v63, %v1471_v7  ;;  %v1375_v12 = vadd.f32 %v905_v2, %v646_v55  ;;  %v2036_v7 = vld [vmem:[%s7078_s3 + $0x470] sm:$0xff] }
 0x163   :  { %2815 = vmatpush.msra.mxu3 %v1992_v1  ;;  %688 = vmatmul.bf16.gmra.mxu0 %v3983_v6 }
 0x164   :  { %v1670_v14 = vmax.f32 %v1572_v11, 0.0  ;;  %944 = vmatmul.bf16.gmra.mxu1 %v3983_v6  ;;  %1200 = vmatmul.bf16.gmra.mxu2 %v3983_v6 }
 0x165   :  { %2816 = vmatpush.msra.mxu3 %v1991_v3  ;;  %v2035_v3 = vld [vmem:[%s7078_s3 + $0x468] sm:$0xff] }
 0x166   :  { %v4711_v16 = vmax.f32 %v1669_v10, %v1670_v14  ;;  %v2032_v14 = vld [vmem:[%s7078_s3 + $0x450] sm:$0xff] }
 0x167   :  { %2817 = vmatpush.msra.mxu3 %v1990_v13  ;;  %v1161_v18 = vpop.f32.mrf.mxu2 }
 0x168   :  { %2818 = vmatmul.f32.vlgmr.msra.gmra.mxu3 %v4568_v37  ;;  %v1472_v19 = vadd.f32 %v1374_v58, %v1161_v18  ;;  %v651_v20 = vpop.f32.mrf.mxu0  ;;  %v2017_v37 = vld [vmem:[%s7078_s3 + $0x3d8] sm:$0xff]  ;;  %v2007_v58 = vld [vmem:[%s7078_s3 + $0x388] sm:$0xff] }
 0x169   :  { %2822 = vmatpush.msrb.mxu3 %v2021_v15  ;;  %v907_v22 = vpop.f32.mrf.mxu1  ;;  %v3986_v15 = vld [vmem:[%s7076_s0 + $0xb8] sm:$0xff] }
 0x16a   :  { %v1376_v23 = vadd.f32 %v907_v22, %v649_v8  ;;  %v1573_v25 = vadd.f32 %v4346_v63, %v1472_v19  ;;  %v2337_v19 = vld [vmem:[%s7078_s3 + $0xdd8] sm:$0xff] }
 0x16b   :  { %2823 = vmatpush.msrb.mxu3 %v2020_v17  ;;  %3226 = vmatpush.msrb.mxu2 %v2337_v19  ;;  %v2045_v19 = vld [vmem:[%s7078_s3 + $0x4b8] sm:$0xff] }
 0x16c   :  { %v1671_v34 = vmax.f32 %v1573_v25, 0.0 }
 0x16d   :  { %2824 = vmatpush.msrb.mxu3 %v2019_v21 }
 0x16f   :  { %2825 = vmatpush.msrb.mxu3 %v2018_v24  ;;  %v1163_v28 = vpop.f32.mrf.mxu2  ;;  %v2305_v24 = vld [vmem:[%s7078_s3 + $0xcd8] sm:$0xff] }
 0x170   :  { %v1473_v30 = vadd.f32 %v1375_v12, %v1163_v28  ;;  %v654_v31 = vpop.f32.mrf.mxu0  ;;  %v2034_v12 = vld [vmem:[%s7078_s3 + $0x460] sm:$0xff]  ;;  %v2321_v28 = vld [vmem:[%s7078_s3 + $0xd58] sm:$0xff]  ;;  %3186 = vmatpush.msrb.mxu0 %v2305_v24  ;;  %v2043_v24 = vld [vmem:[%s7078_s3 + $0x4a8] sm:$0xff] }
 0x171   :  { %2826 = vmatpush.msrb.mxu3 %v2017_v37  ;;  %v910_v33 = vpop.f32.mrf.mxu1  ;;  %3206 = vmatpush.msrb.mxu1 %v2321_v28  ;;  %v2042_v28 = vld [vmem:[%s7078_s3 + $0x4a0] sm:$0xff] }
 0x172   :  { %v1574_v9 = vadd.f32 %v4346_v63, %v1473_v30  ;;  %v1377_v35 = vadd.f32 %v910_v33, %v651_v20  ;;  %v2031_v20 = vld [vmem:[%s7078_s3 + $0x448] sm:$0xff]  ;;  %v2029_v30 = vld [vmem:[%s7078_s3 + $0x438] sm:$0xff] }
 0x173   :  { %2827 = vmatpush.msrb.mxu3 %v2016_v27  ;;  %693 = vmatmul.bf16.gmra.mxu0 %v3984_v29  ;;  %v2030_v27 = vld [vmem:[%s7078_s3 + $0x440] sm:$0xff] }
 0x174   :  { %v1672_v38 = vmax.f32 %v1574_v9, 0.0  ;;  %949 = vmatmul.bf16.gmra.mxu1 %v3984_v29  ;;  %1205 = vmatmul.bf16.gmra.mxu2 %v3984_v29 }
 0x175   :  { %2828 = vmatpush.msrb.mxu3 %v2015_v32 }
 0x176   :  { %v4743_v40 = vmax.f32 %v1671_v34, %v1672_v38  ;;  %v2027_v34 = vld [vmem:[%s7078_s3 + $0x428] sm:$0xff]  ;;  %v2026_v38 = vld [vmem:[%s7078_s3 + $0x420] sm:$0xff] }
 0x177   :  { %2829 = vmatpush.msrb.mxu3 %v2014_v36  ;;  %v1166_v42 = vpop.f32.mrf.mxu2 }
 0x178   :  { %v656_v43 = vpop.f32.mrf.mxu0  ;;  %v1474_v44 = vadd.f32 %v1376_v23, %v1166_v42 }
 0x179   :  { %2830 = vmatpush.msrb.mxu3 %v2013_v39  ;;  %v912_v46 = vpop.f32.mrf.mxu1  ;;  %v2025_v39 = vld [vmem:[%s7078_s3 + $0x418] sm:$0xff] }
 0x17a   :  { %v1378_v47 = vadd.f32 %v912_v46, %v654_v31  ;;  %v1575_v51 = vadd.f32 %v4346_v63, %v1474_v44  ;;  %v2028_v31 = vld [vmem:[%s7078_s3 + $0x430] sm:$0xff]  ;;  %v3987_v44 = vld [vmem:[%s7076_s0 + $0xc0] sm:$0xff] }
 0x17b   :  { %2831 = vmatpush.msrb.mxu3 %v2012_v41  ;;  %v4832_v41 = vld [vmem:[%s7077_s2] ss:$0 sm:$0xff] }
 0x17c   :  { %v1673_v61 = vmax.f32 %v1575_v51, 0.0 }
 0x17d   :  { %2832 = vmatpush.msrb.mxu3 %v2011_v45 }
 0x17f   :  { %2833 = vmatpush.msrb.mxu3 %v2010_v48  ;;  %v1168_v55 = vpop.f32.mrf.mxu2 }
 0x180   :  { %v659_v56 = vpop.f32.mrf.mxu0  ;;  %v1475_v57 = vadd.f32 %v1377_v35, %v1168_v55  ;;  %v2022_v55 = vld [vmem:[%s7078_s3 + $0x400] sm:$0xff] }
 0x181   :  { %2834 = vmatpush.msrb.mxu3 %v2009_v49  ;;  %v915_v59 = vpop.f32.mrf.mxu1 }
 0x182   :  { %v1379_v60 = vadd.f32 %v915_v59, %v656_v43  ;;  %v1576_v62 = vadd.f32 %v4346_v63, %v1475_v57  ;;  %v2024_v43 = vld [vmem:[%s7078_s3 + $0x410] sm:$0xff]  ;;  %v2053_v57 = vld [vmem:[%s7078_s3 + $0x4f8] sm:$0xff] }
 0x183   :  { %2835 = vmatpush.msrb.mxu3 %v2008_v52  ;;  %698 = vmatmul.bf16.gmra.mxu0 %v3985_v54  ;;  %v2052_v59 = vld [vmem:[%s7078_s3 + $0x4f0] sm:$0xff] }
 0x184   :  { %954 = vmatmul.bf16.gmra.mxu1 %v3985_v54  ;;  %v1674_v1 = vmax.f32 %v1576_v62, 0.0  ;;  %1210 = vmatmul.bf16.gmra.mxu2 %v3985_v54  ;;  %v2051_v62 = vld [vmem:[%s7078_s3 + $0x4e8] sm:$0xff] }
 0x185   :  { %2836 = vmatpush.msrb.mxu3 %v2007_v58 }
 0x186   :  { %v4774_v6 = vmax.f32 %v1673_v61, %v1674_v1 }
 0x187   :  { %2837 = vmatpush.msrb.mxu3 %v2006_v0  ;;  %v1171_v8 = vpop.f32.mrf.mxu2 }
 0x188   :  { %2838 = vmatmul.f32.vlgmr.msrb.gmra.mxu3 %v4608_v4  ;;  %v661_v53 = vpop.f32.mrf.mxu0  ;;  %v1476_v2 = vadd.f32 %v1378_v47, %v1171_v8  ;;  %v2033_v4 = vld [vmem:[%s7078_s3 + $0x458] sm:$0xff]  ;;  %v2023_v47 = vld [vmem:[%s7078_s3 + $0x408] sm:$0xff] }
 0x189   :  { %2842 = vmatpush.msra.mxu3 %v2037_v5  ;;  %v917_v10 = vpop.f32.mrf.mxu1 }
 0x18a   :  { %v1380_v11 = vadd.f32 %v917_v10, %v659_v56  ;;  %v1577_v13 = vadd.f32 %v4346_v63, %v1476_v2 }
 0x18b   :  { %2843 = vmatpush.msra.mxu3 %v2036_v7  ;;  %v2050_v7 = vld [vmem:[%s7078_s3 + $0x4e0] sm:$0xff] }
 0x18c   :  { %v1675_v37 = vmax.f32 %v1577_v13, 0.0 }
 0x18d   :  { %2844 = vmatpush.msra.mxu3 %v2035_v3  ;;  %v3988_v3 = vld [vmem:[%s7076_s0 + $0xc8] sm:$0xff] }
 0x18f   :  { %2845 = vmatpush.msra.mxu3 %v2034_v12  ;;  %v1173_v17 = vpop.f32.mrf.mxu2 }
 0x190   :  { %v664_v18 = vpop.f32.mrf.mxu0  ;;  %v1477_v21 = vadd.f32 %v1379_v60, %v1173_v17  ;;  %v2046_v17 = vld [vmem:[%s7078_s3 + $0x4c0] sm:$0xff] }
 0x191   :  { %2846 = vmatpush.msra.mxu3 %v2033_v4  ;;  %v920_v22 = vpop.f32.mrf.mxu1 }
 0x192   :  { %v1381_v23 = vadd.f32 %v920_v22, %v661_v53  ;;  %v1578_v25 = vadd.f32 %v4346_v63, %v1477_v21  ;;  %v2048_v53 = vld [vmem:[%s7078_s3 + $0x4d0] sm:$0xff] }
 0x193   :  { %2847 = vmatpush.msra.mxu3 %v2032_v14  ;;  %703 = vmatmul.bf16.gmra.mxu0 %v3986_v15  ;;  %v2044_v21 = vld [vmem:[%s7078_s3 + $0x4b0] sm:$0xff] }
 0x194   :  { %959 = vmatmul.bf16.gmra.mxu1 %v3986_v15  ;;  %v1676_v29 = vmax.f32 %v1578_v25, 0.0  ;;  %1215 = vmatmul.bf16.gmra.mxu2 %v3986_v15 }
 0x195   :  { %2848 = vmatpush.msra.mxu3 %v2031_v20 }
 0x196   :  { %v4815_v63 = vmax.f32 %v1675_v37, %v1676_v29  ;;  %v2041_v29 = vld [vmem:[%s7078_s3 + $0x498] sm:$0xff] }
 0x197   :  { %2849 = vmatpush.msra.mxu3 %v2030_v27  ;;  %v1176_v32 = vpop.f32.mrf.mxu2 }
 0x198   :  { %v666_v33 = vpop.f32.mrf.mxu0  ;;  %v1478_v9 = vadd.f32 %v1380_v11, %v1176_v32  ;;  %v2047_v11 = vld [vmem:[%s7078_s3 + $0x4c8] sm:$0xff]  ;;  %v3989_v32 = vld [vmem:[%s7076_s0 + $0xd0] sm:$0xff] }
 0x199   :  { %2850 = vmatpush.msra.mxu3 %v2029_v30  ;;  %v922_v35 = vpop.f32.mrf.mxu1 }
 0x19a   :  { %v1382_v36 = vadd.f32 %v922_v35, %v664_v18  ;;  %v1579_v42 = vadd.f32 %v4832_v41, %v1478_v9  ;;  %v2039_v9 = vld [vmem:[%s7078_s3 + $0x488] sm:$0xff] }
 0x19b   :  { %2851 = vmatpush.msra.mxu3 %v2028_v31  ;;  %v2040_v31 = vld [vmem:[%s7078_s3 + $0x490] sm:$0xff] }
 0x19c   :  { %v1677_v52 = vmax.f32 %v1579_v42, 0.0 }
 0x19d   :  { %2852 = vmatpush.msra.mxu3 %v2027_v34 }
 0x19f   :  { %2853 = vmatpush.msra.mxu3 %v2026_v38  ;;  %v1178_v45 = vpop.f32.mrf.mxu2 }
 0x1a0   :  { %v669_v46 = vpop.f32.mrf.mxu0  ;;  %v1479_v48 = vadd.f32 %v1381_v23, %v1178_v45 }
 0x1a1   :  { %2854 = vmatpush.msra.mxu3 %v2025_v39  ;;  %v925_v49 = vpop.f32.mrf.mxu1 }
 0x1a2   :  { %v1383_v51 = vadd.f32 %v925_v49, %v666_v33  ;;  %v1580_v54 = vadd.f32 %v4832_v41, %v1479_v48  ;;  %v2068_v49 = vld [vmem:[%s7078_s3 + $0x570] sm:$0xff] }
 0x1a3   :  { %2855 = vmatpush.msra.mxu3 %v2024_v43  ;;  %708 = vmatmul.bf16.gmra.mxu0 %v3987_v44  ;;  %v2038_v43 = vld [vmem:[%s7078_s3 + $0x480] sm:$0xff] }
 0x1a4   :  { %964 = vmatmul.bf16.gmra.mxu1 %v3987_v44  ;;  %v1678_v56 = vmax.f32 %v1580_v54, 0.0  ;;  %1220 = vmatmul.bf16.gmra.mxu2 %v3987_v44  ;;  %v2336_v44 = vld [vmem:[%s7078_s3 + $0xdd0] sm:$0xff] }
 0x1a5   :  { %2856 = vmatpush.msra.mxu3 %v2023_v47  ;;  %3227 = vmatpush.msrb.mxu2 %v2336_v44  ;;  %v2304_v47 = vld [vmem:[%s7078_s3 + $0xcd0] sm:$0xff]  ;;  %v2083_v44 = vld [vmem:[%s7078_s3 + $0x5e8] sm:$0xff] }
 0x1a6   :  { %v4851_v58 = vmax.f32 %v1677_v52, %v1678_v56  ;;  %3187 = vmatpush.msrb.mxu0 %v2304_v47  ;;  %v2320_v54 = vld [vmem:[%s7078_s3 + $0xd50] sm:$0xff]  ;;  %v4995_v47 = vpop.f32.mrf.mxu3 }
 0x1a7   :  { %2857 = vmatpush.msra.mxu3 %v2022_v55  ;;  %v1181_v60 = vpop.f32.mrf.mxu2  ;;  %v2067_v55 = vld [vmem:[%s7078_s3 + $0x568] sm:$0xff]  ;;  %3207 = vmatpush.msrb.mxu1 %v2320_v54  ;;  %v2080_v54 = vld [vmem:[%s7078_s3 + $0x5d0] sm:$0xff] }
 0x1a8   :  { %2858 = vmatmul.f32.vlgmr.msra.gmra.mxu3 %v4639_v26  ;;  %v671_v61 = vpop.f32.mrf.mxu0  ;;  %v1480_v0 = vadd.f32 %v1382_v36, %v1181_v60  ;;  %v2049_v26 = vld [vmem:[%s7078_s3 + $0x4d8] sm:$0xff] }
 0x1a9   :  { %2862 = vmatpush.msrb.mxu3 %v2053_v57  ;;  %v927_v1 = vpop.f32.mrf.mxu1  ;;  %v2065_v60 = vld [vmem:[%s7078_s3 + $0x558] sm:$0xff] }
 0x1aa   :  { %v1384_v5 = vadd.f32 %v927_v1, %v669_v46  ;;  %v1581_v8 = vadd.f32 %v4832_v41, %v1480_v0  ;;  %v2069_v46 = vld [vmem:[%s7078_s3 + $0x578] sm:$0xff] }
 0x1ab   :  { %2863 = vmatpush.msrb.mxu3 %v2052_v59  ;;  %v2066_v59 = vld [vmem:[%s7078_s3 + $0x560] sm:$0xff]  ;;  %v3990_v0 = vld [vmem:[%s7076_s0 + $0xd8] sm:$0xff] }
 0x1ac   :  { %v1679_v14 = vmax.f32 %v1581_v8, 0.0 }
 0x1ad   :  { %2864 = vmatpush.msrb.mxu3 %v2051_v62  ;;  %v2064_v62 = vld [vmem:[%s7078_s3 + $0x550] sm:$0xff] }
 0x1af   :  { %2865 = vmatpush.msrb.mxu3 %v2050_v7  ;;  %v1183_v2 = vpop.f32.mrf.mxu2  ;;  %v2063_v7 = vld [vmem:[%s7078_s3 + $0x548] sm:$0xff] }
 0x1b0   :  { %v674_v10 = vpop.f32.mrf.mxu0  ;;  %v1481_v12 = vadd.f32 %v1383_v51, %v1183_v2  ;;  %v2062_v2 = vld [vmem:[%s7078_s3 + $0x540] sm:$0xff] }
 0x1b1   :  { %2866 = vmatpush.msrb.mxu3 %v2049_v26  ;;  %v930_v4 = vpop.f32.mrf.mxu1 }
 0x1b2   :  { %v1385_v13 = vadd.f32 %v930_v4, %v671_v61  ;;  %v1582_v15 = vadd.f32 %v4832_v41, %v1481_v12  ;;  %v2061_v12 = vld [vmem:[%s7078_s3 + $0x538] sm:$0xff] }
 0x1b3   :  { %2867 = vmatpush.msrb.mxu3 %v2048_v53  ;;  %713 = vmatmul.bf16.gmra.mxu0 %v3988_v3 }
 0x1b4   :  { %969 = vmatmul.bf16.gmra.mxu1 %v3988_v3  ;;  %v1680_v18 = vmax.f32 %v1582_v15, 0.0  ;;  %1225 = vmatmul.bf16.gmra.mxu2 %v3988_v3 }
 0x1b5   :  { %2868 = vmatpush.msrb.mxu3 %v2047_v11 }
 0x1b6   :  { %v4883_v20 = vmax.f32 %v1679_v14, %v1680_v18 }
 0x1b7   :  { %2869 = vmatpush.msrb.mxu3 %v2046_v17  ;;  %v1186_v22 = vpop.f32.mrf.mxu2  ;;  %v2059_v17 = vld [vmem:[%s7078_s3 + $0x528] sm:$0xff] }
 0x1b8   :  { %v676_v23 = vpop.f32.mrf.mxu0  ;;  %v1482_v37 = vadd.f32 %v1384_v5, %v1186_v22  ;;  %v2058_v22 = vld [vmem:[%s7078_s3 + $0x520] sm:$0xff] }
 0x1b9   :  { %2870 = vmatpush.msrb.mxu3 %v2045_v19  ;;  %v932_v25 = vpop.f32.mrf.mxu1 }
 0x1ba   :  { %v1386_v27 = vadd.f32 %v932_v25, %v674_v10  ;;  %v1583_v30 = vadd.f32 %v4832_v41, %v1482_v37  ;;  %v2056_v37 = vld [vmem:[%s7078_s3 + $0x510] sm:$0xff]  ;;  %v3991_v25 = vld [vmem:[%s7076_s0 + $0xe0] sm:$0xff] }
 0x1bb   :  { %2871 = vmatpush.msrb.mxu3 %v2044_v21 }
 0x1bc   :  { %v1681_v39 = vmax.f32 %v1583_v30, 0.0 }
 0x1bd   :  { %2872 = vmatpush.msrb.mxu3 %v2043_v24 }
 0x1bf   :  { %2873 = vmatpush.msrb.mxu3 %v2042_v28  ;;  %v1188_v33 = vpop.f32.mrf.mxu2 }
 0x1c0   :  { %v679_v34 = vpop.f32.mrf.mxu0  ;;  %v1483_v35 = vadd.f32 %v1385_v13, %v1188_v33  ;;  %v2060_v13 = vld [vmem:[%s7078_s3 + $0x530] sm:$0xff] }
 0x1c1   :  { %2874 = vmatpush.msrb.mxu3 %v2041_v29  ;;  %v935_v36 = vpop.f32.mrf.mxu1  ;;  %v2055_v29 = vld [vmem:[%s7078_s3 + $0x508] sm:$0xff] }
 0x1c2   :  { %v1387_v38 = vadd.f32 %v935_v36, %v676_v23  ;;  %v1584_v42 = vadd.f32 %v4832_v41, %v1483_v35  ;;  %v2057_v23 = vld [vmem:[%s7078_s3 + $0x518] sm:$0xff] }
 0x1c3   :  { %2875 = vmatpush.msrb.mxu3 %v2040_v31  ;;  %718 = vmatmul.bf16.gmra.mxu0 %v3989_v32  ;;  %v2085_v36 = vld [vmem:[%s7078_s3 + $0x5f8] sm:$0xff] }
 0x1c4   :  { %974 = vmatmul.bf16.gmra.mxu1 %v3989_v32  ;;  %v1682_v45 = vmax.f32 %v1584_v42, 0.0  ;;  %1230 = vmatmul.bf16.gmra.mxu2 %v3989_v32 }
 0x1c5   :  { %2876 = vmatpush.msrb.mxu3 %v2039_v9 }
 0x1c6   :  { %v4920_v48 = vmax.f32 %v1681_v39, %v1682_v45  ;;  %v2084_v39 = vld [vmem:[%s7078_s3 + $0x5f0] sm:$0xff] }
 0x1c7   :  { %2877 = vmatpush.msrb.mxu3 %v2038_v43  ;;  %v1191_v51 = vpop.f32.mrf.mxu2 }
 0x1c8   :  { %2878 = vmatmul.f32.vlgmr.msrb.gmra.mxu3 %v4671_v50  ;;  %v681_v52 = vpop.f32.mrf.mxu0  ;;  %v1484_v56 = vadd.f32 %v1386_v27, %v1191_v51  ;;  %v2081_v51 = vld [vmem:[%s7078_s3 + $0x5d8] sm:$0xff] }
 0x1c9   :  { %2882 = vmatpush.msra.mxu3 %v2069_v46  ;;  %v937_v57 = vpop.f32.mrf.mxu1 }
 0x1ca   :  { %v1388_v50 = vadd.f32 %v937_v57, %v679_v34  ;;  %v1585_v61 = vadd.f32 %v4832_v41, %v1484_v56  ;;  %v2054_v34 = vld [vmem:[%s7078_s3 + $0x500] sm:$0xff] }
 0x1cb   :  { %2883 = vmatpush.msra.mxu3 %v2068_v49 }
 0x1cc   :  { %v1683_v3 = vmax.f32 %v1585_v61, 0.0  ;;  %v5013_v61 = vpop.f32.mrf.mxu3 }
 0x1cd   :  { %2884 = vmatpush.msra.mxu3 %v2067_v55  ;;  %v3992_v55 = vld [vmem:[%s7076_s0 + $0xe8] sm:$0xff] }
 0x1cf   :  { %2885 = vmatpush.msra.mxu3 %v2066_v59  ;;  %v1193_v1 = vpop.f32.mrf.mxu2 }
 0x1d0   :  { %v684_v5 = vpop.f32.mrf.mxu0  ;;  %v1485_v26 = vadd.f32 %v1387_v38, %v1193_v1  ;;  %v2078_v1 = vld [vmem:[%s7078_s3 + $0x5c0] sm:$0xff] }
 0x1d1   :  { %2886 = vmatpush.msra.mxu3 %v2065_v60  ;;  %v940_v8 = vpop.f32.mrf.mxu1 }
 0x1d2   :  { %v1389_v53 = vadd.f32 %v940_v8, %v681_v52  ;;  %v1586_v10 = vadd.f32 %v4832_v41, %v1485_v26  ;;  %v2077_v26 = vld [vmem:[%s7078_s3 + $0x5b8] sm:$0xff] }
 0x1d3   :  { %2887 = vmatpush.msra.mxu3 %v2064_v62  ;;  %723 = vmatmul.bf16.gmra.mxu0 %v3990_v0 }
 0x1d4   :  { %979 = vmatmul.bf16.gmra.mxu1 %v3990_v0  ;;  %v1684_v11 = vmax.f32 %v1586_v10, 0.0  ;;  %1235 = vmatmul.bf16.gmra.mxu2 %v3990_v0  ;;  %v2335_v10 = vld [vmem:[%s7078_s3 + $0xdc8] sm:$0xff] }
 0x1d5   :  { %2888 = vmatpush.msra.mxu3 %v2063_v7  ;;  %3228 = vmatpush.msrb.mxu2 %v2335_v10  ;;  %v2092_v10 = vld [vmem:[%s7078_s3 + $0x630] sm:$0xff] }
 0x1d6   :  { %v4955_v4 = vmax.f32 %v1683_v3, %v1684_v11  ;;  %v2075_v11 = vld [vmem:[%s7078_s3 + $0x5a8] sm:$0xff] }
 0x1d7   :  { %2889 = vmatpush.msra.mxu3 %v2062_v2  ;;  %v1196_v14 = vpop.f32.mrf.mxu2 }
 0x1d8   :  { %v686_v15 = vpop.f32.mrf.mxu0  ;;  %v1486_v18 = vadd.f32 %v1388_v50, %v1196_v14  ;;  %v2079_v50 = vld [vmem:[%s7078_s3 + $0x5c8] sm:$0xff]  ;;  %v5033_v14 = vpop.f32.mrf.mxu3 }
 0x1d9   :  { %2890 = vmatpush.msra.mxu3 %v2061_v12  ;;  %v942_v19 = vpop.f32.mrf.mxu1 }
 0x1da   :  { %v1390_v21 = vadd.f32 %v942_v19, %v684_v5  ;;  %v1587_v24 = vadd.f32 %v4832_v41, %v1486_v18  ;;  %v2074_v18 = vld [vmem:[%s7078_s3 + $0x5a0] sm:$0xff]  ;;  %v2319_v19 = vld [vmem:[%s7078_s3 + $0xd48] sm:$0xff] }
 0x1db   :  { %2891 = vmatpush.msra.mxu3 %v2060_v13  ;;  %3208 = vmatpush.msrb.mxu1 %v2319_v19 }
 0x1dc   :  { %v1685_v33 = vmax.f32 %v1587_v24, 0.0  ;;  %v3993_v24 = vld [vmem:[%s7076_s0 + $0xf0] sm:$0xff] }
 0x1dd   :  { %2892 = vmatpush.msra.mxu3 %v2059_v17  ;;  %v2303_v17 = vld [vmem:[%s7078_s3 + $0xcc8] sm:$0xff] }
 0x1de   :  { %3188 = vmatpush.msrb.mxu0 %v2303_v17 }
 0x1df   :  { %2893 = vmatpush.msra.mxu3 %v2058_v22  ;;  %v1198_v27 = vpop.f32.mrf.mxu2 }
 0x1e0   :  { %v689_v28 = vpop.f32.mrf.mxu0  ;;  %v1487_v30 = vadd.f32 %v1389_v53, %v1198_v27  ;;  %v2076_v53 = vld [vmem:[%s7078_s3 + $0x5b0] sm:$0xff]  ;;  %v2071_v27 = vld [vmem:[%s7078_s3 + $0x588] sm:$0xff] }
 0x1e1   :  { %2894 = vmatpush.msra.mxu3 %v2057_v23  ;;  %v945_v31 = vpop.f32.mrf.mxu1  ;;  %v2072_v23 = vld [vmem:[%s7078_s3 + $0x590] sm:$0xff] }
 0x1e2   :  { %v1391_v32 = vadd.f32 %v945_v31, %v686_v15  ;;  %v1588_v9 = vadd.f32 %v4832_v41, %v1487_v30  ;;  %v5057_v30 = vpop.f32.mrf.mxu3 }
 0x1e3   :  { %2895 = vmatpush.msra.mxu3 %v2056_v37  ;;  %728 = vmatmul.bf16.gmra.mxu0 %v3991_v25 }
 0x1e4   :  { %984 = vmatmul.bf16.gmra.mxu1 %v3991_v25  ;;  %v1686_v35 = vmax.f32 %v1588_v9, 0.0  ;;  %1240 = vmatmul.bf16.gmra.mxu2 %v3991_v25  ;;  %v2101_v9 = vld [vmem:[%s7078_s3 + $0x678] sm:$0xff] }
 0x1e5   :  { %2896 = vmatpush.msra.mxu3 %v2055_v29 }
 0x1e6   :  { %v4986_v38 = vmax.f32 %v1685_v33, %v1686_v35  ;;  %v2070_v33 = vld [vmem:[%s7078_s3 + $0x580] sm:$0xff] }
 0x1e7   :  { %2897 = vmatpush.msra.mxu3 %v2054_v34  ;;  %v1201_v42 = vpop.f32.mrf.mxu2 }
 0x1e8   :  { %2898 = vmatmul.f32.vlgmr.msra.gmra.mxu3 %v4711_v16  ;;  %v691_v43 = vpop.f32.mrf.mxu0  ;;  %v1488_v45 = vadd.f32 %v1390_v21, %v1201_v42  ;;  %v2082_v16 = vld [vmem:[%s7078_s3 + $0x5e0] sm:$0xff]  ;;  %v2073_v21 = vld [vmem:[%s7078_s3 + $0x598] sm:$0xff] }
 0x1e9   :  { %2902 = vmatpush.msrb.mxu3 %v2085_v36  ;;  %v947_v46 = vpop.f32.mrf.mxu1 }
 0x1ea   :  { %v1392_v49 = vadd.f32 %v947_v46, %v689_v28  ;;  %v1589_v52 = vadd.f32 %v4832_v41, %v1488_v45 }
 0x1eb   :  { %2903 = vmatpush.msrb.mxu3 %v2084_v39  ;;  %v2100_v39 = vld [vmem:[%s7078_s3 + $0x670] sm:$0xff] }
 0x1ec   :  { %v1687_v0 = vmax.f32 %v1589_v52, 0.0 }
 0x1ed   :  { %2904 = vmatpush.msrb.mxu3 %v2083_v44  ;;  %v2099_v44 = vld [vmem:[%s7078_s3 + $0x668] sm:$0xff] }
 0x1ef   :  { %2905 = vmatpush.msrb.mxu3 %v2082_v16  ;;  %v1203_v56 = vpop.f32.mrf.mxu2 }
 0x1f0   :  { %v694_v57 = vpop.f32.mrf.mxu0  ;;  %v1489_v59 = vadd.f32 %v1391_v32, %v1203_v56 }
 0x1f1   :  { %2906 = vmatpush.msrb.mxu3 %v2081_v51  ;;  %v950_v60 = vpop.f32.mrf.mxu1  ;;  %v2097_v51 = vld [vmem:[%s7078_s3 + $0x658] sm:$0xff] }
 0x1f2   :  { %v1393_v62 = vadd.f32 %v950_v60, %v691_v43  ;;  %v1590_v5 = vadd.f32 %v4832_v41, %v1489_v59 }
 0x1f3   :  { %2907 = vmatpush.msrb.mxu3 %v2080_v54  ;;  %733 = vmatmul.bf16.gmra.mxu0 %v3992_v55  ;;  %v2096_v54 = vld [vmem:[%s7078_s3 + $0x650] sm:$0xff] }
 0x1f4   :  { %989 = vmatmul.bf16.gmra.mxu1 %v3992_v55  ;;  %v1688_v7 = vmax.f32 %v1590_v5, 0.0  ;;  %1245 = vmatmul.bf16.gmra.mxu2 %v3992_v55  ;;  %v3994_v55 = vld [vmem:[%s7076_s0 + $0xf8] sm:$0xff]  ;;  %v2094_v5 = vld [vmem:[%s7078_s3 + $0x640] sm:$0xff] }
 0x1f5   :  { %2908 = vmatpush.msrb.mxu3 %v2079_v50  ;;  %v2095_v50 = vld [vmem:[%s7078_s3 + $0x648] sm:$0xff] }
 0x1f6   :  { %v5022_v8 = vmax.f32 %v1687_v0, %v1688_v7 }
 0x1f7   :  { %2909 = vmatpush.msrb.mxu3 %v2078_v1  ;;  %v1206_v3 = vpop.f32.mrf.mxu2 }
 0x1f8   :  { %v696_v2 = vpop.f32.mrf.mxu0  ;;  %v1490_v12 = vadd.f32 %v1392_v49, %v1206_v3  ;;  %v2779_v49 = vpop.f32.mrf.mxu3  ;;  %v4038_v3 = vld [vmem:[%s7079_s4] ss:$0 sm:$0xff] }
 0x1f9   :  { %2910 = vmatpush.msrb.mxu3 %v2077_v26  ;;  %v952_v13 = vpop.f32.mrf.mxu1  ;;  %v2093_v26 = vld [vmem:[%s7078_s3 + $0x638] sm:$0xff] }
 0x1fa   :  { %v1394_v15 = vadd.f32 %v952_v13, %v694_v57  ;;  %v1591_v22 = vadd.f32 %v4832_v41, %v1490_v12  ;;  %v2091_v13 = vld [vmem:[%s7078_s3 + $0x628] sm:$0xff] }
 0x1fb   :  { %2911 = vmatpush.msrb.mxu3 %v2076_v53 }
 0x1fc   :  { %v1689_v32 = vmax.f32 %v1591_v22, 0.0  ;;  %v2090_v22 = vld [vmem:[%s7078_s3 + $0x620] sm:$0xff] }
 0x1fd   :  { %2912 = vmatpush.msrb.mxu3 %v2075_v11 }
 0x1ff   :  { %2913 = vmatpush.msrb.mxu3 %v2074_v18  ;;  %v1208_v37 = vpop.f32.mrf.mxu2 }
 0x200   :  { %v699_v25 = vpop.f32.mrf.mxu0  ;;  %v1491_v28 = vadd.f32 %v1393_v62, %v1208_v37  ;;  %v2799_v62 = vpop.f32.mrf.mxu3 }
 0x201   :  { %2914 = vmatpush.msrb.mxu3 %v2073_v21  ;;  %v955_v29 = vpop.f32.mrf.mxu1  ;;  %v2700_v21 = vadd.f32 %v4038_v3, %v4995_v47  ;;  %v2088_v47 = vld [vmem:[%s7078_s3 + $0x610] sm:$0xff]  ;;  %v2111_v3 = vld [vmem:[%s7078_s3 + $0x6c8] sm:$0xff] }
 0x202   :  { %v1395_v31 = vadd.f32 %v955_v29, %v696_v2  ;;  %v1592_v34 = vadd.f32 %v4832_v41, %v1491_v28 }
 0x203   :  { %2915 = vmatpush.msrb.mxu3 %v2072_v23  ;;  %738 = vmatmul.bf16.gmra.mxu0 %v3993_v24  ;;  %v2720_v23 = vadd.f32 %v5013_v61, %v2700_v21 }
 0x204   :  { %994 = vmatmul.bf16.gmra.mxu1 %v3993_v24  ;;  %v1690_v35 = vmax.f32 %v1592_v34, 0.0  ;;  %1250 = vmatmul.bf16.gmra.mxu2 %v3993_v24  ;;  %v2089_v24 = vld [vmem:[%s7078_s3 + $0x618] sm:$0xff] }
 0x205   :  { %2916 = vmatpush.msrb.mxu3 %v2071_v27  ;;  %v2740_v37 = vadd.f32 %v5033_v14, %v2720_v23  ;;  %v3995_v27 = vld [vmem:[%s7076_s0 + $0x100] sm:$0xff] }
 0x206   :  { %v5067_v36 = vmax.f32 %v1689_v32, %v1690_v35 }
 0x207   :  { %2917 = vmatpush.msrb.mxu3 %v2070_v33  ;;  %v1211_v42 = vpop.f32.mrf.mxu2  ;;  %v2760_v29 = vadd.f32 %v5057_v30, %v2740_v37  ;;  %v2107_v37 = vld [vmem:[%s7078_s3 + $0x6a8] sm:$0xff] }
 0x208   :  { %2918 = vmatmul.f32.vlgmr.msrb.gmra.mxu3 %v4743_v40  ;;  %v701_v43 = vpop.f32.mrf.mxu0  ;;  %v1492_v45 = vadd.f32 %v1394_v15, %v1211_v42  ;;  %v2098_v40 = vld [vmem:[%s7078_s3 + $0x660] sm:$0xff]  ;;  %v2819_v18 = vpop.f32.mrf.mxu3 }
 0x209   :  { %2922 = vmatpush.msra.mxu3 %v2101_v9  ;;  %v957_v46 = vpop.f32.mrf.mxu1  ;;  %v2780_v9 = vadd.f32 %v2779_v49, %v2760_v29  ;;  %v2116_v49 = vld [vmem:[%s7078_s3 + $0x6f0] sm:$0xff] }
 0x20a   :  { %v1396_v16 = vadd.f32 %v957_v46, %v699_v25  ;;  %v1593_v52 = vadd.f32 %v4832_v41, %v1492_v45 }
 0x20b   :  { %2923 = vmatpush.msra.mxu3 %v2100_v39  ;;  %v2086_v39 = vld [vmem:[%s7078_s3 + $0x600] sm:$0xff]  ;;  %v2800_v30 = vadd.f32 %v2799_v62, %v2780_v9 }
 0x20c   :  { %v1691_v1 = vmax.f32 %v1593_v52, 0.0  ;;  %v2115_v52 = vld [vmem:[%s7078_s3 + $0x6e8] sm:$0xff]  ;;  %v2302_v62 = vld [vmem:[%s7078_s3 + $0xcc0] sm:$0xff] }
 0x20d   :  { %2924 = vmatpush.msra.mxu3 %v2099_v44  ;;  %v2820_v45 = vadd.f32 %v2819_v18, %v2800_v30  ;;  %3189 = vmatpush.msrb.mxu0 %v2302_v62  ;;  %v2109_v18 = vld [vmem:[%s7078_s3 + $0x6b8] sm:$0xff]  ;;  %v2102_v30 = vld [vmem:[%s7078_s3 + $0x680] sm:$0xff] }
 0x20f   :  { %2925 = vmatpush.msra.mxu3 %v2098_v40  ;;  %v1213_v56 = vpop.f32.mrf.mxu2 }
 0x210   :  { %v704_v57 = vpop.f32.mrf.mxu0  ;;  %v1493_v59 = vadd.f32 %v1395_v31, %v1213_v56  ;;  %v2087_v31 = vld [vmem:[%s7078_s3 + $0x608] sm:$0xff]  ;;  %v2839_v33 = vpop.f32.mrf.mxu3 }
 0x211   :  { %2926 = vmatpush.msra.mxu3 %v2097_v51  ;;  %v960_v60 = vpop.f32.mrf.mxu1  ;;  %v2840_v51 = vadd.f32 %v2839_v33, %v2820_v45 }
 0x212   :  { %v1397_v0 = vadd.f32 %v960_v60, %v701_v43  ;;  %v1594_v7 = vadd.f32 %v4832_v41, %v1493_v59  ;;  %v2117_v43 = vld [vmem:[%s7078_s3 + $0x6f8] sm:$0xff]  ;;  %v2334_v59 = vld [vmem:[%s7078_s3 + $0xdc0] sm:$0xff] }
 0x213   :  { %2927 = vmatpush.msra.mxu3 %v2096_v54  ;;  %743 = vmatmul.bf16.gmra.mxu0 %v3994_v55  ;;  %v2113_v60 = vld [vmem:[%s7078_s3 + $0x6d8] sm:$0xff] }
 0x214   :  { %999 = vmatmul.bf16.gmra.mxu1 %v3994_v55  ;;  %v1692_v53 = vmax.f32 %v1594_v7, 0.0  ;;  %1255 = vmatmul.bf16.gmra.mxu2 %v3994_v55 }
 0x215   :  { %2928 = vmatpush.msra.mxu3 %v2095_v50  ;;  %3229 = vmatpush.msrb.mxu2 %v2334_v59  ;;  %v2129_v59 = vld [vmem:[%s7078_s3 + $0x758] sm:$0xff] }
 0x216   :  { %v5101_v2 = vmax.f32 %v1691_v1, %v1692_v53  ;;  %v2112_v1 = vld [vmem:[%s7078_s3 + $0x6d0] sm:$0xff]  ;;  %v2318_v53 = vld [vmem:[%s7078_s3 + $0xd40] sm:$0xff] }
 0x217   :  { %2929 = vmatpush.msra.mxu3 %v2094_v5  ;;  %v1216_v11 = vpop.f32.mrf.mxu2  ;;  %v3996_v5 = vld [vmem:[%s7076_s0 + $0x108] sm:$0xff]  ;;  %3209 = vmatpush.msrb.mxu1 %v2318_v53 }
 0x218   :  { %v706_v12 = vpop.f32.mrf.mxu0  ;;  %v1494_v15 = vadd.f32 %v1396_v16, %v1216_v11 }
 0x219   :  { %2930 = vmatpush.msra.mxu3 %v2093_v26  ;;  %v962_v17 = vpop.f32.mrf.mxu1 }
 0x21a   :  { %v1398_v19 = vadd.f32 %v962_v17, %v704_v57  ;;  %v1595_v25 = vadd.f32 %v4832_v41, %v1494_v15  ;;  %v2110_v15 = vld [vmem:[%s7078_s3 + $0x6c0] sm:$0xff] }
 0x21b   :  { %2931 = vmatpush.msra.mxu3 %v2092_v10 }
 0x21c   :  { %v1693_v35 = vmax.f32 %v1595_v25, 0.0 }
 0x21d   :  { %2932 = vmatpush.msra.mxu3 %v2091_v13 }
 0x21f   :  { %2933 = vmatpush.msra.mxu3 %v2090_v22  ;;  %v1218_v28 = vpop.f32.mrf.mxu2  ;;  %v2108_v22 = vld [vmem:[%s7078_s3 + $0x6b0] sm:$0xff] }
 0x220   :  { %v709_v61 = vpop.f32.mrf.mxu0  ;;  %v1495_v14 = vadd.f32 %v1397_v0, %v1218_v28  ;;  %v2106_v28 = vld [vmem:[%s7078_s3 + $0x6a0] sm:$0xff] }
 0x221   :  { %2934 = vmatpush.msra.mxu3 %v2089_v24  ;;  %v965_v32 = vpop.f32.mrf.mxu1 }
 0x222   :  { %v1399_v34 = vadd.f32 %v965_v32, %v706_v12  ;;  %v1596_v42 = vadd.f32 %v4832_v41, %v1495_v14  ;;  %v3997_v14 = vld [vmem:[%s7076_s0 + $0x110] sm:$0xff] }
 0x223   :  { %2935 = vmatpush.msra.mxu3 %v2088_v47  ;;  %748 = vmatmul.bf16.gmra.mxu0 %v3995_v27 }
 0x224   :  { %1004 = vmatmul.bf16.gmra.mxu1 %v3995_v27  ;;  %v1694_v44 = vmax.f32 %v1596_v42, 0.0  ;;  %1260 = vmatmul.bf16.gmra.mxu2 %v3995_v27 }
 0x225   :  { %2936 = vmatpush.msra.mxu3 %v2087_v31  ;;  %v2104_v31 = vld [vmem:[%s7078_s3 + $0x690] sm:$0xff] }
 0x226   :  { %v5137_v46 = vmax.f32 %v1693_v35, %v1694_v44  ;;  %v2133_v44 = vld [vmem:[%s7078_s3 + $0x778] sm:$0xff] }
 0x227   :  { %2937 = vmatpush.msra.mxu3 %v2086_v39  ;;  %v1221_v16 = vpop.f32.mrf.mxu2 }
 0x228   :  { %2938 = vmatmul.f32.vlgmr.msra.gmra.mxu3 %v4774_v6  ;;  %v711_v40 = vpop.f32.mrf.mxu0  ;;  %v1496_v54 = vadd.f32 %v1398_v19, %v1221_v16  ;;  %v2114_v6 = vld [vmem:[%s7078_s3 + $0x6e0] sm:$0xff] }
 0x229   :  { %2942 = vmatpush.msrb.mxu3 %v2117_v43  ;;  %v967_v55 = vpop.f32.mrf.mxu1 }
 0x22a   :  { %v1400_v57 = vadd.f32 %v967_v55, %v709_v61  ;;  %v1597_v0 = vadd.f32 %v4832_v41, %v1496_v54  ;;  %v2105_v61 = vld [vmem:[%s7078_s3 + $0x698] sm:$0xff] }
 0x22b   :  { %2943 = vmatpush.msrb.mxu3 %v2116_v49  ;;  %v2859_v56 = vpop.f32.mrf.mxu3  ;;  %v2132_v49 = vld [vmem:[%s7078_s3 + $0x770] sm:$0xff] }
 0x22c   :  { %v5148_v50 = vadd.f32 %v2859_v56, %v2840_v51  ;;  %v1695_v13 = vmax.f32 %v1597_v0, 0.0  ;;  %v3998_v0 = vld [vmem:[%s7076_s0 + $0x118] sm:$0xff] }
 0x22d   :  { %2944 = vmatpush.msrb.mxu3 %v2115_v52  ;;  %v2131_v52 = vld [vmem:[%s7078_s3 + $0x768] sm:$0xff] }
 0x22f   :  { %2945 = vmatpush.msrb.mxu3 %v2114_v6  ;;  %v1223_v7 = vpop.f32.mrf.mxu2 }
 0x230   :  { %v714_v26 = vpop.f32.mrf.mxu0  ;;  %v1497_v10 = vadd.f32 %v1399_v34, %v1223_v7  ;;  %v2103_v34 = vld [vmem:[%s7078_s3 + $0x688] sm:$0xff] }
 0x231   :  { %2946 = vmatpush.msrb.mxu3 %v2113_v60  ;;  %v970_v11 = vpop.f32.mrf.mxu1  ;;  %v2128_v60 = vld [vmem:[%s7078_s3 + $0x750] sm:$0xff] }
 0x232   :  { %v1401_v12 = vadd.f32 %v970_v11, %v711_v40  ;;  %v1598_v17 = vadd.f32 %v4832_v41, %v1497_v10  ;;  %v2126_v10 = vld [vmem:[%s7078_s3 + $0x740] sm:$0xff] }
 0x233   :  { %2947 = vmatpush.msrb.mxu3 %v2112_v1  ;;  %753 = vmatmul.bf16.gmra.mxu0 %v3996_v5 }
 0x234   :  { %1009 = vmatmul.bf16.gmra.mxu1 %v3996_v5  ;;  %v1696_v19 = vmax.f32 %v1598_v17, 0.0  ;;  %1265 = vmatmul.bf16.gmra.mxu2 %v3996_v5  ;;  %v2127_v5 = vld [vmem:[%s7078_s3 + $0x748] sm:$0xff] }
 0x235   :  { %2948 = vmatpush.msrb.mxu3 %v2111_v3 }
 0x236   :  { %v5179_v21 = vmax.f32 %v1695_v13, %v1696_v19 }
 0x237   :  { %2949 = vmatpush.msrb.mxu3 %v2110_v15  ;;  %v1226_v23 = vpop.f32.mrf.mxu2  ;;  %v2124_v15 = vld [vmem:[%s7078_s3 + $0x730] sm:$0xff] }
 0x238   :  { %v716_v24 = vpop.f32.mrf.mxu0  ;;  %v1498_v25 = vadd.f32 %v1400_v57, %v1226_v23 }
 0x239   :  { %2950 = vmatpush.msrb.mxu3 %v2109_v18  ;;  %v972_v47 = vpop.f32.mrf.mxu1 }
 0x23a   :  { %v1402_v27 = vadd.f32 %v972_v47, %v714_v26  ;;  %v1599_v29 = vadd.f32 %v4832_v41, %v1498_v25  ;;  %v2122_v25 = vld [vmem:[%s7078_s3 + $0x720] sm:$0xff]  ;;  %v2121_v47 = vld [vmem:[%s7078_s3 + $0x718] sm:$0xff] }
 0x23b   :  { %2951 = vmatpush.msrb.mxu3 %v2108_v22  ;;  %v2123_v22 = vld [vmem:[%s7078_s3 + $0x728] sm:$0xff] }
 0x23c   :  { %v1697_v42 = vmax.f32 %v1599_v29, 0.0  ;;  %v3999_v29 = vld [vmem:[%s7076_s0 + $0x120] sm:$0xff] }
 0x23d   :  { %2952 = vmatpush.msrb.mxu3 %v2107_v37 }
 0x23f   :  { %2953 = vmatpush.msrb.mxu3 %v2106_v28  ;;  %v1228_v32 = vpop.f32.mrf.mxu2  ;;  %v2120_v28 = vld [vmem:[%s7078_s3 + $0x710] sm:$0xff] }
 0x240   :  { %v719_v33 = vpop.f32.mrf.mxu0  ;;  %v1499_v9 = vadd.f32 %v1401_v12, %v1228_v32  ;;  %v2125_v12 = vld [vmem:[%s7078_s3 + $0x738] sm:$0xff] }
 0x241   :  { %2954 = vmatpush.msrb.mxu3 %v2105_v61  ;;  %v975_v35 = vpop.f32.mrf.mxu1  ;;  %v2301_v32 = vld [vmem:[%s7078_s3 + $0xcb8] sm:$0xff] }
 0x242   :  { %v1403_v39 = vadd.f32 %v975_v35, %v716_v24  ;;  %v1600_v43 = vadd.f32 %v4832_v41, %v1499_v9  ;;  %3190 = vmatpush.msrb.mxu0 %v2301_v32  ;;  %v2135_v32 = vld [vmem:[%s7078_s3 + $0x788] sm:$0xff] }
 0x243   :  { %2955 = vmatpush.msrb.mxu3 %v2104_v31  ;;  %758 = vmatmul.bf16.gmra.mxu0 %v3997_v14 }
 0x244   :  { %1014 = vmatmul.bf16.gmra.mxu1 %v3997_v14  ;;  %v1698_v45 = vmax.f32 %v1600_v43, 0.0  ;;  %1270 = vmatmul.bf16.gmra.mxu2 %v3997_v14 }
 0x245   :  { %2956 = vmatpush.msrb.mxu3 %v2103_v34 }
 0x246   :  { %v5214_v16 = vmax.f32 %v1697_v42, %v1698_v45 }
 0x247   :  { %2957 = vmatpush.msrb.mxu3 %v2102_v30  ;;  %v1231_v40 = vpop.f32.mrf.mxu2  ;;  %v2118_v30 = vld [vmem:[%s7078_s3 + $0x700] sm:$0xff] }
 0x248   :  { %2958 = vmatmul.f32.vlgmr.msrb.gmra.mxu3 %v4815_v63  ;;  %v721_v51 = vpop.f32.mrf.mxu0  ;;  %v1500_v54 = vadd.f32 %v1402_v27, %v1231_v40  ;;  %v2130_v63 = vld [vmem:[%s7078_s3 + $0x760] sm:$0xff]  ;;  %v2333_v27 = vld [vmem:[%s7078_s3 + $0xdb8] sm:$0xff] }
 0x249   :  { %2962 = vmatpush.msra.mxu3 %v2133_v44  ;;  %v977_v55 = vpop.f32.mrf.mxu1  ;;  %3230 = vmatpush.msrb.mxu2 %v2333_v27  ;;  %v2149_v44 = vld [vmem:[%s7078_s3 + $0x7f8] sm:$0xff] }
 0x24a   :  { %v1404_v57 = vadd.f32 %v977_v55, %v719_v33  ;;  %v1601_v62 = vadd.f32 %v4832_v41, %v1500_v54  ;;  %v2119_v33 = vld [vmem:[%s7078_s3 + $0x708] sm:$0xff]  ;;  %v2137_v27 = vld [vmem:[%s7078_s3 + $0x798] sm:$0xff] }
 0x24b   :  { %2963 = vmatpush.msra.mxu3 %v2132_v49  ;;  %v2879_v56 = vpop.f32.mrf.mxu3  ;;  %v2148_v49 = vld [vmem:[%s7078_s3 + $0x7f0] sm:$0xff]  ;;  %v2147_v54 = vld [vmem:[%s7078_s3 + $0x7e8] sm:$0xff] }
 0x24c   :  { %v5223_v6 = vadd.f32 %v2879_v56, %v5148_v50  ;;  %v1699_v3 = vmax.f32 %v1601_v62, 0.0  ;;  %v2144_v62 = vld [vmem:[%s7078_s3 + $0x7d0] sm:$0xff] }
 0x24d   :  { %2964 = vmatpush.msra.mxu3 %v2131_v52 }
 0x24f   :  { %2965 = vmatpush.msra.mxu3 %v2130_v63  ;;  %v1233_v1 = vpop.f32.mrf.mxu2 }
 0x250   :  { %v724_v50 = vpop.f32.mrf.mxu0  ;;  %v1501_v7 = vadd.f32 %v1403_v39, %v1233_v1  ;;  %v2317_v39 = vld [vmem:[%s7078_s3 + $0xd38] sm:$0xff]  ;;  %v4000_v1 = vld [vmem:[%s7076_s0 + $0x128] sm:$0xff] }
 0x251   :  { %2966 = vmatpush.msra.mxu3 %v2129_v59  ;;  %v980_v26 = vpop.f32.mrf.mxu1  ;;  %3210 = vmatpush.msrb.mxu1 %v2317_v39  ;;  %v2134_v39 = vld [vmem:[%s7078_s3 + $0x780] sm:$0xff] }
 0x252   :  { %v1405_v53 = vadd.f32 %v980_v26, %v721_v51  ;;  %v1602_v11 = vadd.f32 %v4832_v41, %v1501_v7 }
 0x253   :  { %2967 = vmatpush.msra.mxu3 %v2128_v60  ;;  %763 = vmatmul.bf16.gmra.mxu0 %v3998_v0  ;;  %v2145_v60 = vld [vmem:[%s7078_s3 + $0x7d8] sm:$0xff] }
 0x254   :  { %1019 = vmatmul.bf16.gmra.mxu1 %v3998_v0  ;;  %v1700_v13 = vmax.f32 %v1602_v11, 0.0  ;;  %1275 = vmatmul.bf16.gmra.mxu2 %v3998_v0 }
 0x255   :  { %2968 = vmatpush.msra.mxu3 %v2127_v5  ;;  %v2143_v5 = vld [vmem:[%s7078_s3 + $0x7c8] sm:$0xff] }
 0x256   :  { %v5248_v17 = vmax.f32 %v1699_v3, %v1700_v13 }
 0x257   :  { %2969 = vmatpush.msra.mxu3 %v2126_v10  ;;  %v1236_v18 = vpop.f32.mrf.mxu2  ;;  %v5319_v10 = vld [vmem:[%s7077_s2] ss:$0 sm:$0xff] }
 0x258   :  { %v726_v19 = vpop.f32.mrf.mxu0  ;;  %v1502_v23 = vadd.f32 %v1404_v57, %v1236_v18 }
 0x259   :  { %2970 = vmatpush.msra.mxu3 %v2125_v12  ;;  %v982_v24 = vpop.f32.mrf.mxu1  ;;  %v2141_v12 = vld [vmem:[%s7078_s3 + $0x7b8] sm:$0xff] }
 0x25a   :  { %v1406_v37 = vadd.f32 %v982_v24, %v724_v50  ;;  %v1603_v61 = vadd.f32 %v4832_v41, %v1502_v23  ;;  %v2139_v23 = vld [vmem:[%s7078_s3 + $0x7a8] sm:$0xff] }
 0x25b   :  { %2971 = vmatpush.msra.mxu3 %v2124_v15  ;;  %v2140_v15 = vld [vmem:[%s7078_s3 + $0x7b0] sm:$0xff] }
 0x25c   :  { %v1701_v42 = vmax.f32 %v1603_v61, 0.0 }
 0x25d   :  { %2972 = vmatpush.msra.mxu3 %v2123_v22 }
 0x25f   :  { %2973 = vmatpush.msra.mxu3 %v2122_v25  ;;  %v1238_v31 = vpop.f32.mrf.mxu2 }
 0x260   :  { %v729_v14 = vpop.f32.mrf.mxu0  ;;  %v1503_v34 = vadd.f32 %v1405_v53, %v1238_v31 }
 0x261   :  { %2974 = vmatpush.msra.mxu3 %v2121_v47  ;;  %v985_v9 = vpop.f32.mrf.mxu1  ;;  %v2138_v47 = vld [vmem:[%s7078_s3 + $0x7a0] sm:$0xff] }
 0x262   :  { %v1407_v35 = vadd.f32 %v985_v9, %v726_v19  ;;  %v1604_v43 = vadd.f32 %v4832_v41, %v1503_v34 }
 0x263   :  { %2975 = vmatpush.msra.mxu3 %v2120_v28  ;;  %768 = vmatmul.bf16.gmra.mxu0 %v3999_v29  ;;  %v2136_v28 = vld [vmem:[%s7078_s3 + $0x790] sm:$0xff] }
 0x264   :  { %1024 = vmatmul.bf16.gmra.mxu1 %v3999_v29  ;;  %v1702_v45 = vmax.f32 %v1604_v43, 0.0  ;;  %1280 = vmatmul.bf16.gmra.mxu2 %v3999_v29  ;;  %v4001_v29 = vld [vmem:[%s7076_s0 + $0x130] sm:$0xff] }
 0x265   :  { %2976 = vmatpush.msra.mxu3 %v2119_v33 }
 0x266   :  { %v5289_v40 = vmax.f32 %v1701_v42, %v1702_v45 }
 0x267   :  { %2977 = vmatpush.msra.mxu3 %v2118_v30  ;;  %v1241_v51 = vpop.f32.mrf.mxu2  ;;  %v2165_v30 = vld [vmem:[%s7078_s3 + $0x878] sm:$0xff] }
 0x268   :  { %2978 = vmatmul.f32.vlgmr.msra.gmra.mxu3 %v4851_v58  ;;  %v731_v52 = vpop.f32.mrf.mxu0  ;;  %v1504_v55 = vadd.f32 %v1406_v37, %v1241_v51  ;;  %v2146_v58 = vld [vmem:[%s7078_s3 + $0x7e0] sm:$0xff] }
 0x269   :  { %2982 = vmatpush.msrb.mxu3 %v2149_v44  ;;  %v987_v56 = vpop.f32.mrf.mxu1  ;;  %v2164_v44 = vld [vmem:[%s7078_s3 + $0x870] sm:$0xff] }
 0x26a   :  { %v1408_v63 = vadd.f32 %v987_v56, %v729_v14  ;;  %v1605_v0 = vadd.f32 %v4832_v41, %v1504_v55  ;;  %v2142_v41 = vld [vmem:[%s7078_s3 + $0x7c0] sm:$0xff] }
 0x26b   :  { %2983 = vmatpush.msrb.mxu3 %v2148_v49  ;;  %v2899_v57 = vpop.f32.mrf.mxu3 }
 0x26c   :  { %v5298_v59 = vadd.f32 %v2899_v57, %v5223_v6  ;;  %v1703_v3 = vmax.f32 %v1605_v0, 0.0  ;;  %v4002_v0 = vld [vmem:[%s7076_s0 + $0x138] sm:$0xff] }
 0x26d   :  { %2984 = vmatpush.msrb.mxu3 %v2147_v54 }
 0x26f   :  { %2985 = vmatpush.msrb.mxu3 %v2146_v58  ;;  %v1243_v50 = vpop.f32.mrf.mxu2  ;;  %v2161_v58 = vld [vmem:[%s7078_s3 + $0x858] sm:$0xff] }
 0x270   :  { %v734_v6 = vpop.f32.mrf.mxu0  ;;  %v1505_v7 = vadd.f32 %v1407_v35, %v1243_v50  ;;  %v2159_v50 = vld [vmem:[%s7078_s3 + $0x848] sm:$0xff] }
 0x271   :  { %2986 = vmatpush.msrb.mxu3 %v2145_v60  ;;  %v990_v26 = vpop.f32.mrf.mxu1  ;;  %v2160_v60 = vld [vmem:[%s7078_s3 + $0x850] sm:$0xff] }
 0x272   :  { %v1409_v53 = vadd.f32 %v990_v26, %v731_v52  ;;  %v1606_v11 = vadd.f32 %v5319_v10, %v1505_v7  ;;  %v2163_v52 = vld [vmem:[%s7078_s3 + $0x868] sm:$0xff]  ;;  %v2332_v26 = vld [vmem:[%s7078_s3 + $0xdb0] sm:$0xff] }
 0x273   :  { %2987 = vmatpush.msrb.mxu3 %v2144_v62  ;;  %773 = vmatmul.bf16.gmra.mxu0 %v4000_v1 }
 0x274   :  { %1029 = vmatmul.bf16.gmra.mxu1 %v4000_v1  ;;  %v1704_v13 = vmax.f32 %v1606_v11, 0.0  ;;  %1285 = vmatmul.bf16.gmra.mxu2 %v4000_v1  ;;  %v2300_v11 = vld [vmem:[%s7078_s3 + $0xcb0] sm:$0xff] }
 0x275   :  { %2988 = vmatpush.msrb.mxu3 %v2143_v5  ;;  %3231 = vmatpush.msrb.mxu2 %v2332_v26 }
 0x276   :  { %v5328_v18 = vmax.f32 %v1703_v3, %v1704_v13  ;;  %v2158_v3 = vld [vmem:[%s7078_s3 + $0x840] sm:$0xff]  ;;  %3191 = vmatpush.msrb.mxu0 %v2300_v11 }
 0x277   :  { %2989 = vmatpush.msrb.mxu3 %v2142_v41  ;;  %v1246_v19 = vpop.f32.mrf.mxu2 }
 0x278   :  { %v736_v22 = vpop.f32.mrf.mxu0  ;;  %v1506_v24 = vadd.f32 %v1408_v63, %v1246_v19  ;;  %v2156_v19 = vld [vmem:[%s7078_s3 + $0x830] sm:$0xff] }
 0x279   :  { %2990 = vmatpush.msrb.mxu3 %v2141_v12  ;;  %v992_v37 = vpop.f32.mrf.mxu1  ;;  %v2157_v12 = vld [vmem:[%s7078_s3 + $0x838] sm:$0xff] }
 0x27a   :  { %v1410_v25 = vadd.f32 %v992_v37, %v734_v6  ;;  %v1607_v61 = vadd.f32 %v5319_v10, %v1506_v24  ;;  %v2155_v37 = vld [vmem:[%s7078_s3 + $0x828] sm:$0xff] }
 0x27b   :  { %2991 = vmatpush.msrb.mxu3 %v2140_v15  ;;  %v2316_v15 = vld [vmem:[%s7078_s3 + $0xd30] sm:$0xff] }
 0x27c   :  { %v1705_v35 = vmax.f32 %v1607_v61, 0.0  ;;  %3211 = vmatpush.msrb.mxu1 %v2316_v15  ;;  %v2153_v61 = vld [vmem:[%s7078_s3 + $0x818] sm:$0xff]  ;;  %v2172_v15 = vld [vmem:[%s7078_s3 + $0x8b0] sm:$0xff] }
 0x27d   :  { %2992 = vmatpush.msrb.mxu3 %v2139_v23 }
 0x27f   :  { %2993 = vmatpush.msrb.mxu3 %v2138_v47  ;;  %v1248_v31 = vpop.f32.mrf.mxu2 }
 0x280   :  { %v739_v14 = vpop.f32.mrf.mxu0  ;;  %v1507_v33 = vadd.f32 %v1409_v53, %v1248_v31 }
 0x281   :  { %2994 = vmatpush.msrb.mxu3 %v2137_v27  ;;  %v995_v34 = vpop.f32.mrf.mxu1 }
 0x282   :  { %v1411_v9 = vadd.f32 %v995_v34, %v736_v22  ;;  %v1608_v42 = vadd.f32 %v5319_v10, %v1507_v33  ;;  %v2151_v34 = vld [vmem:[%s7078_s3 + $0x808] sm:$0xff] }
 0x283   :  { %2995 = vmatpush.msrb.mxu3 %v2136_v28  ;;  %778 = vmatmul.bf16.gmra.mxu0 %v4001_v29  ;;  %v2154_v28 = vld [vmem:[%s7078_s3 + $0x820] sm:$0xff] }
 0x284   :  { %1034 = vmatmul.bf16.gmra.mxu1 %v4001_v29  ;;  %v1706_v43 = vmax.f32 %v1608_v42, 0.0  ;;  %1290 = vmatmul.bf16.gmra.mxu2 %v4001_v29  ;;  %v2152_v29 = vld [vmem:[%s7078_s3 + $0x810] sm:$0xff] }
 0x285   :  { %2996 = vmatpush.msrb.mxu3 %v2135_v32 }
 0x286   :  { %v5360_v45 = vmax.f32 %v1705_v35, %v1706_v43 }
 0x287   :  { %2997 = vmatpush.msrb.mxu3 %v2134_v39  ;;  %v1251_v49 = vpop.f32.mrf.mxu2 }
 0x288   :  { %2998 = vmatmul.f32.vlgmr.msrb.gmra.mxu3 %v4883_v20  ;;  %v741_v51 = vpop.f32.mrf.mxu0  ;;  %v1508_v54 = vadd.f32 %v1410_v25, %v1251_v49  ;;  %v2162_v20 = vld [vmem:[%s7078_s3 + $0x860] sm:$0xff] }
 0x289   :  { %3002 = vmatpush.msra.mxu3 %v2165_v30  ;;  %v997_v55 = vpop.f32.mrf.mxu1  ;;  %v2150_v30 = vld [vmem:[%s7078_s3 + $0x800] sm:$0xff] }
 0x28a   :  { %v1412_v57 = vadd.f32 %v997_v55, %v739_v14  ;;  %v1609_v62 = vadd.f32 %v5319_v10, %v1508_v54  ;;  %v4003_v14 = vld [vmem:[%s7076_s0 + $0x140] sm:$0xff] }
 0x28b   :  { %3003 = vmatpush.msra.mxu3 %v2164_v44  ;;  %v2919_v56 = vpop.f32.mrf.mxu3  ;;  %v2181_v44 = vld [vmem:[%s7078_s3 + $0x8f8] sm:$0xff] }
 0x28c   :  { %v5369_v63 = vadd.f32 %v2919_v56, %v5298_v59  ;;  %v1707_v53 = vmax.f32 %v1609_v62, 0.0  ;;  %v2179_v56 = vld [vmem:[%s7078_s3 + $0x8e8] sm:$0xff] }
 0x28d   :  { %3004 = vmatpush.msra.mxu3 %v2163_v52 }
 0x28f   :  { %3005 = vmatpush.msra.mxu3 %v2162_v20  ;;  %v1253_v1 = vpop.f32.mrf.mxu2 }
 0x290   :  { %v744_v59 = vpop.f32.mrf.mxu0  ;;  %v1509_v6 = vadd.f32 %v1411_v9, %v1253_v1  ;;  %v2176_v1 = vld [vmem:[%s7078_s3 + $0x8d0] sm:$0xff] }
 0x291   :  { %3006 = vmatpush.msra.mxu3 %v2161_v58  ;;  %v1000_v5 = vpop.f32.mrf.mxu1 }
 0x292   :  { %v1413_v7 = vadd.f32 %v1000_v5, %v741_v51  ;;  %v1610_v41 = vadd.f32 %v5319_v10, %v1509_v6  ;;  %v2180_v51 = vld [vmem:[%s7078_s3 + $0x8f0] sm:$0xff]  ;;  %v2175_v5 = vld [vmem:[%s7078_s3 + $0x8c8] sm:$0xff] }
 0x293   :  { %3007 = vmatpush.msra.mxu3 %v2160_v60  ;;  %783 = vmatmul.bf16.gmra.mxu0 %v4002_v0 }
 0x294   :  { %1039 = vmatmul.bf16.gmra.mxu1 %v4002_v0  ;;  %v1708_v13 = vmax.f32 %v1610_v41, 0.0  ;;  %1295 = vmatmul.bf16.gmra.mxu2 %v4002_v0  ;;  %v2177_v0 = vld [vmem:[%s7078_s3 + $0x8d8] sm:$0xff]  ;;  %v2174_v41 = vld [vmem:[%s7078_s3 + $0x8c0] sm:$0xff] }
 0x295   :  { %3008 = vmatpush.msra.mxu3 %v2159_v50  ;;  %v4004_v50 = vld [vmem:[%s7076_s0 + $0x148] sm:$0xff] }
 0x296   :  { %v5403_v22 = vmax.f32 %v1707_v53, %v1708_v13 }
 0x297   :  { %3009 = vmatpush.msra.mxu3 %v2158_v3  ;;  %v1256_v23 = vpop.f32.mrf.mxu2 }
 0x298   :  { %v746_v24 = vpop.f32.mrf.mxu0  ;;  %v1510_v25 = vadd.f32 %v1412_v57, %v1256_v23 }
 0x299   :  { %3010 = vmatpush.msra.mxu3 %v2157_v12  ;;  %v1002_v47 = vpop.f32.mrf.mxu1  ;;  %v2173_v12 = vld [vmem:[%s7078_s3 + $0x8b8] sm:$0xff] }
 0x29a   :  { %v1414_v27 = vadd.f32 %v1002_v47, %v744_v59  ;;  %v1611_v31 = vadd.f32 %v5319_v10, %v1510_v25 }
 0x29b   :  { %3011 = vmatpush.msra.mxu3 %v2156_v19 }
 0x29c   :  { %v1709_v42 = vmax.f32 %v1611_v31, 0.0 }
 0x29d   :  { %3012 = vmatpush.msra.mxu3 %v2155_v37  ;;  %v2171_v37 = vld [vmem:[%s7078_s3 + $0x8a8] sm:$0xff] }
 0x29f   :  { %3013 = vmatpush.msra.mxu3 %v2154_v28  ;;  %v1258_v32 = vpop.f32.mrf.mxu2  ;;  %v2170_v28 = vld [vmem:[%s7078_s3 + $0x8a0] sm:$0xff] }
 0x2a0   :  { %v749_v33 = vpop.f32.mrf.mxu0  ;;  %v1511_v9 = vadd.f32 %v1413_v7, %v1258_v32 }
 0x2a1   :  { %3014 = vmatpush.msra.mxu3 %v2153_v61  ;;  %v1005_v35 = vpop.f32.mrf.mxu1  ;;  %v2169_v61 = vld [vmem:[%s7078_s3 + $0x898] sm:$0xff] }
 0x2a2   :  { %v1415_v39 = vadd.f32 %v1005_v35, %v746_v24  ;;  %v1612_v43 = vadd.f32 %v5319_v10, %v1511_v9 }
 0x2a3   :  { %3015 = vmatpush.msra.mxu3 %v2152_v29  ;;  %788 = vmatmul.bf16.gmra.mxu0 %v4003_v14  ;;  %v2168_v29 = vld [vmem:[%s7078_s3 + $0x890] sm:$0xff] }
 0x2a4   :  { %1044 = vmatmul.bf16.gmra.mxu1 %v4003_v14  ;;  %v1710_v49 = vmax.f32 %v1612_v43, 0.0  ;;  %1300 = vmatmul.bf16.gmra.mxu2 %v4003_v14  ;;  %v4005_v14 = vld [vmem:[%s7076_s0 + $0x150] sm:$0xff] }
 0x2a5   :  { %3016 = vmatpush.msra.mxu3 %v2151_v34  ;;  %v2167_v34 = vld [vmem:[%s7078_s3 + $0x888] sm:$0xff] }
 0x2a6   :  { %v5435_v52 = vmax.f32 %v1709_v42, %v1710_v49 }
 0x2a7   :  { %3017 = vmatpush.msra.mxu3 %v2150_v30  ;;  %v1261_v54 = vpop.f32.mrf.mxu2  ;;  %v2166_v30 = vld [vmem:[%s7078_s3 + $0x880] sm:$0xff] }
 0x2a8   :  { %3018 = vmatmul.f32.vlgmr.msra.gmra.mxu3 %v4920_v48  ;;  %v751_v55 = vpop.f32.mrf.mxu0  ;;  %v1512_v57 = vadd.f32 %v1414_v27, %v1261_v54  ;;  %v2178_v48 = vld [vmem:[%s7078_s3 + $0x8e0] sm:$0xff]  ;;  %v2196_v54 = vld [vmem:[%s7078_s3 + $0x970] sm:$0xff] }
 0x2a9   :  { %3022 = vmatpush.msrb.mxu3 %v2181_v44  ;;  %v1007_v20 = vpop.f32.mrf.mxu1  ;;  %v2197_v44 = vld [vmem:[%s7078_s3 + $0x978] sm:$0xff] }
 0x2aa   :  { %v1416_v60 = vadd.f32 %v1007_v20, %v749_v33  ;;  %v1613_v59 = vadd.f32 %v5319_v10, %v1512_v57  ;;  %v2299_v20 = vld [vmem:[%s7078_s3 + $0xca8] sm:$0xff] }
 0x2ab   :  { %3023 = vmatpush.msrb.mxu3 %v2180_v51  ;;  %v2939_v58 = vpop.f32.mrf.mxu3  ;;  %v2331_v51 = vld [vmem:[%s7078_s3 + $0xda8] sm:$0xff]  ;;  %3192 = vmatpush.msrb.mxu0 %v2299_v20  ;;  %v2212_v20 = vld [vmem:[%s7078_s3 + $0x9f0] sm:$0xff] }
 0x2ac   :  { %v5444_v62 = vadd.f32 %v2939_v58, %v5369_v63  ;;  %v1711_v3 = vmax.f32 %v1613_v59, 0.0  ;;  %3232 = vmatpush.msrb.mxu2 %v2331_v51  ;;  %v2195_v58 = vld [vmem:[%s7078_s3 + $0x968] sm:$0xff]  ;;  %v2194_v59 = vld [vmem:[%s7078_s3 + $0x960] sm:$0xff] }
 0x2ad   :  { %3024 = vmatpush.msrb.mxu3 %v2179_v56 }
 0x2af   :  { %3025 = vmatpush.msrb.mxu3 %v2178_v48  ;;  %v1263_v6 = vpop.f32.mrf.mxu2 }
 0x2b0   :  { %v754_v63 = vpop.f32.mrf.mxu0  ;;  %v1513_v7 = vadd.f32 %v1415_v39, %v1263_v6  ;;  %v2193_v6 = vld [vmem:[%s7078_s3 + $0x958] sm:$0xff] }
 0x2b1   :  { %3026 = vmatpush.msrb.mxu3 %v2177_v0  ;;  %v1010_v26 = vpop.f32.mrf.mxu1 }
 0x2b2   :  { %v1417_v53 = vadd.f32 %v1010_v26, %v751_v55  ;;  %v1614_v11 = vadd.f32 %v5319_v10, %v1513_v7  ;;  %v4006_v7 = vld [vmem:[%s7076_s0 + $0x158] sm:$0xff] }
 0x2b3   :  { %3027 = vmatpush.msrb.mxu3 %v2176_v1  ;;  %793 = vmatmul.bf16.gmra.mxu0 %v4004_v50  ;;  %v2315_v1 = vld [vmem:[%s7078_s3 + $0xd28] sm:$0xff] }
 0x2b4   :  { %1049 = vmatmul.bf16.gmra.mxu1 %v4004_v50  ;;  %v1712_v13 = vmax.f32 %v1614_v11, 0.0  ;;  %1305 = vmatmul.bf16.gmra.mxu2 %v4004_v50 }
 0x2b5   :  { %3028 = vmatpush.msrb.mxu3 %v2175_v5  ;;  %3212 = vmatpush.msrb.mxu1 %v2315_v1 }
 0x2b6   :  { %v5469_v19 = vmax.f32 %v1711_v3, %v1712_v13 }
 0x2b7   :  { %3029 = vmatpush.msrb.mxu3 %v2174_v41  ;;  %v1266_v23 = vpop.f32.mrf.mxu2 }
 0x2b8   :  { %v756_v24 = vpop.f32.mrf.mxu0  ;;  %v1514_v25 = vadd.f32 %v1416_v60, %v1266_v23  ;;  %v2189_v23 = vld [vmem:[%s7078_s3 + $0x938] sm:$0xff] }
 0x2b9   :  { %3030 = vmatpush.msrb.mxu3 %v2173_v12  ;;  %v1012_v47 = vpop.f32.mrf.mxu1  ;;  %v2190_v12 = vld [vmem:[%s7078_s3 + $0x940] sm:$0xff] }
 0x2ba   :  { %v1418_v27 = vadd.f32 %v1012_v47, %v754_v63  ;;  %v1615_v31 = vadd.f32 %v5319_v10, %v1514_v25  ;;  %v2192_v63 = vld [vmem:[%s7078_s3 + $0x950] sm:$0xff] }
 0x2bb   :  { %3031 = vmatpush.msrb.mxu3 %v2172_v15 }
 0x2bc   :  { %v1713_v42 = vmax.f32 %v1615_v31, 0.0 }
 0x2bd   :  { %3032 = vmatpush.msrb.mxu3 %v2171_v37  ;;  %v2188_v37 = vld [vmem:[%s7078_s3 + $0x930] sm:$0xff] }
 0x2bf   :  { %3033 = vmatpush.msrb.mxu3 %v2170_v28  ;;  %v1268_v32 = vpop.f32.mrf.mxu2  ;;  %v2187_v28 = vld [vmem:[%s7078_s3 + $0x928] sm:$0xff] }
 0x2c0   :  { %v759_v33 = vpop.f32.mrf.mxu0  ;;  %v1515_v9 = vadd.f32 %v1417_v53, %v1268_v32  ;;  %v2191_v53 = vld [vmem:[%s7078_s3 + $0x948] sm:$0xff]  ;;  %v2185_v32 = vld [vmem:[%s7078_s3 + $0x918] sm:$0xff] }
 0x2c1   :  { %3034 = vmatpush.msrb.mxu3 %v2169_v61  ;;  %v1015_v35 = vpop.f32.mrf.mxu1 }
 0x2c2   :  { %v1419_v39 = vadd.f32 %v1015_v35, %v756_v24  ;;  %v1616_v43 = vadd.f32 %v5319_v10, %v1515_v9  ;;  %v4007_v9 = vld [vmem:[%s7076_s0 + $0x160] sm:$0xff] }
 0x2c3   :  { %3035 = vmatpush.msrb.mxu3 %v2168_v29  ;;  %798 = vmatmul.bf16.gmra.mxu0 %v4005_v14 }
 0x2c4   :  { %1054 = vmatmul.bf16.gmra.mxu1 %v4005_v14  ;;  %v1714_v49 = vmax.f32 %v1616_v43, 0.0  ;;  %1310 = vmatmul.bf16.gmra.mxu2 %v4005_v14  ;;  %v2186_v14 = vld [vmem:[%s7078_s3 + $0x920] sm:$0xff] }
 0x2c5   :  { %3036 = vmatpush.msrb.mxu3 %v2167_v34 }
 0x2c6   :  { %v5504_v55 = vmax.f32 %v1713_v42, %v1714_v49  ;;  %v2183_v42 = vld [vmem:[%s7078_s3 + $0x908] sm:$0xff]  ;;  %v2182_v49 = vld [vmem:[%s7078_s3 + $0x900] sm:$0xff] }
 0x2c7   :  { %3037 = vmatpush.msrb.mxu3 %v2166_v30  ;;  %v1271_v56 = vpop.f32.mrf.mxu2 }
 0x2c8   :  { %3038 = vmatmul.f32.vlgmr.msrb.gmra.mxu3 %v4955_v4  ;;  %v761_v57 = vpop.f32.mrf.mxu0  ;;  %v1516_v60 = vadd.f32 %v1418_v27, %v1271_v56  ;;  %v2213_v56 = vld [vmem:[%s7078_s3 + $0x9f8] sm:$0xff] }
 0x2c9   :  { %3042 = vmatpush.msra.mxu3 %v2197_v44  ;;  %v1017_v4 = vpop.f32.mrf.mxu1 }
 0x2ca   :  { %v1420_v0 = vadd.f32 %v1017_v4, %v759_v33  ;;  %v1617_v5 = vadd.f32 %v5319_v10, %v1516_v60  ;;  %v2184_v33 = vld [vmem:[%s7078_s3 + $0x910] sm:$0xff] }
 0x2cb   :  { %3043 = vmatpush.msra.mxu3 %v2196_v54  ;;  %v2959_v48 = vpop.f32.mrf.mxu3 }
 0x2cc   :  { %v5519_v50 = vadd.f32 %v2959_v48, %v5444_v62  ;;  %v1715_v13 = vmax.f32 %v1617_v5, 0.0  ;;  %v2211_v48 = vld [vmem:[%s7078_s3 + $0x9e8] sm:$0xff] }
 0x2cd   :  { %3044 = vmatpush.msra.mxu3 %v2195_v58 }
 0x2cf   :  { %3045 = vmatpush.msra.mxu3 %v2194_v59  ;;  %v1273_v62 = vpop.f32.mrf.mxu2 }
 0x2d0   :  { %v764_v26 = vpop.f32.mrf.mxu0  ;;  %v1517_v3 = vadd.f32 %v1419_v39, %v1273_v62 }
 0x2d1   :  { %3046 = vmatpush.msra.mxu3 %v2193_v6  ;;  %v1020_v41 = vpop.f32.mrf.mxu1  ;;  %v2209_v6 = vld [vmem:[%s7078_s3 + $0x9d8] sm:$0xff] }
 0x2d2   :  { %v1421_v11 = vadd.f32 %v1020_v41, %v761_v57  ;;  %v1618_v15 = vadd.f32 %v5319_v10, %v1517_v3 }
 0x2d3   :  { %3047 = vmatpush.msra.mxu3 %v2192_v63  ;;  %803 = vmatmul.bf16.gmra.mxu0 %v4006_v7  ;;  %v2208_v63 = vld [vmem:[%s7078_s3 + $0x9d0] sm:$0xff] }
 0x2d4   :  { %1059 = vmatmul.bf16.gmra.mxu1 %v4006_v7  ;;  %v1716_v24 = vmax.f32 %v1618_v15, 0.0  ;;  %1315 = vmatmul.bf16.gmra.mxu2 %v4006_v7  ;;  %v4008_v7 = vld [vmem:[%s7076_s0 + $0x168] sm:$0xff] }
 0x2d5   :  { %3048 = vmatpush.msra.mxu3 %v2191_v53  ;;  %v2207_v53 = vld [vmem:[%s7078_s3 + $0x9c8] sm:$0xff] }
 0x2d6   :  { %v5544_v25 = vmax.f32 %v1715_v13, %v1716_v24 }
 0x2d7   :  { %3049 = vmatpush.msra.mxu3 %v2190_v12  ;;  %v1276_v47 = vpop.f32.mrf.mxu2  ;;  %v2206_v12 = vld [vmem:[%s7078_s3 + $0x9c0] sm:$0xff] }
 0x2d8   :  { %v766_v27 = vpop.f32.mrf.mxu0  ;;  %v1518_v61 = vadd.f32 %v1420_v0, %v1276_v47 }
 0x2d9   :  { %3050 = vmatpush.msra.mxu3 %v2189_v23  ;;  %v1022_v29 = vpop.f32.mrf.mxu1  ;;  %v2205_v23 = vld [vmem:[%s7078_s3 + $0x9b8] sm:$0xff] }
 0x2da   :  { %v1422_v31 = vadd.f32 %v1022_v29, %v764_v26  ;;  %v1619_v34 = vadd.f32 %v5319_v10, %v1518_v61  ;;  %v2203_v61 = vld [vmem:[%s7078_s3 + $0x9a8] sm:$0xff] }
 0x2db   :  { %3051 = vmatpush.msra.mxu3 %v2188_v37  ;;  %v2204_v37 = vld [vmem:[%s7078_s3 + $0x9b0] sm:$0xff] }
 0x2dc   :  { %v1717_v51 = vmax.f32 %v1619_v34, 0.0  ;;  %v2298_v34 = vld [vmem:[%s7078_s3 + $0xca0] sm:$0xff] }
 0x2dd   :  { %3052 = vmatpush.msra.mxu3 %v2187_v28  ;;  %3193 = vmatpush.msrb.mxu0 %v2298_v34  ;;  %v2294_v34 = vld [vmem:[%s7078_s3 + $0xc80] sm:$0xff] }
 0x2df   :  { %3053 = vmatpush.msra.mxu3 %v2186_v14  ;;  %v1278_v35 = vpop.f32.mrf.mxu2 }
 0x2e0   :  { %v769_v39 = vpop.f32.mrf.mxu0  ;;  %v1519_v30 = vadd.f32 %v1421_v11, %v1278_v35  ;;  %v2314_v35 = vld [vmem:[%s7078_s3 + $0xd20] sm:$0xff] }
 0x2e1   :  { %3054 = vmatpush.msra.mxu3 %v2185_v32  ;;  %v1025_v43 = vpop.f32.mrf.mxu1  ;;  %v2330_v32 = vld [vmem:[%s7078_s3 + $0xda0] sm:$0xff]  ;;  %3213 = vmatpush.msrb.mxu1 %v2314_v35  ;;  %v2328_v35 = vld [vmem:[%s7078_s3 + $0xd90] sm:$0xff] }
 0x2e2   :  { %v1423_v44 = vadd.f32 %v1025_v43, %v766_v27  ;;  %v1620_v54 = vadd.f32 %v5319_v10, %v1519_v30  ;;  %3233 = vmatpush.msrb.mxu2 %v2330_v32  ;;  %v4009_v30 = vld [vmem:[%s7076_s0 + $0x170] sm:$0xff]  ;;  %v2221_v32 = vld [vmem:[%s7078_s3 + $0xa38] sm:$0xff] }
 0x2e3   :  { %3055 = vmatpush.msra.mxu3 %v2184_v33  ;;  %808 = vmatmul.bf16.gmra.mxu0 %v4007_v9  ;;  %v2202_v33 = vld [vmem:[%s7078_s3 + $0x9a0] sm:$0xff] }
 0x2e4   :  { %1064 = vmatmul.bf16.gmra.mxu1 %v4007_v9  ;;  %v1718_v57 = vmax.f32 %v1620_v54, 0.0  ;;  %1320 = vmatmul.bf16.gmra.mxu2 %v4007_v9  ;;  %v2201_v9 = vld [vmem:[%s7078_s3 + $0x998] sm:$0xff] }
 0x2e5   :  { %3056 = vmatpush.msra.mxu3 %v2183_v42 }
 0x2e6   :  { %v5576_v58 = vmax.f32 %v1717_v51, %v1718_v57 }
 0x2e7   :  { %3057 = vmatpush.msra.mxu3 %v2182_v49  ;;  %v1281_v60 = vpop.f32.mrf.mxu2  ;;  %v2199_v49 = vld [vmem:[%s7078_s3 + $0x988] sm:$0xff] }
 0x2e8   :  { %3058 = vmatmul.f32.vlgmr.msra.gmra.mxu3 %v4986_v38  ;;  %v771_v4 = vpop.f32.mrf.mxu0  ;;  %v1520_v0 = vadd.f32 %v1422_v31, %v1281_v60  ;;  %v2210_v38 = vld [vmem:[%s7078_s3 + $0x9e0] sm:$0xff]  ;;  %v2229_v60 = vld [vmem:[%s7078_s3 + $0xa78] sm:$0xff] }
 0x2e9   :  { %3062 = vmatpush.msrb.mxu3 %v2213_v56  ;;  %v1027_v1 = vpop.f32.mrf.mxu1  ;;  %v2198_v56 = vld [vmem:[%s7078_s3 + $0x980] sm:$0xff] }
 0x2ea   :  { %v1424_v59 = vadd.f32 %v1027_v1, %v769_v39  ;;  %v1621_v5 = vadd.f32 %v5319_v10, %v1520_v0  ;;  %v2200_v39 = vld [vmem:[%s7078_s3 + $0x990] sm:$0xff] }
 0x2eb   :  { %3063 = vmatpush.msrb.mxu3 %v2212_v20 }
 0x2ec   :  { %v1719_v13 = vmax.f32 %v1621_v5, 0.0  ;;  %v2225_v5 = vld [vmem:[%s7078_s3 + $0xa58] sm:$0xff] }
 0x2ed   :  { %3064 = vmatpush.msrb.mxu3 %v2211_v48  ;;  %v2228_v48 = vld [vmem:[%s7078_s3 + $0xa70] sm:$0xff] }
 0x2ef   :  { %3065 = vmatpush.msrb.mxu3 %v2210_v38  ;;  %v1283_v62 = vpop.f32.mrf.mxu2  ;;  %v2227_v38 = vld [vmem:[%s7078_s3 + $0xa68] sm:$0xff] }
 0x2f0   :  { %v774_v26 = vpop.f32.mrf.mxu0  ;;  %v1521_v3 = vadd.f32 %v1423_v44, %v1283_v62  ;;  %v2224_v62 = vld [vmem:[%s7078_s3 + $0xa50] sm:$0xff] }
 0x2f1   :  { %3066 = vmatpush.msrb.mxu3 %v2209_v6  ;;  %v1030_v41 = vpop.f32.mrf.mxu1 }
 0x2f2   :  { %v1425_v11 = vadd.f32 %v1030_v41, %v771_v4  ;;  %v1622_v15 = vadd.f32 %v5319_v10, %v1521_v3 }
 0x2f3   :  { %3067 = vmatpush.msrb.mxu3 %v2208_v63  ;;  %813 = vmatmul.bf16.gmra.mxu0 %v4008_v7 }
 0x2f4   :  { %1069 = vmatmul.bf16.gmra.mxu1 %v4008_v7  ;;  %v1720_v24 = vmax.f32 %v1622_v15, 0.0  ;;  %1325 = vmatmul.bf16.gmra.mxu2 %v4008_v7 }
 0x2f5   :  { %3068 = vmatpush.msrb.mxu3 %v2207_v53  ;;  %v4010_v53 = vld [vmem:[%s7076_s0 + $0x178] sm:$0xff] }
 0x2f6   :  { %v5607_v47 = vmax.f32 %v1719_v13, %v1720_v24  ;;  %v2223_v13 = vld [vmem:[%s7078_s3 + $0xa48] sm:$0xff]  ;;  %v2296_v24 = vld [vmem:[%s7078_s3 + $0xc90] sm:$0xff] }
 0x2f7   :  { %3069 = vmatpush.msrb.mxu3 %v2206_v12  ;;  %v1286_v27 = vpop.f32.mrf.mxu2  ;;  %v2313_v12 = vld [vmem:[%s7078_s3 + $0xd18] sm:$0xff] }
 0x2f8   :  { %v776_v28 = vpop.f32.mrf.mxu0  ;;  %v1522_v29 = vadd.f32 %v1424_v59, %v1286_v27  ;;  %3214 = vmatpush.msrb.mxu1 %v2313_v12  ;;  %v2222_v27 = vld [vmem:[%s7078_s3 + $0xa40] sm:$0xff] }
 0x2f9   :  { %3070 = vmatpush.msrb.mxu3 %v2205_v23  ;;  %v1032_v31 = vpop.f32.mrf.mxu1 }
 0x2fa   :  { %v1426_v14 = vadd.f32 %v1032_v31, %v774_v26  ;;  %v1623_v42 = vadd.f32 %v5319_v10, %v1522_v29  ;;  %v2295_v29 = vld [vmem:[%s7078_s3 + $0xc88] sm:$0xff] }
 0x2fb   :  { %3071 = vmatpush.msrb.mxu3 %v2204_v37  ;;  %v2312_v37 = vld [vmem:[%s7078_s3 + $0xd10] sm:$0xff]  ;;  %v2311_v31 = vld [vmem:[%s7078_s3 + $0xd08] sm:$0xff] }
 0x2fc   :  { %v1721_v57 = vmax.f32 %v1623_v42, 0.0  ;;  %3215 = vmatpush.msrb.mxu1 %v2312_v37 }
 0x2fd   :  { %3072 = vmatpush.msrb.mxu3 %v2203_v61 }
 0x2fe   :  { %3216 = vmatpush.msrb.mxu1 %v2311_v31  ;;  %v2403_v31 = vld [vmem:[%s7078_s3 + $0xfe8] sm:$0xff] }
 0x2ff   :  { %3073 = vmatpush.msrb.mxu3 %v2202_v33  ;;  %v1288_v43 = vpop.f32.mrf.mxu2 }
 0x300   :  { %v5634_v44 = vpop.f32.mrf.mxu0  ;;  %v1523_v51 = vadd.f32 %v1425_v11, %v1288_v43  ;;  %v2297_v11 = vld [vmem:[%s7078_s3 + $0xc98] sm:$0xff] }
 0x301   :  { %3074 = vmatpush.msrb.mxu3 %v2201_v9  ;;  %v1035_v54 = vpop.f32.mrf.mxu1  ;;  %3194 = vmatpush.msrb.mxu0 %v2297_v11  ;;  %v2310_v9 = vld [vmem:[%s7078_s3 + $0xd00] sm:$0xff]  ;;  %v2373_v43 = vld [vmem:[%s7078_s3 + $0xef8] sm:$0xff] }
 0x302   :  { %v1624_v20 = vadd.f32 %v5319_v10, %v1523_v51  ;;  %v1427_v7 = vadd.f32 %v1035_v54, %v776_v28  ;;  %3217 = vmatpush.msrb.mxu1 %v2310_v9  ;;  %v2389_v54 = vld [vmem:[%s7078_s3 + $0xf78] sm:$0xff]  ;;  %v2383_v9 = vld [vmem:[%s7078_s3 + $0xf48] sm:$0xff] }
 0x303   :  { %3075 = vmatpush.msrb.mxu3 %v2200_v39  ;;  %818 = vmatmul.bf16.gmra.mxu0 %v4009_v30  ;;  %v2220_v39 = vld [vmem:[%s7078_s3 + $0xa30] sm:$0xff]  ;;  %v2369_v11 = vld [vmem:[%s7078_s3 + $0xed8] sm:$0xff] }
 0x304   :  { %1074 = vmatmul.bf16.gmra.mxu1 %v4009_v30  ;;  %v1722_v4 = vmax.f32 %v1624_v20, 0.0  ;;  %1330 = vmatmul.bf16.gmra.mxu2 %v4009_v30  ;;  %v2372_v20 = vld [vmem:[%s7078_s3 + $0xef0] sm:$0xff] }
 0x305   :  { %3076 = vmatpush.msrb.mxu3 %v2199_v49  ;;  %3195 = vmatpush.msrb.mxu0 %v2296_v24 }
 0x306   :  { %v5650_v0 = vmax.f32 %v1721_v57, %v1722_v4  ;;  %v2326_v4 = vld [vmem:[%s7078_s3 + $0xd80] sm:$0xff]  ;;  %3282 = vmatpush.msra.mxu1 %v2389_v54 }
 0x307   :  { %3077 = vmatpush.msrb.mxu3 %v2198_v56  ;;  %v1291_v1 = vpop.f32.mrf.mxu2  ;;  %3196 = vmatpush.msrb.mxu0 %v2295_v29  ;;  %v2219_v56 = vld [vmem:[%s7078_s3 + $0xa28] sm:$0xff]  ;;  %v2382_v54 = vld [vmem:[%s7078_s3 + $0xf40] sm:$0xff] }
 0x308   :  { %3078 = vmatmul.f32.vlgmr.msrb.gmra.mxu3 %v5022_v8  ;;  %v5652_v59 = vpop.f32.mrf.mxu0  ;;  %v2226_v8 = vld [vmem:[%s7078_s3 + $0xa60] sm:$0xff]  ;;  %v1524_v63 = vadd.f32 %v1426_v14, %v1291_v1  ;;  %v2329_v14 = vld [vmem:[%s7078_s3 + $0xd98] sm:$0xff] }
 0x309   :  { %3082 = vmatpush.msra.mxu3 %v2229_v60  ;;  %v1037_v6 = vpop.f32.mrf.mxu1  ;;  %3234 = vmatpush.msrb.mxu2 %v2329_v14  ;;  %v2388_v60 = vld [vmem:[%s7078_s3 + $0xf70] sm:$0xff] }
 0x30a   :  { %v1625_v26 = vadd.f32 %v5319_v10, %v1524_v63  ;;  %v1428_v42 = vadd.f32 %v1037_v6, %v5634_v44  ;;  %v2327_v44 = vld [vmem:[%s7078_s3 + $0xd88] sm:$0xff]  ;;  %3197 = vmatpush.msrb.mxu0 %v2294_v34  ;;  %v2217_v63 = vld [vmem:[%s7078_s3 + $0xa18] sm:$0xff]  ;;  %3283 = vmatpush.msra.mxu1 %v2388_v60  ;;  %v2384_v14 = vld [vmem:[%s7078_s3 + $0xf50] sm:$0xff] }
 0x30b   :  { %3083 = vmatpush.msra.mxu3 %v2228_v48  ;;  %3235 = vmatpush.msrb.mxu2 %v2328_v35  ;;  %v2218_v48 = vld [vmem:[%s7078_s3 + $0xa20] sm:$0xff]  ;;  %v2387_v6 = vld [vmem:[%s7078_s3 + $0xf68] sm:$0xff]  ;;  %v2244_v35 = vld [vmem:[%s7078_s3 + $0xaf0] sm:$0xff] }
 0x30c   :  { %v1723_v28 = vmax.f32 %v1625_v26, 0.0  ;;  %3262 = vmatpush.msra.mxu0 %v2373_v43  ;;  %v2404_v26 = vld [vmem:[%s7078_s3 + $0xff0] sm:$0xff]  ;;  %3284 = vmatpush.msra.mxu1 %v2387_v6  ;;  %v2367_v34 = vld [vmem:[%s7078_s3 + $0xec8] sm:$0xff]  ;;  %v2365_v60 = vld [vmem:[%s7078_s3 + $0xeb8] sm:$0xff] }
 0x30d   :  { %3084 = vmatpush.msra.mxu3 %v2227_v38  ;;  %3236 = vmatpush.msrb.mxu2 %v2327_v44  ;;  %v2371_v38 = vld [vmem:[%s7078_s3 + $0xee8] sm:$0xff]  ;;  %v2380_v6 = vld [vmem:[%s7078_s3 + $0xf30] sm:$0xff] }
 0x30e   :  { %3263 = vmatpush.msra.mxu0 %v2372_v20  ;;  %v2243_v44 = vld [vmem:[%s7078_s3 + $0xae8] sm:$0xff]  ;;  %v2400_v20 = vld [vmem:[%s7078_s3 + $0xfd0] sm:$0xff] }
 0x30f   :  { %3085 = vmatpush.msra.mxu3 %v2226_v8  ;;  %v1293_v3 = vpop.f32.mrf.mxu2  ;;  %v2405_v8 = vld [vmem:[%s7078_s3 + $0xff8] sm:$0xff]  ;;  %3237 = vmatpush.msrb.mxu2 %v2326_v4 }
 0x310   :  { %v5670_v41 = vpop.f32.mrf.mxu0  ;;  %v1525_v15 = vadd.f32 %v1427_v7, %v1293_v3  ;;  %v2370_v7 = vld [vmem:[%s7078_s3 + $0xee0] sm:$0xff]  ;;  %3264 = vmatpush.msra.mxu0 %v2371_v38  ;;  %v2381_v4 = vld [vmem:[%s7078_s3 + $0xf38] sm:$0xff]  ;;  %v2364_v38 = vld [vmem:[%s7078_s3 + $0xeb0] sm:$0xff] }
 0x311   :  { %3086 = vmatpush.msra.mxu3 %v2225_v5  ;;  %v1040_v23 = vpop.f32.mrf.mxu1  ;;  %v4011_v3 = vld [vmem:[%s7076_s0 + $0x180] sm:$0xff]  ;;  %3302 = vmatpush.msra.mxu2 %v2405_v8  ;;  %v2241_v8 = vld [vmem:[%s7078_s3 + $0xad8] sm:$0xff] }
 0x312   :  { %v1626_v61 = vadd.f32 %v5319_v10, %v1525_v15  ;;  %v1429_v5 = vadd.f32 %v1040_v23, %v5652_v59  ;;  %v2216_v59 = vld [vmem:[%s7078_s3 + $0xa10] sm:$0xff]  ;;  %3265 = vmatpush.msra.mxu0 %v2370_v7  ;;  %v2385_v15 = vld [vmem:[%s7078_s3 + $0xf58] sm:$0xff]  ;;  %v2215_v23 = vld [vmem:[%s7078_s3 + $0xa08] sm:$0xff] }
 0x313   :  { %3087 = vmatpush.msra.mxu3 %v2224_v62  ;;  %823 = vmatmul.bf16.gmra.mxu0 %v4010_v53  ;;  %v2386_v62 = vld [vmem:[%s7078_s3 + $0xf60] sm:$0xff]  ;;  %v2379_v7 = vld [vmem:[%s7078_s3 + $0xf28] sm:$0xff] }
 0x314   :  { %1079 = vmatmul.bf16.gmra.mxu1 %v4010_v53  ;;  %v1724_v33 = vmax.f32 %v1626_v61, 0.0  ;;  %1335 = vmatmul.bf16.gmra.mxu2 %v4010_v53 }
 0x315   :  { %3088 = vmatpush.msra.mxu3 %v2223_v13  ;;  %3285 = vmatpush.msra.mxu1 %v2386_v62  ;;  %v2240_v62 = vld [vmem:[%s7078_s3 + $0xad0] sm:$0xff] }
 0x316   :  { %v5716_v30 = vmax.f32 %v1723_v28, %v1724_v33  ;;  %3303 = vmatpush.msra.mxu2 %v2404_v26  ;;  %3266 = vmatpush.msra.mxu0 %v2369_v11  ;;  %v2214_v28 = vld [vmem:[%s7078_s3 + $0xa00] sm:$0xff]  ;;  %v4012_v26 = vld [vmem:[%s7076_s0 + $0x188] sm:$0xff] }
 0x317   :  { %3089 = vmatpush.msra.mxu3 %v2222_v27  ;;  %v1296_v49 = vpop.f32.mrf.mxu2  ;;  %v2368_v27 = vld [vmem:[%s7078_s3 + $0xed0] sm:$0xff]  ;;  %3286 = vmatpush.msra.mxu1 %v2385_v15  ;;  %v2378_v11 = vld [vmem:[%s7078_s3 + $0xf20] sm:$0xff] }
 0x318   :  { %v5721_v51 = vpop.f32.mrf.mxu0  ;;  %v1526_v1 = vadd.f32 %v1428_v42, %v1296_v49  ;;  %3267 = vmatpush.msra.mxu0 %v2368_v27  ;;  %3304 = vmatpush.msra.mxu2 %v2403_v31  ;;  %v2401_v42 = vld [vmem:[%s7078_s3 + $0xfd8] sm:$0xff]  ;;  %v2396_v27 = vld [vmem:[%s7078_s3 + $0xfb0] sm:$0xff]  ;;  %v2395_v31 = vld [vmem:[%s7078_s3 + $0xfa8] sm:$0xff] }
 0x319   :  { %3090 = vmatpush.msra.mxu3 %v2221_v32  ;;  %v5732_v57 = vpop.f32.mrf.mxu1  ;;  %v2245_v32 = vld [vmem:[%s7078_s3 + $0xaf8] sm:$0xff]  ;;  %3287 = vmatpush.msra.mxu1 %v2384_v14  ;;  %v2360_v14 = vld [vmem:[%s7078_s3 + $0xe90] sm:$0xff] }
 0x31a   :  { %v1627_v53 = vadd.f32 %v5319_v10, %v1526_v1  ;;  %3268 = vmatpush.msra.mxu0 %v2367_v34  ;;  %v2399_v1 = vld [vmem:[%s7078_s3 + $0xfc8] sm:$0xff]  ;;  %v2394_v34 = vld [vmem:[%s7078_s3 + $0xfa0] sm:$0xff] }
 0x31b   :  { %3091 = vmatpush.msra.mxu3 %v2220_v39  ;;  %3288 = vmatpush.msra.mxu1 %v2383_v9 }
 0x31c   :  { %v1725_v61 = vmax.f32 %v1627_v53, 0.0 }
 0x31d   :  { %3092 = vmatpush.msra.mxu3 %v2219_v56  ;;  %3289 = vmatpush.msra.mxu1 %v2382_v54 }
 0x31f   :  { %3093 = vmatpush.msra.mxu3 %v2218_v48  ;;  %v1298_v12 = vpop.f32.mrf.mxu2  ;;  %v2242_v48 = vld [vmem:[%s7078_s3 + $0xae0] sm:$0xff]  ;;  %3290 = vmatpush.msra.mxu1 %v2381_v4 }
 0x320   :  { %v5778_v13 = vpop.f32.mrf.mxu0  ;;  %v1527_v24 = vadd.f32 %v1429_v5, %v1298_v12  ;;  %v2363_v5 = vld [vmem:[%s7078_s3 + $0xea8] sm:$0xff]  ;;  %v2234_v4 = vld [vmem:[%s7078_s3 + $0xaa0] sm:$0xff] }
 0x321   :  { %3094 = vmatpush.msra.mxu3 %v2217_v63  ;;  %v5786_v37 = vpop.f32.mrf.mxu1  ;;  %v2398_v63 = vld [vmem:[%s7078_s3 + $0xfc0] sm:$0xff]  ;;  %3291 = vmatpush.msra.mxu1 %v2380_v6  ;;  %v2239_v12 = vld [vmem:[%s7078_s3 + $0xac8] sm:$0xff] }
 0x322   :  { %v1628_v29 = vadd.f32 %v5319_v10, %v1527_v24  ;;  %v2402_v10 = vld [vmem:[%s7078_s3 + $0xfe0] sm:$0xff] }
 0x323   :  { %3095 = vmatpush.msra.mxu3 %v2216_v59  ;;  %828 = vmatmul.bf16.gmra.mxu0 %v4011_v3  ;;  %v2397_v59 = vld [vmem:[%s7078_s3 + $0xfb8] sm:$0xff]  ;;  %v2238_v24 = vld [vmem:[%s7078_s3 + $0xac0] sm:$0xff] }
 0x324   :  { %1084 = vmatmul.bf16.gmra.mxu1 %v4011_v3  ;;  %v1726_v33 = vmax.f32 %v1628_v29, 0.0  ;;  %1340 = vmatmul.bf16.gmra.mxu2 %v4011_v3  ;;  %v2237_v29 = vld [vmem:[%s7078_s3 + $0xab8] sm:$0xff] }
 0x325   :  { %3096 = vmatpush.msra.mxu3 %v2215_v23  ;;  %3305 = vmatpush.msra.mxu2 %v2402_v10  ;;  %v2362_v23 = vld [vmem:[%s7078_s3 + $0xea0] sm:$0xff] }
 0x326   :  { %v5817_v39 = vmax.f32 %v1725_v61, %v1726_v33  ;;  %3292 = vmatpush.msra.mxu1 %v2379_v7  ;;  %v2377_v61 = vld [vmem:[%s7078_s3 + $0xf18] sm:$0xff]  ;;  %v2236_v33 = vld [vmem:[%s7078_s3 + $0xab0] sm:$0xff] }
 0x327   :  { %3097 = vmatpush.msra.mxu3 %v2214_v28  ;;  %v5822_v43 = vpop.f32.mrf.mxu2  ;;  %3306 = vmatpush.msra.mxu2 %v2401_v42  ;;  %v2361_v28 = vld [vmem:[%s7078_s3 + $0xe98] sm:$0xff]  ;;  %v2359_v42 = vld [vmem:[%s7078_s3 + $0xe88] sm:$0xff] }
 0x328   :  { %3098 = vmatmul.f32.vlgmr.msra.gmra.mxu3 %v5067_v36  ;;  %v5824_v49 = vpop.f32.mrf.mxu0  ;;  %v2366_v36 = vld [vmem:[%s7078_s3 + $0xec0] sm:$0xff]  ;;  %3293 = vmatpush.msra.mxu1 %v2378_v11 }
 0x329   :  { %3102 = vmatpush.msrb.mxu3 %v2245_v32  ;;  %v1047_v56 = vpop.f32.mrf.mxu1  ;;  %3269 = vmatpush.msra.mxu0 %v2366_v36  ;;  %v2376_v32 = vld [vmem:[%s7078_s3 + $0xf10] sm:$0xff]  ;;  %v2375_v36 = vld [vmem:[%s7078_s3 + $0xf08] sm:$0xff] }
 0x32a   :  { %3307 = vmatpush.msra.mxu2 %v2400_v20  ;;  %v1432_v10 = vadd.f32 %v1047_v56, %v5778_v13  ;;  %3294 = vmatpush.msra.mxu1 %v2377_v61  ;;  %v2235_v13 = vld [vmem:[%s7078_s3 + $0xaa8] sm:$0xff]  ;;  %v2358_v20 = vld [vmem:[%s7078_s3 + $0xe80] sm:$0xff]  ;;  %v2436_v61 = vld [vmem:[%s7078_s3 + $0x10f0] sm:$0xff] }
 0x32b   :  { %3103 = vmatpush.msrb.mxu3 %v2244_v35  ;;  %3270 = vmatpush.msra.mxu0 %v2365_v60  ;;  %v2374_v60 = vld [vmem:[%s7078_s3 + $0xf00] sm:$0xff] }
 0x32c   :  { %3308 = vmatpush.msra.mxu2 %v2399_v1  ;;  %3295 = vmatpush.msra.mxu1 %v2376_v32  ;;  %v2392_v1 = vld [vmem:[%s7078_s3 + $0xf90] sm:$0xff] }
 0x32d   :  { %3104 = vmatpush.msrb.mxu3 %v2243_v44  ;;  %3271 = vmatpush.msra.mxu0 %v2364_v38  ;;  %v2393_v44 = vld [vmem:[%s7078_s3 + $0xf98] sm:$0xff] }
 0x32e   :  { %3309 = vmatpush.msra.mxu2 %v2398_v63  ;;  %3296 = vmatpush.msra.mxu1 %v2375_v36  ;;  %v2233_v38 = vld [vmem:[%s7078_s3 + $0xa98] sm:$0xff]  ;;  %v2232_v63 = vld [vmem:[%s7078_s3 + $0xa90] sm:$0xff]  ;;  %v2450_v36 = vld [vmem:[%s7078_s3 + $0x1160] sm:$0xff] }
 0x32f   :  { %3105 = vmatpush.msrb.mxu3 %v2242_v48  ;;  %v5877_v53 = vpop.f32.mrf.mxu2  ;;  %3272 = vmatpush.msra.mxu0 %v2363_v5  ;;  %v5958_v5 = vld [vmem:[%s7077_s2] ss:$0 sm:$0xff] }
 0x330   :  { %v794_v3 = vpop.f32.mrf.mxu0  ;;  %3310 = vmatpush.msra.mxu2 %v2397_v59  ;;  %3297 = vmatpush.msra.mxu1 %v2374_v60  ;;  %v2231_v59 = vld [vmem:[%s7078_s3 + $0xa88] sm:$0xff]  ;;  %v2449_v60 = vld [vmem:[%s7078_s3 + $0x1158] sm:$0xff] }
 0x331   :  { %3106 = vmatpush.msrb.mxu3 %v2241_v8  ;;  %v1050_v15 = vpop.f32.mrf.mxu1  ;;  %3273 = vmatpush.msra.mxu0 %v2362_v23  ;;  %v2391_v8 = vld [vmem:[%s7078_s3 + $0xf88] sm:$0xff]  ;;  %v2230_v23 = vld [vmem:[%s7078_s3 + $0xa80] sm:$0xff] }
 0x332   :  { %3311 = vmatpush.msra.mxu2 %v2396_v27  ;;  %v1433_v6 = vadd.f32 %v1050_v15, %v5824_v49  ;;  %v2390_v49 = vld [vmem:[%s7078_s3 + $0xf80] sm:$0xff]  ;;  %v2437_v15 = vld [vmem:[%s7078_s3 + $0x10f8] sm:$0xff] }
 0x333   :  { %3107 = vmatpush.msrb.mxu3 %v2240_v62  ;;  %833 = vmatmul.bf16.gmra.mxu0 %v4012_v26 }
 0x334   :  { %1089 = vmatmul.bf16.gmra.mxu1 %v4012_v26  ;;  %1345 = vmatmul.bf16.gmra.mxu2 %v4012_v26 }
 0x335   :  { %3108 = vmatpush.msrb.mxu3 %v2239_v12  ;;  %3274 = vmatpush.msra.mxu0 %v2361_v28  ;;  %v2453_v28 = vld [vmem:[%s7078_s3 + $0x1178] sm:$0xff] }
 0x336   :  { %3312 = vmatpush.msra.mxu2 %v2395_v31 }
 0x337   :  { %3109 = vmatpush.msrb.mxu3 %v2238_v24  ;;  %v1306_v9 = vpop.f32.mrf.mxu2  ;;  %3275 = vmatpush.msra.mxu0 %v2360_v14  ;;  %v2469_v14 = vld [vmem:[%s7078_s3 + $0x11f8] sm:$0xff] }
 0x338   :  { %v796_v35 = vpop.f32.mrf.mxu0  ;;  %3313 = vmatpush.msra.mxu2 %v2394_v34  ;;  %v1530_v48 = vadd.f32 %v1432_v10, %v1306_v9  ;;  %v2434_v9 = vld [vmem:[%s7078_s3 + $0x10e0] sm:$0xff] }
 0x339   :  { %3110 = vmatpush.msrb.mxu3 %v2237_v29  ;;  %v1052_v54 = vpop.f32.mrf.mxu1  ;;  %3276 = vmatpush.msra.mxu0 %v2359_v42  ;;  %v2261_v29 = vld [vmem:[%s7078_s3 + $0xb78] sm:$0xff] }
 0x33a   :  { %v5931_v56 = vadd.f32 %v1052_v54, %v794_v3  ;;  %3314 = vmatpush.msra.mxu2 %v2393_v44  ;;  %v1631_v7 = vadd.f32 %v5958_v5, %v1530_v48  ;;  %v2258_v54 = vld [vmem:[%s7078_s3 + $0xb60] sm:$0xff]  ;;  %v2432_v48 = vld [vmem:[%s7078_s3 + $0x10d0] sm:$0xff] }
 0x33b   :  { %3111 = vmatpush.msrb.mxu3 %v2236_v33  ;;  %3277 = vmatpush.msra.mxu0 %v2358_v20  ;;  %v2451_v33 = vld [vmem:[%s7078_s3 + $0x1168] sm:$0xff]  ;;  %v2433_v20 = vld [vmem:[%s7078_s3 + $0x10d8] sm:$0xff] }
 0x33c   :  { %3315 = vmatpush.msra.mxu2 %v2392_v1  ;;  %v1729_v24 = vmax.f32 %v1631_v7, 0.0  ;;  %v2448_v1 = vld [vmem:[%s7078_s3 + $0x1150] sm:$0xff]  ;;  %v2255_v7 = vld [vmem:[%s7078_s3 + $0xb48] sm:$0xff] }
 0x33d   :  { %3112 = vmatpush.msrb.mxu3 %v2235_v13 }
 0x33e   :  { %3316 = vmatpush.msra.mxu2 %v2391_v8  ;;  %v2447_v8 = vld [vmem:[%s7078_s3 + $0x1148] sm:$0xff] }
 0x33f   :  { %3113 = vmatpush.msrb.mxu3 %v2234_v4  ;;  %v1308_v62 = vpop.f32.mrf.mxu2  ;;  %v2257_v4 = vld [vmem:[%s7078_s3 + $0xb58] sm:$0xff] }
 0x340   :  { %v799_v26 = vpop.f32.mrf.mxu0  ;;  %v1531_v3 = vadd.f32 %v1433_v6, %v1308_v62  ;;  %3317 = vmatpush.msra.mxu2 %v2390_v49  ;;  %v2431_v6 = vld [vmem:[%s7078_s3 + $0x10c8] sm:$0xff]  ;;  %v2465_v62 = vld [vmem:[%s7078_s3 + $0x11d8] sm:$0xff] }
 0x341   :  { %3114 = vmatpush.msrb.mxu3 %v2233_v38  ;;  %v1055_v11 = vpop.f32.mrf.mxu1 }
 0x342   :  { %v5967_v12 = vadd.f32 %v1055_v11, %v796_v35  ;;  %v1632_v27 = vadd.f32 %v5958_v5, %v1531_v3  ;;  %v2259_v35 = vld [vmem:[%s7078_s3 + $0xb68] sm:$0xff]  ;;  %v2430_v3 = vld [vmem:[%s7078_s3 + $0x10c0] sm:$0xff] }
 0x343   :  { %3115 = vmatpush.msrb.mxu3 %v2232_v63  ;;  %3198 = vmatmul.f32.vlgmr.msrb.gmra.mxu0 %v5248_v17  ;;  %v2452_v17 = vld [vmem:[%s7078_s3 + $0x1170] sm:$0xff]  ;;  %v2446_v11 = vld [vmem:[%s7078_s3 + $0x1140] sm:$0xff] }
 0x344   :  { %3218 = vmatmul.f32.vlgmr.msrb.gmra.mxu1 %v5289_v40  ;;  %v1730_v31 = vmax.f32 %v1632_v27, 0.0  ;;  %3238 = vmatmul.f32.vlgmr.msrb.gmra.mxu2 %v5328_v18  ;;  %v2435_v40 = vld [vmem:[%s7078_s3 + $0x10e8] sm:$0xff]  ;;  %v2260_v18 = vld [vmem:[%s7078_s3 + $0xb70] sm:$0xff]  ;;  %v2429_v27 = vld [vmem:[%s7078_s3 + $0x10b8] sm:$0xff] }
 0x345   :  { %3116 = vmatpush.msrb.mxu3 %v2231_v59  ;;  %3342 = vmatpush.msrb.mxu0 %v2437_v15 }
 0x346   :  { %3362 = vmatpush.msrb.mxu1 %v2453_v28  ;;  %v6001_v32 = vmax.f32 %v1729_v24, %v1730_v31  ;;  %3382 = vmatpush.msrb.mxu2 %v2469_v14  ;;  %v2464_v24 = vld [vmem:[%s7078_s3 + $0x11d0] sm:$0xff]  ;;  %v2445_v28 = vld [vmem:[%s7078_s3 + $0x1138] sm:$0xff]  ;;  %v2463_v31 = vld [vmem:[%s7078_s3 + $0x11c8] sm:$0xff] }
 0x347   :  { %3117 = vmatpush.msrb.mxu3 %v2230_v23  ;;  %3343 = vmatpush.msrb.mxu0 %v2436_v61  ;;  %v1311_v10 = vpop.f32.mrf.mxu2  ;;  %v2253_v61 = vld [vmem:[%s7078_s3 + $0xb38] sm:$0xff]  ;;  %v2252_v14 = vld [vmem:[%s7078_s3 + $0xb30] sm:$0xff] }
 0x348   :  { %3118 = vmatmul.f32.vlgmr.msrb.gmra.mxu3 %v5101_v2  ;;  %3363 = vmatpush.msrb.mxu1 %v2452_v17  ;;  %v801_v34 = vpop.f32.mrf.mxu0  ;;  %v2468_v2 = vld [vmem:[%s7078_s3 + $0x11f0] sm:$0xff]  ;;  %v1532_v44 = vadd.f32 %v5931_v56, %v1311_v10  ;;  %v2467_v56 = vld [vmem:[%s7078_s3 + $0x11e8] sm:$0xff] }
 0x349   :  { %3122 = vmatpush.msra.mxu3 %v2261_v29  ;;  %3344 = vmatpush.msrb.mxu0 %v2435_v40  ;;  %v1057_v42 = vpop.f32.mrf.mxu1  ;;  %v2428_v17 = vld [vmem:[%s7078_s3 + $0x10b0] sm:$0xff] }
 0x34a   :  { %3364 = vmatpush.msrb.mxu1 %v2451_v33  ;;  %v6018_v13 = vadd.f32 %v1057_v42, %v799_v26  ;;  %3383 = vmatpush.msrb.mxu2 %v2468_v2  ;;  %v2444_v40 = vld [vmem:[%s7078_s3 + $0x1130] sm:$0xff]  ;;  %v2462_v33 = vld [vmem:[%s7078_s3 + $0x11c0] sm:$0xff]  ;;  %v2461_v42 = vld [vmem:[%s7078_s3 + $0x11b8] sm:$0xff] }
 0x34b   :  { %3123 = vmatpush.msra.mxu3 %v2260_v18  ;;  %3345 = vmatpush.msrb.mxu0 %v2434_v9  ;;  %v2443_v9 = vld [vmem:[%s7078_s3 + $0x1128] sm:$0xff] }
 0x34c   :  { %3365 = vmatpush.msrb.mxu1 %v2450_v36  ;;  %3278 = vmatmul.f32.vlgmr.msra.gmra.mxu0 %v5403_v22  ;;  %v2256_v22 = vld [vmem:[%s7078_s3 + $0xb50] sm:$0xff] }
 0x34d   :  { %3124 = vmatpush.msra.mxu3 %v2259_v35  ;;  %3298 = vmatmul.f32.vlgmr.msra.gmra.mxu1 %v5435_v52  ;;  %v1633_v52 = vadd.f32 %v5958_v5, %v1532_v44  ;;  %v2251_v35 = vld [vmem:[%s7078_s3 + $0xb28] sm:$0xff]  ;;  %v2426_v44 = vld [vmem:[%s7078_s3 + $0x10a0] sm:$0xff] }
 0x34e   :  { %3318 = vmatmul.f32.vlgmr.msra.gmra.mxu2 %v5469_v19  ;;  %3346 = vmatpush.msrb.mxu0 %v2433_v20  ;;  %v2466_v19 = vld [vmem:[%s7078_s3 + $0x11e0] sm:$0xff] }
 0x34f   :  { %3125 = vmatpush.msra.mxu3 %v2258_v54  ;;  %3366 = vmatpush.msrb.mxu1 %v2449_v60  ;;  %v1313_v38 = vpop.f32.mrf.mxu2  ;;  %v1731_v15 = vmax.f32 %v1633_v52, 0.0  ;;  %v2442_v20 = vld [vmem:[%s7078_s3 + $0x1120] sm:$0xff]  ;;  %v2424_v52 = vld [vmem:[%s7078_s3 + $0x1090] sm:$0xff] }
 0x350   :  { %3384 = vmatpush.msrb.mxu2 %v2467_v56  ;;  %v804_v63 = vpop.f32.mrf.mxu0  ;;  %3347 = vmatpush.msrb.mxu0 %v2432_v48  ;;  %v1533_v49 = vadd.f32 %v5967_v12, %v1313_v38  ;;  %v2254_v12 = vld [vmem:[%s7078_s3 + $0xb40] sm:$0xff]  ;;  %v2460_v56 = vld [vmem:[%s7078_s3 + $0x11b0] sm:$0xff]  ;;  %v2425_v48 = vld [vmem:[%s7078_s3 + $0x1098] sm:$0xff] }
 0x351   :  { %3126 = vmatpush.msra.mxu3 %v2257_v4  ;;  %3367 = vmatpush.msrb.mxu1 %v2448_v1  ;;  %v1060_v26 = vpop.f32.mrf.mxu1  ;;  %v2250_v60 = vld [vmem:[%s7078_s3 + $0xb20] sm:$0xff]  ;;  %v2441_v1 = vld [vmem:[%s7078_s3 + $0x1118] sm:$0xff]  ;;  %v2248_v38 = vld [vmem:[%s7078_s3 + $0xb10] sm:$0xff] }
 0x352   :  { %3385 = vmatpush.msrb.mxu2 %v2466_v19  ;;  %v6065_v59 = vadd.f32 %v1060_v26, %v801_v34  ;;  %v1634_v23 = vadd.f32 %v5958_v5, %v1533_v49  ;;  %3348 = vmatpush.msrb.mxu0 %v2431_v6  ;;  %v2427_v34 = vld [vmem:[%s7078_s3 + $0x10a8] sm:$0xff]  ;;  %v2440_v19 = vld [vmem:[%s7078_s3 + $0x1110] sm:$0xff] }
 0x353   :  { %3127 = vmatpush.msra.mxu3 %v2256_v22  ;;  %3368 = vmatpush.msrb.mxu1 %v2447_v8  ;;  %v2459_v22 = vld [vmem:[%s7078_s3 + $0x11a8] sm:$0xff]  ;;  %v2458_v8 = vld [vmem:[%s7078_s3 + $0x11a0] sm:$0xff] }
 0x354   :  { %3386 = vmatpush.msrb.mxu2 %v2465_v62  ;;  %v1732_v29 = vmax.f32 %v1634_v23, 0.0  ;;  %3349 = vmatpush.msrb.mxu0 %v2430_v3  ;;  %v2439_v49 = vld [vmem:[%s7078_s3 + $0x1108] sm:$0xff]  ;;  %v2422_v23 = vld [vmem:[%s7078_s3 + $0x1080] sm:$0xff] }
 0x355   :  { %3128 = vmatpush.msra.mxu3 %v2255_v7  ;;  %3369 = vmatpush.msrb.mxu1 %v2446_v11  ;;  %v2423_v7 = vld [vmem:[%s7078_s3 + $0x1088] sm:$0xff]  ;;  %v2457_v11 = vld [vmem:[%s7078_s3 + $0x1198] sm:$0xff] }
 0x356   :  { %3387 = vmatpush.msrb.mxu2 %v2464_v24  ;;  %v6101_v18 = vmax.f32 %v1731_v15, %v1732_v29  ;;  %3350 = vmatpush.msrb.mxu0 %v2429_v27  ;;  %v2247_v26 = vld [vmem:[%s7078_s3 + $0xb08] sm:$0xff]  ;;  %v2438_v24 = vld [vmem:[%s7078_s3 + $0x1100] sm:$0xff]  ;;  %v2277_v29 = vld [vmem:[%s7078_s3 + $0xbf8] sm:$0xff] }
 0x357   :  { %3129 = vmatpush.msra.mxu3 %v2254_v12  ;;  %3370 = vmatpush.msrb.mxu1 %v2445_v28  ;;  %v1316_v10 = vpop.f32.mrf.mxu2 }
 0x358   :  { %3388 = vmatpush.msrb.mxu2 %v2463_v31  ;;  %v806_v2 = vpop.f32.mrf.mxu0  ;;  %3351 = vmatpush.msrb.mxu0 %v2428_v17  ;;  %v1534_v4 = vadd.f32 %v6018_v13, %v1316_v10  ;;  %v2249_v13 = vld [vmem:[%s7078_s3 + $0xb18] sm:$0xff]  ;;  %v2455_v17 = vld [vmem:[%s7078_s3 + $0x1188] sm:$0xff]  ;;  %v2454_v10 = vld [vmem:[%s7078_s3 + $0x1180] sm:$0xff] }
 0x359   :  { %3130 = vmatpush.msra.mxu3 %v2253_v61  ;;  %3371 = vmatpush.msrb.mxu1 %v2444_v40  ;;  %v1062_v36 = vpop.f32.mrf.mxu1  ;;  %v2456_v61 = vld [vmem:[%s7078_s3 + $0x1190] sm:$0xff]  ;;  %v2501_v40 = vld [vmem:[%s7078_s3 + $0x12f8] sm:$0xff] }
 0x35a   :  { %3389 = vmatpush.msrb.mxu2 %v2462_v33  ;;  %v6118_v54 = vadd.f32 %v1062_v36, %v804_v63  ;;  %3352 = vmatpush.msrb.mxu0 %v2427_v34  ;;  %v1635_v6 = vadd.f32 %v5958_v5, %v1534_v4 }
 0x35b   :  { %3131 = vmatpush.msra.mxu3 %v2252_v14  ;;  %3372 = vmatpush.msrb.mxu1 %v2443_v9  ;;  %v2276_v14 = vld [vmem:[%s7078_s3 + $0xbf0] sm:$0xff] }
 0x35c   :  { %3390 = vmatpush.msrb.mxu2 %v2461_v42  ;;  %3353 = vmatpush.msrb.mxu0 %v2426_v44  ;;  %v1733_v27 = vmax.f32 %v1635_v6, 0.0  ;;  %v2274_v42 = vld [vmem:[%s7078_s3 + $0xbe0] sm:$0xff] }
 0x35d   :  { %3132 = vmatpush.msra.mxu3 %v2251_v35  ;;  %3373 = vmatpush.msrb.mxu1 %v2442_v20  ;;  %v2498_v44 = vld [vmem:[%s7078_s3 + $0x12e0] sm:$0xff]  ;;  %v2273_v20 = vld [vmem:[%s7078_s3 + $0xbd8] sm:$0xff] }
 0x35e   :  { %3391 = vmatpush.msrb.mxu2 %v2460_v56  ;;  %3354 = vmatpush.msrb.mxu0 %v2425_v48  ;;  %v2516_v56 = vld [vmem:[%s7078_s3 + $0x1370] sm:$0xff] }
 0x35f   :  { %3133 = vmatpush.msra.mxu3 %v2250_v60  ;;  %3374 = vmatpush.msrb.mxu1 %v2441_v1  ;;  %v1318_v63 = vpop.f32.mrf.mxu2  ;;  %v2517_v60 = vld [vmem:[%s7078_s3 + $0x1378] sm:$0xff] }
 0x360   :  { %3392 = vmatpush.msrb.mxu2 %v2459_v22  ;;  %v809_v62 = vpop.f32.mrf.mxu0  ;;  %3355 = vmatpush.msrb.mxu0 %v2424_v52  ;;  %v1535_v3 = vadd.f32 %v6065_v59, %v1318_v63  ;;  %v2246_v59 = vld [vmem:[%s7078_s3 + $0xb00] sm:$0xff]  ;;  %v2271_v22 = vld [vmem:[%s7078_s3 + $0xbc8] sm:$0xff] }
 0x361   :  { %3134 = vmatpush.msra.mxu3 %v2249_v13  ;;  %3375 = vmatpush.msrb.mxu1 %v2440_v19  ;;  %v1065_v12 = vpop.f32.mrf.mxu1  ;;  %v2496_v13 = vld [vmem:[%s7078_s3 + $0x12d0] sm:$0xff]  ;;  %v2270_v63 = vld [vmem:[%s7078_s3 + $0xbc0] sm:$0xff] }
 0x362   :  { %3393 = vmatpush.msrb.mxu2 %v2458_v8  ;;  %v1439_v15 = vadd.f32 %v1065_v12, %v806_v2  ;;  %v1636_v28 = vadd.f32 %v5958_v5, %v1535_v3  ;;  %3356 = vmatpush.msrb.mxu0 %v2423_v7  ;;  %v2275_v2 = vld [vmem:[%s7078_s3 + $0xbe8] sm:$0xff]  ;;  %v2269_v3 = vld [vmem:[%s7078_s3 + $0xbb8] sm:$0xff] }
 0x363   :  { %3135 = vmatpush.msra.mxu3 %v2248_v38  ;;  %3376 = vmatpush.msrb.mxu1 %v2439_v49  ;;  %v2515_v38 = vld [vmem:[%s7078_s3 + $0x1368] sm:$0xff]  ;;  %v2513_v12 = vld [vmem:[%s7078_s3 + $0x1358] sm:$0xff] }
 0x364   :  { %3394 = vmatpush.msrb.mxu2 %v2457_v11  ;;  %v1734_v31 = vmax.f32 %v1636_v28, 0.0  ;;  %3357 = vmatpush.msrb.mxu0 %v2422_v23  ;;  %v2495_v8 = vld [vmem:[%s7078_s3 + $0x12c8] sm:$0xff]  ;;  %v2268_v23 = vld [vmem:[%s7078_s3 + $0xbb0] sm:$0xff] }
 0x365   :  { %3136 = vmatpush.msra.mxu3 %v2247_v26  ;;  %3377 = vmatpush.msrb.mxu1 %v2438_v24  ;;  %v2494_v26 = vld [vmem:[%s7078_s3 + $0x12c0] sm:$0xff] }
 0x366   :  { %3395 = vmatpush.msrb.mxu2 %v2456_v61  ;;  %v6197_v33 = vmax.f32 %v1733_v27, %v1734_v31  ;;  %3358 = vmatmul.f32.vlgmr.msrb.gmra.mxu0 %v5544_v25  ;;  %v2492_v61 = vld [vmem:[%s7078_s3 + $0x12b0] sm:$0xff] }
 0x367   :  { %3137 = vmatpush.msra.mxu3 %v2246_v59  ;;  %3378 = vmatmul.f32.vlgmr.msrb.gmra.mxu1 %v5576_v58  ;;  %v1321_v34 = vpop.f32.mrf.mxu2  ;;  %v2499_v58 = vld [vmem:[%s7078_s3 + $0x12e8] sm:$0xff]  ;;  %v2512_v59 = vld [vmem:[%s7078_s3 + $0x1350] sm:$0xff] }
 0x368   :  { %3138 = vmatmul.f32.vlgmr.msra.gmra.mxu3 %v5137_v46  ;;  %v811_v9 = vpop.f32.mrf.mxu0  ;;  %v2500_v46 = vld [vmem:[%s7078_s3 + $0x12f0] sm:$0xff]  ;;  %3396 = vmatpush.msrb.mxu2 %v2455_v17  ;;  %v1536_v36 = vadd.f32 %v6118_v54, %v1321_v34  ;;  %v2497_v54 = vld [vmem:[%s7078_s3 + $0x12d8] sm:$0xff]  ;;  %v2266_v34 = vld [vmem:[%s7078_s3 + $0xba0] sm:$0xff] }
 0x369   :  { %3142 = vmatpush.msrb.mxu3 %v2277_v29  ;;  %3422 = vmatpush.msra.mxu0 %v2501_v40  ;;  %v1067_v25 = vpop.f32.mrf.mxu1  ;;  %v2267_v29 = vld [vmem:[%s7078_s3 + $0xba8] sm:$0xff] }
 0x36a   :  { %v1440_v35 = vadd.f32 %v1067_v25, %v809_v62  ;;  %3397 = vmatpush.msrb.mxu2 %v2454_v10  ;;  %3442 = vmatpush.msra.mxu1 %v2517_v60  ;;  %v1637_v4 = vadd.f32 %v5958_v5, %v1536_v36  ;;  %v2514_v62 = vld [vmem:[%s7078_s3 + $0x1360] sm:$0xff]  ;;  %v2511_v40 = vld [vmem:[%s7078_s3 + $0x1348] sm:$0xff]  ;;  %v2509_v25 = vld [vmem:[%s7078_s3 + $0x1338] sm:$0xff] }
 0x36b   :  { %3143 = vmatpush.msrb.mxu3 %v2276_v14  ;;  %3423 = vmatpush.msra.mxu0 %v2500_v46  ;;  %v2491_v10 = vld [vmem:[%s7078_s3 + $0x12a8] sm:$0xff]  ;;  %v2490_v46 = vld [vmem:[%s7078_s3 + $0x12a0] sm:$0xff] }
 0x36c   :  { %3398 = vmatmul.f32.vlgmr.msrb.gmra.mxu2 %v5607_v47  ;;  %v2272_v47 = vld [vmem:[%s7078_s3 + $0xbd0] sm:$0xff]  ;;  %3443 = vmatpush.msra.mxu1 %v2516_v56  ;;  %v1735_v7 = vmax.f32 %v1637_v4, 0.0  ;;  %v2263_v4 = vld [vmem:[%s7078_s3 + $0xb88] sm:$0xff] }
 0x36d   :  { %3144 = vmatpush.msrb.mxu3 %v2275_v2  ;;  %3424 = vmatpush.msra.mxu0 %v2499_v58  ;;  %v2265_v2 = vld [vmem:[%s7078_s3 + $0xb98] sm:$0xff] }
 0x36e   :  { %3444 = vmatpush.msra.mxu1 %v2515_v38  ;;  %v2489_v58 = vld [vmem:[%s7078_s3 + $0x1298] sm:$0xff] }
 0x36f   :  { %3145 = vmatpush.msrb.mxu3 %v2274_v42  ;;  %3425 = vmatpush.msra.mxu0 %v2498_v44  ;;  %v1323_v48 = vpop.f32.mrf.mxu2  ;;  %v2264_v42 = vld [vmem:[%s7078_s3 + $0xb90] sm:$0xff] }
 0x370   :  { %v814_v1 = vpop.f32.mrf.mxu0  ;;  %v1537_v52 = vadd.f32 %v1439_v15, %v1323_v48  ;;  %3445 = vmatpush.msra.mxu1 %v2514_v62  ;;  %v2493_v15 = vld [vmem:[%s7078_s3 + $0x12b8] sm:$0xff]  ;;  %v2508_v44 = vld [vmem:[%s7078_s3 + $0x1330] sm:$0xff] }
 0x371   :  { %3146 = vmatpush.msrb.mxu3 %v2273_v20  ;;  %3426 = vmatpush.msra.mxu0 %v2497_v54  ;;  %v1070_v19 = vpop.f32.mrf.mxu1  ;;  %v2532_v20 = vld [vmem:[%s7078_s3 + $0x13f0] sm:$0xff] }
 0x372   :  { %v1441_v6 = vadd.f32 %v1070_v19, %v811_v9  ;;  %v1638_v49 = vadd.f32 %v5958_v5, %v1537_v52  ;;  %3446 = vmatpush.msra.mxu1 %v2513_v12  ;;  %v2510_v9 = vld [vmem:[%s7078_s3 + $0x1340] sm:$0xff]  ;;  %v2487_v52 = vld [vmem:[%s7078_s3 + $0x1288] sm:$0xff] }
 0x373   :  { %3147 = vmatpush.msrb.mxu3 %v2272_v47  ;;  %3427 = vmatpush.msra.mxu0 %v2496_v13  ;;  %v2488_v47 = vld [vmem:[%s7078_s3 + $0x1290] sm:$0xff]  ;;  %v2531_v13 = vld [vmem:[%s7078_s3 + $0x13e8] sm:$0xff]  ;;  %v2262_v19 = vld [vmem:[%s7078_s3 + $0xb80] sm:$0xff] }
 0x374   :  { %v1736_v11 = vmax.f32 %v1638_v49, 0.0  ;;  %3447 = vmatpush.msra.mxu1 %v2512_v59  ;;  %v2293_v49 = vld [vmem:[%s7078_s3 + $0xc78] sm:$0xff]  ;;  %v2504_v59 = vld [vmem:[%s7078_s3 + $0x1310] sm:$0xff] }
 0x375   :  { %3148 = vmatpush.msrb.mxu3 %v2271_v22  ;;  %3428 = vmatpush.msra.mxu0 %v2495_v8  ;;  %v2506_v8 = vld [vmem:[%s7078_s3 + $0x1320] sm:$0xff] }
 0x376   :  { %v6271_v24 = vmax.f32 %v1735_v7, %v1736_v11  ;;  %3448 = vmatpush.msra.mxu1 %v2511_v40  ;;  %v2486_v7 = vld [vmem:[%s7078_s3 + $0x1280] sm:$0xff]  ;;  %v2292_v11 = vld [vmem:[%s7078_s3 + $0xc70] sm:$0xff]  ;;  %v1430_v40 = vadd.f32 %v5732_v57, %v5670_v41  ;;  %v2525_v41 = vld [vmem:[%s7078_s3 + $0x13b8] sm:$0xff] }
 0x377   :  { %3149 = vmatpush.msrb.mxu3 %v2270_v63  ;;  %3429 = vmatpush.msra.mxu0 %v2494_v26  ;;  %v1326_v27 = vpop.f32.mrf.mxu2  ;;  %v2530_v63 = vld [vmem:[%s7078_s3 + $0x13e0] sm:$0xff]  ;;  %v2505_v26 = vld [vmem:[%s7078_s3 + $0x1318] sm:$0xff] }
 0x378   :  { %v816_v28 = vpop.f32.mrf.mxu0  ;;  %v1538_v31 = vadd.f32 %v1440_v35, %v1326_v27  ;;  %3449 = vmatpush.msra.mxu1 %v2510_v9  ;;  %v2533_v35 = vld [vmem:[%s7078_s3 + $0x13f8] sm:$0xff]  ;;  %v2291_v27 = vld [vmem:[%s7078_s3 + $0xc68] sm:$0xff]  ;;  %v2526_v9 = vld [vmem:[%s7078_s3 + $0x13c0] sm:$0xff] }
 0x379   :  { %3150 = vmatpush.msrb.mxu3 %v2269_v3  ;;  %3430 = vmatpush.msra.mxu0 %v2493_v15  ;;  %v1072_v17 = vpop.f32.mrf.mxu1  ;;  %v2529_v3 = vld [vmem:[%s7078_s3 + $0x13d8] sm:$0xff] }
 0x37a   :  { %v6285_v14 = vadd.f32 %v1072_v17, %v814_v1  ;;  %3450 = vmatpush.msra.mxu1 %v2509_v25  ;;  %v1639_v36 = vadd.f32 %v5958_v5, %v1538_v31  ;;  %3462 = vmatpush.msra.mxu2 %v2533_v35  ;;  %v2507_v1 = vld [vmem:[%s7078_s3 + $0x1328] sm:$0xff]  ;;  %v2290_v31 = vld [vmem:[%s7078_s3 + $0xc60] sm:$0xff] }
 0x37b   :  { %3151 = vmatpush.msrb.mxu3 %v2268_v23  ;;  %3431 = vmatpush.msra.mxu0 %v2492_v61  ;;  %v2287_v35 = vld [vmem:[%s7078_s3 + $0xc48] sm:$0xff] }
 0x37c   :  { %3451 = vmatpush.msra.mxu1 %v2508_v44  ;;  %3463 = vmatpush.msra.mxu2 %v2532_v20  ;;  %v1737_v38 = vmax.f32 %v1639_v36, 0.0 }
 0x37d   :  { %3152 = vmatpush.msrb.mxu3 %v2267_v29  ;;  %3432 = vmatpush.msra.mxu0 %v2491_v10  ;;  %v2527_v29 = vld [vmem:[%s7078_s3 + $0x13c8] sm:$0xff]  ;;  %v1431_v10 = vadd.f32 %v5786_v37, %v5721_v51  ;;  %v2288_v51 = vld [vmem:[%s7078_s3 + $0xc50] sm:$0xff]  ;;  %v1528_v37 = vadd.f32 %v1430_v40, %v5822_v43 }
 0x37e   :  { %3452 = vmatpush.msra.mxu1 %v2507_v1  ;;  %3464 = vmatpush.msra.mxu2 %v2531_v13  ;;  %v2523_v43 = vld [vmem:[%s7078_s3 + $0x13a8] sm:$0xff]  ;;  %v2284_v1 = vld [vmem:[%s7078_s3 + $0xc30] sm:$0xff] }
 0x37f   :  { %3153 = vmatpush.msrb.mxu3 %v2266_v34  ;;  %3433 = vmatpush.msra.mxu0 %v2490_v46  ;;  %v1328_v60 = vpop.f32.mrf.mxu2  ;;  %v2502_v34 = vld [vmem:[%s7078_s3 + $0x1300] sm:$0xff]  ;;  %v1529_v46 = vadd.f32 %v1431_v10, %v5877_v53  ;;  %v2563_v40 = vld [vmem:[%s7078_s3 + $0x14e8] sm:$0xff] }
 0x380   :  { %v819_v54 = vpop.f32.mrf.mxu0  ;;  %v1539_v56 = vadd.f32 %v1441_v6, %v1328_v60  ;;  %3453 = vmatpush.msra.mxu1 %v2506_v8  ;;  %3465 = vmatpush.msra.mxu2 %v2530_v63  ;;  %v2286_v53 = vld [vmem:[%s7078_s3 + $0xc40] sm:$0xff]  ;;  %v1629_v60 = vadd.f32 %v5958_v5, %v1528_v37  ;;  %v2283_v8 = vld [vmem:[%s7078_s3 + $0xc28] sm:$0xff] }
 0x381   :  { %3154 = vmatpush.msrb.mxu3 %v2265_v2  ;;  %3434 = vmatpush.msra.mxu0 %v2489_v58  ;;  %v1075_v48 = vpop.f32.mrf.mxu1  ;;  %v2278_v10 = vld [vmem:[%s7078_s3 + $0xc00] sm:$0xff] }
 0x382   :  { %v6333_v22 = vadd.f32 %v1075_v48, %v816_v28  ;;  %v1640_v6 = vadd.f32 %v5958_v5, %v1539_v56  ;;  %3454 = vmatpush.msra.mxu1 %v2505_v26  ;;  %3466 = vmatpush.msra.mxu2 %v2529_v3  ;;  %v2521_v48 = vld [vmem:[%s7078_s3 + $0x1398] sm:$0xff] }
 0x383   :  { %3155 = vmatpush.msrb.mxu3 %v2264_v42  ;;  %3435 = vmatpush.msra.mxu0 %v2488_v47  ;;  %v2522_v47 = vld [vmem:[%s7078_s3 + $0x13a0] sm:$0xff] }
 0x384   :  { %v1738_v62 = vmax.f32 %v1640_v6, 0.0  ;;  %3455 = vmatpush.msra.mxu1 %v2504_v59  ;;  %v2520_v6 = vld [vmem:[%s7078_s3 + $0x1390] sm:$0xff] }
 0x385   :  { %3156 = vmatpush.msrb.mxu3 %v2263_v4  ;;  %3436 = vmatpush.msra.mxu0 %v2487_v52  ;;  %v2285_v4 = vld [vmem:[%s7078_s3 + $0xc38] sm:$0xff]  ;;  %v2280_v59 = vld [vmem:[%s7078_s3 + $0xc10] sm:$0xff] }
 0x386   :  { %v6364_v12 = vmax.f32 %v1737_v38, %v1738_v62  ;;  %v2282_v62 = vld [vmem:[%s7078_s3 + $0xc20] sm:$0xff] }
 0x387   :  { %3157 = vmatpush.msrb.mxu3 %v2262_v19  ;;  %3437 = vmatpush.msra.mxu0 %v2486_v7  ;;  %v1331_v15 = vpop.f32.mrf.mxu2 }
 0x388   :  { %3158 = vmatmul.f32.vlgmr.msrb.gmra.mxu3 %v5179_v21  ;;  %3438 = vmatmul.f32.vlgmr.msra.gmra.mxu0 %v5716_v30  ;;  %v821_v23 = vpop.f32.mrf.mxu0  ;;  %v2528_v21 = vld [vmem:[%s7078_s3 + $0x13d0] sm:$0xff]  ;;  %v2503_v30 = vld [vmem:[%s7078_s3 + $0x1308] sm:$0xff]  ;;  %v1540_v17 = vadd.f32 %v6285_v14, %v1331_v15  ;;  %v2289_v14 = vld [vmem:[%s7078_s3 + $0xc58] sm:$0xff] }
 0x389   :  { %3162 = vmatpush.msra.mxu3 %v2293_v49  ;;  %v1077_v28 = vpop.f32.mrf.mxu1  ;;  %3467 = vmatpush.msra.mxu2 %v2528_v21  ;;  %v2519_v49 = vld [vmem:[%s7078_s3 + $0x1388] sm:$0xff]  ;;  %v2281_v15 = vld [vmem:[%s7078_s3 + $0xc18] sm:$0xff] }
 0x38a   :  { %v6376_v61 = vadd.f32 %v1077_v28, %v819_v54  ;;  %3456 = vmatpush.msra.mxu1 %v2503_v30  ;;  %v1641_v57 = vadd.f32 %v5958_v5, %v1540_v17  ;;  %v1630_v54 = vadd.f32 %v5958_v5, %v1529_v46  ;;  %v2279_v30 = vld [vmem:[%s7078_s3 + $0xc08] sm:$0xff]  ;;  %v2561_v46 = vld [vmem:[%s7078_s3 + $0x14d8] sm:$0xff] }
 0x38b   :  { %3163 = vmatpush.msra.mxu3 %v2292_v11  ;;  %3468 = vmatpush.msra.mxu2 %v2527_v29  ;;  %v2518_v11 = vld [vmem:[%s7078_s3 + $0x1380] sm:$0xff] }
 0x38c   :  { %3457 = vmatpush.msra.mxu1 %v2502_v34  ;;  %v1739_v44 = vmax.f32 %v1641_v57, 0.0  ;;  %v1728_v52 = vmax.f32 %v1630_v54, 0.0  ;;  %v2356_v57 = vld [vmem:[%s7078_s3 + $0xe70] sm:$0xff]  ;;  %v2557_v54 = vld [vmem:[%s7078_s3 + $0x14b8] sm:$0xff] }
 0x38d   :  { %3164 = vmatpush.msra.mxu3 %v2291_v27  ;;  %3458 = vmatmul.f32.vlgmr.msra.gmra.mxu1 %v5817_v39  ;;  %v2524_v39 = vld [vmem:[%s7078_s3 + $0x13b0] sm:$0xff] }
 0x38e   :  { %3469 = vmatpush.msra.mxu2 %v2526_v9 }
 0x38f   :  { %3165 = vmatpush.msra.mxu3 %v2290_v31  ;;  %v1333_v2 = vpop.f32.mrf.mxu2 }
 0x390   :  { %v824_v25 = vpop.f32.mrf.mxu0  ;;  %v1541_v58 = vadd.f32 %v6333_v22, %v1333_v2  ;;  %3470 = vmatpush.msra.mxu2 %v2525_v41  ;;  %v1727_v22 = vmax.f32 %v1629_v60, 0.0  ;;  %v2357_v41 = vld [vmem:[%s7078_s3 + $0xe78] sm:$0xff] }
 0x391   :  { %3166 = vmatpush.msra.mxu3 %v2289_v14  ;;  %v1080_v42 = vpop.f32.mrf.mxu1  ;;  %v2562_v14 = vld [vmem:[%s7078_s3 + $0x14e0] sm:$0xff] }
 0x392   :  { %v1445_v36 = vadd.f32 %v1080_v42, %v821_v23  ;;  %v1642_v20 = vadd.f32 %v5958_v5, %v1541_v58  ;;  %3471 = vmatpush.msra.mxu2 %v2524_v39  ;;  %v1786_v3 = vmax.f32 %v1727_v22, %v1728_v52  ;;  %v2565_v23 = vld [vmem:[%s7078_s3 + $0x14f8] sm:$0xff]  ;;  %v2355_v39 = vld [vmem:[%s7078_s3 + $0xe68] sm:$0xff]  ;;  %v2354_v42 = vld [vmem:[%s7078_s3 + $0xe60] sm:$0xff] }
 0x393   :  { %3167 = vmatpush.msra.mxu3 %v2288_v51  ;;  %3502 = vmatpush.msrb.mxu0 %v2565_v23  ;;  %v2556_v52 = vld [vmem:[%s7078_s3 + $0x14b0] sm:$0xff]  ;;  %v2553_v23 = vld [vmem:[%s7078_s3 + $0x1498] sm:$0xff] }
 0x394   :  { %v1740_v56 = vmax.f32 %v1642_v20, 0.0  ;;  %3472 = vmatpush.msra.mxu2 %v2523_v43  ;;  %v2559_v43 = vld [vmem:[%s7078_s3 + $0x14c8] sm:$0xff]  ;;  %v2352_v20 = vld [vmem:[%s7078_s3 + $0xe50] sm:$0xff] }
 0x395   :  { %3168 = vmatpush.msra.mxu3 %v2287_v35 }
 0x396   :  { %v6439_v13 = vmax.f32 %v1739_v44, %v1740_v56  ;;  %3473 = vmatpush.msra.mxu2 %v2522_v47  ;;  %v2558_v44 = vld [vmem:[%s7078_s3 + $0x14c0] sm:$0xff]  ;;  %v2581_v47 = vld [vmem:[%s7078_s3 + $0x1578] sm:$0xff] }
 0x397   :  { %3169 = vmatpush.msra.mxu3 %v2286_v53  ;;  %v1336_v19 = vpop.f32.mrf.mxu2  ;;  %v2353_v53 = vld [vmem:[%s7078_s3 + $0xe58] sm:$0xff]  ;;  %3522 = vmatpush.msrb.mxu1 %v2581_v47  ;;  %v2420_v47 = vld [vmem:[%s7078_s3 + $0x1070] sm:$0xff] }
 0x398   :  { %v826_v38 = vpop.f32.mrf.mxu0  ;;  %3474 = vmatpush.msra.mxu2 %v2521_v48  ;;  %v1542_v26 = vadd.f32 %v6376_v61, %v1336_v19  ;;  %v2564_v61 = vld [vmem:[%s7078_s3 + $0x14f0] sm:$0xff]  ;;  %v2351_v48 = vld [vmem:[%s7078_s3 + $0xe48] sm:$0xff] }
 0x399   :  { %3170 = vmatpush.msra.mxu3 %v2285_v4  ;;  %v1082_v63 = vpop.f32.mrf.mxu1  ;;  %3503 = vmatpush.msrb.mxu0 %v2564_v61  ;;  %v2580_v19 = vld [vmem:[%s7078_s3 + $0x1570] sm:$0xff] }
 0x39a   :  { %v1446_v7 = vadd.f32 %v1082_v63, %v824_v25  ;;  %3475 = vmatpush.msra.mxu2 %v2520_v6  ;;  %v1643_v21 = vadd.f32 %v5958_v5, %v1542_v26  ;;  %v2350_v6 = vld [vmem:[%s7078_s3 + $0xe40] sm:$0xff]  ;;  %3523 = vmatpush.msrb.mxu1 %v2580_v19  ;;  %v2567_v19 = vld [vmem:[%s7078_s3 + $0x1508] sm:$0xff] }
 0x39b   :  { %3171 = vmatpush.msra.mxu3 %v2284_v1  ;;  %3504 = vmatpush.msrb.mxu0 %v2563_v40  ;;  %v2551_v40 = vld [vmem:[%s7078_s3 + $0x1488] sm:$0xff] }
 0x39c   :  { %3476 = vmatpush.msra.mxu2 %v2519_v49  ;;  %v1741_v34 = vmax.f32 %v1643_v21, 0.0  ;;  %v2579_v49 = vld [vmem:[%s7078_s3 + $0x1568] sm:$0xff] }
 0x39d   :  { %3172 = vmatpush.msra.mxu3 %v2283_v8  ;;  %3505 = vmatpush.msrb.mxu0 %v2562_v14  ;;  %v2574_v14 = vld [vmem:[%s7078_s3 + $0x1540] sm:$0xff] }
 0x39e   :  { %3477 = vmatpush.msra.mxu2 %v2518_v11  ;;  %3524 = vmatpush.msrb.mxu1 %v2579_v49  ;;  %v2348_v11 = vld [vmem:[%s7078_s3 + $0xe30] sm:$0xff]  ;;  %v2589_v49 = vld [vmem:[%s7078_s3 + $0x15b8] sm:$0xff] }
 0x39f   :  { %3173 = vmatpush.msra.mxu3 %v2282_v62  ;;  %v1338_v27 = vpop.f32.mrf.mxu2  ;;  %3478 = vmatmul.f32.vlgmr.msra.gmra.mxu2 %v1786_v3  ;;  %v2349_v62 = vld [vmem:[%s7078_s3 + $0xe38] sm:$0xff]  ;;  %v2578_v3 = vld [vmem:[%s7078_s3 + $0x1560] sm:$0xff] }
 0x3a0   :  { %v829_v28 = vpop.f32.mrf.mxu0  ;;  %v1543_v29 = vadd.f32 %v1445_v36, %v1338_v27  ;;  %3506 = vmatpush.msrb.mxu0 %v2561_v46  ;;  %3525 = vmatpush.msrb.mxu1 %v2578_v3  ;;  %v2573_v46 = vld [vmem:[%s7078_s3 + $0x1538] sm:$0xff] }
 0x3a1   :  { %3174 = vmatpush.msra.mxu3 %v2281_v15  ;;  %v1085_v31 = vpop.f32.mrf.mxu1  ;;  %v2413_v3 = vld [vmem:[%s7078_s3 + $0x1038] sm:$0xff] }
 0x3a2   :  { %v1447_v17 = vadd.f32 %v1085_v31, %v826_v38  ;;  %v1644_v9 = vadd.f32 %v5958_v5, %v1543_v29  ;;  %v2576_v29 = vld [vmem:[%s7078_s3 + $0x1550] sm:$0xff]  ;;  %v2346_v31 = vld [vmem:[%s7078_s3 + $0xe20] sm:$0xff] }
 0x3a3   :  { %3175 = vmatpush.msra.mxu3 %v2280_v59  ;;  %v2577_v59 = vld [vmem:[%s7078_s3 + $0x1558] sm:$0xff] }
 0x3a4   :  { %v1742_v51 = vmax.f32 %v1644_v9, 0.0  ;;  %3526 = vmatpush.msrb.mxu1 %v2577_v59  ;;  %v2550_v9 = vld [vmem:[%s7078_s3 + $0x1480] sm:$0xff]  ;;  %v2585_v59 = vld [vmem:[%s7078_s3 + $0x1598] sm:$0xff] }
 0x3a5   :  { %3176 = vmatpush.msra.mxu3 %v2279_v30  ;;  %v2552_v30 = vld [vmem:[%s7078_s3 + $0x1490] sm:$0xff] }
 0x3a6   :  { %v6490_v37 = vmax.f32 %v1741_v34, %v1742_v51  ;;  %3527 = vmatpush.msrb.mxu1 %v2576_v29  ;;  %v2345_v34 = vld [vmem:[%s7078_s3 + $0xe18] sm:$0xff]  ;;  %v4042_v51 = vld [vmem:[%s7077_s2] ss:$0 sm:$0xff] }
 0x3a7   :  { %3177 = vmatpush.msra.mxu3 %v2278_v10  ;;  %v1341_v2 = vpop.f32.mrf.mxu2  ;;  %v2575_v10 = vld [vmem:[%s7078_s3 + $0x1548] sm:$0xff]  ;;  %v2582_v29 = vld [vmem:[%s7078_s3 + $0x1580] sm:$0xff] }
 0x3a8   :  { %3178 = vmatmul.f32.vlgmr.msra.gmra.mxu3 %v5214_v16  ;;  %v831_v25 = vpop.f32.mrf.mxu0  ;;  %v2560_v16 = vld [vmem:[%s7078_s3 + $0x14d0] sm:$0xff]  ;;  %v1544_v36 = vadd.f32 %v1446_v7, %v1341_v2  ;;  %v2555_v7 = vld [vmem:[%s7078_s3 + $0x14a8] sm:$0xff]  ;;  %3528 = vmatpush.msrb.mxu1 %v2575_v10  ;;  %v2597_v2 = vld [vmem:[%s7078_s3 + $0x15f8] sm:$0xff] }
 0x3a9   :  { %3242 = vmatpush.msrb.mxu3 %v2357_v41  ;;  %v1087_v35 = vpop.f32.mrf.mxu1  ;;  %3507 = vmatpush.msrb.mxu0 %v2560_v16  ;;  %v2344_v41 = vld [vmem:[%s7078_s3 + $0xe10] sm:$0xff] }
 0x3aa   :  { %v1448_v58 = vadd.f32 %v1087_v35, %v829_v28  ;;  %v1645_v60 = vadd.f32 %v5958_v5, %v1544_v36  ;;  %v2347_v28 = vld [vmem:[%s7078_s3 + $0xe28] sm:$0xff]  ;;  %3529 = vmatpush.msrb.mxu1 %v2574_v14  ;;  %3542 = vmatpush.msrb.mxu2 %v2597_v2  ;;  %v2596_v16 = vld [vmem:[%s7078_s3 + $0x15f0] sm:$0xff]  ;;  %v2481_v2 = vld [vmem:[%s7078_s3 + $0x1258] sm:$0xff] }
 0x3ab   :  { %3243 = vmatpush.msrb.mxu3 %v2356_v57  ;;  %3508 = vmatpush.msrb.mxu0 %v2559_v43  ;;  %v2571_v43 = vld [vmem:[%s7078_s3 + $0x1528] sm:$0xff]  ;;  %v2628_v10 = vld [vmem:[%s7078_s3 + $0x16f0] sm:$0xff] }
 0x3ac   :  { %v1743_v8 = vmax.f32 %v1645_v60, 0.0  ;;  %3530 = vmatpush.msrb.mxu1 %v2573_v46  ;;  %3543 = vmatpush.msrb.mxu2 %v2596_v16  ;;  %v2570_v60 = vld [vmem:[%s7078_s3 + $0x1520] sm:$0xff]  ;;  %v2484_v14 = vld [vmem:[%s7078_s3 + $0x1270] sm:$0xff]  ;;  %v2621_v16 = vld [vmem:[%s7078_s3 + $0x16b8] sm:$0xff] }
 0x3ad   :  { %3244 = vmatpush.msrb.mxu3 %v2355_v39  ;;  %3509 = vmatpush.msrb.mxu0 %v2558_v44  ;;  %v2343_v39 = vld [vmem:[%s7078_s3 + $0xe08] sm:$0xff]  ;;  %v2421_v44 = vld [vmem:[%s7078_s3 + $0x1078] sm:$0xff]  ;;  %v2624_v46 = vld [vmem:[%s7078_s3 + $0x16d0] sm:$0xff] }
 0x3af   :  { %3245 = vmatpush.msrb.mxu3 %v2354_v42  ;;  %v1343_v4 = vpop.f32.mrf.mxu2  ;;  %3510 = vmatpush.msrb.mxu0 %v2557_v54  ;;  %v2594_v54 = vld [vmem:[%s7078_s3 + $0x15e0] sm:$0xff] }
 0x3b0   :  { %v834_v56 = vpop.f32.mrf.mxu0  ;;  %v1545_v1 = vadd.f32 %v1447_v17, %v1343_v4 }
 0x3b1   :  { %3246 = vmatpush.msrb.mxu3 %v2353_v53  ;;  %v1090_v22 = vpop.f32.mrf.mxu1  ;;  %3511 = vmatpush.msrb.mxu0 %v2556_v52  ;;  %v2595_v53 = vld [vmem:[%s7078_s3 + $0x15e8] sm:$0xff]  ;;  %v2569_v56 = vld [vmem:[%s7078_s3 + $0x1518] sm:$0xff]  ;;  %v2418_v52 = vld [vmem:[%s7078_s3 + $0x1060] sm:$0xff] }
 0x3b2   :  { %v1449_v38 = vadd.f32 %v1090_v22, %v831_v25  ;;  %v1646_v63 = vadd.f32 %v5958_v5, %v1545_v1  ;;  %v2554_v5 = vld [vmem:[%s7078_s3 + $0x14a0] sm:$0xff]  ;;  %3544 = vmatpush.msrb.mxu2 %v2595_v53  ;;  %v2568_v1 = vld [vmem:[%s7078_s3 + $0x1510] sm:$0xff]  ;;  %v2477_v53 = vld [vmem:[%s7078_s3 + $0x1238] sm:$0xff] }
 0x3b3   :  { %3247 = vmatpush.msrb.mxu3 %v2352_v20  ;;  %3512 = vmatpush.msrb.mxu0 %v2555_v7  ;;  %v2592_v22 = vld [vmem:[%s7078_s3 + $0x15d0] sm:$0xff] }
 0x3b4   :  { %v1744_v26 = vmax.f32 %v1646_v63, 0.0  ;;  %3545 = vmatpush.msrb.mxu2 %v2594_v54  ;;  %v2590_v63 = vld [vmem:[%s7078_s3 + $0x15c0] sm:$0xff]  ;;  %v2416_v7 = vld [vmem:[%s7078_s3 + $0x1050] sm:$0xff] }
 0x3b5   :  { %3248 = vmatpush.msrb.mxu3 %v2351_v48  ;;  %3513 = vmatpush.msrb.mxu0 %v2554_v5  ;;  %v2593_v48 = vld [vmem:[%s7078_s3 + $0x15d8] sm:$0xff]  ;;  %v2414_v5 = vld [vmem:[%s7078_s3 + $0x1040] sm:$0xff] }
 0x3b6   :  { %v6554_v15 = vmax.f32 %v1743_v8, %v1744_v26  ;;  %3546 = vmatpush.msrb.mxu2 %v2593_v48  ;;  %v2566_v8 = vld [vmem:[%s7078_s3 + $0x1500] sm:$0xff]  ;;  %v2588_v26 = vld [vmem:[%s7078_s3 + $0x15b0] sm:$0xff]  ;;  %v2617_v48 = vld [vmem:[%s7078_s3 + $0x1698] sm:$0xff] }
 0x3b7   :  { %3249 = vmatpush.msrb.mxu3 %v2350_v6  ;;  %v1346_v21 = vpop.f32.mrf.mxu2  ;;  %3514 = vmatpush.msrb.mxu0 %v2553_v23  ;;  %v2417_v6 = vld [vmem:[%s7078_s3 + $0x1058] sm:$0xff]  ;;  %v2412_v23 = vld [vmem:[%s7078_s3 + $0x1030] sm:$0xff]  ;;  %v2618_v54 = vld [vmem:[%s7078_s3 + $0x16a0] sm:$0xff] }
 0x3b8   :  { %v835_v27 = vpop.f32.mrf.mxu0  ;;  %v1546_v17 = vadd.f32 %v1448_v58, %v1346_v21  ;;  %v2342_v58 = vld [vmem:[%s7078_s3 + $0xe00] sm:$0xff]  ;;  %3547 = vmatpush.msrb.mxu2 %v2592_v22  ;;  %v2411_v21 = vld [vmem:[%s7078_s3 + $0x1028] sm:$0xff]  ;;  %v2616_v22 = vld [vmem:[%s7078_s3 + $0x1690] sm:$0xff] }
 0x3b9   :  { %3250 = vmatpush.msrb.mxu3 %v2349_v62  ;;  %v1092_v61 = vpop.f32.mrf.mxu1  ;;  %3515 = vmatpush.msrb.mxu0 %v2552_v30  ;;  %v2415_v62 = vld [vmem:[%s7078_s3 + $0x1048] sm:$0xff]  ;;  %v2584_v27 = vld [vmem:[%s7078_s3 + $0x1590] sm:$0xff]  ;;  %v2409_v30 = vld [vmem:[%s7078_s3 + $0x1018] sm:$0xff] }
 0x3ba   :  { %v1647_v57 = vadd.f32 %v4042_v51, %v1546_v17  ;;  %v2583_v61 = vld [vmem:[%s7078_s3 + $0x1588] sm:$0xff]  ;;  %v2629_v17 = vld [vmem:[%s7078_s3 + $0x16f8] sm:$0xff] }
 0x3bb   :  { %3251 = vmatpush.msrb.mxu3 %v2348_v11  ;;  %3516 = vmatpush.msrb.mxu0 %v2551_v40  ;;  %v2586_v11 = vld [vmem:[%s7078_s3 + $0x15a0] sm:$0xff]  ;;  %v2407_v40 = vld [vmem:[%s7078_s3 + $0x1008] sm:$0xff] }
 0x3bc   :  { %v1745_v42 = vmax.f32 %v1647_v57, 0.0  ;;  %v2625_v57 = vld [vmem:[%s7078_s3 + $0x16d8] sm:$0xff] }
 0x3bd   :  { %3252 = vmatpush.msrb.mxu3 %v2347_v28  ;;  %3517 = vmatpush.msrb.mxu0 %v2550_v9  ;;  %v2410_v28 = vld [vmem:[%s7078_s3 + $0x1020] sm:$0xff]  ;;  %v2485_v9 = vld [vmem:[%s7078_s3 + $0x1278] sm:$0xff] }
 0x3be   :  { %3518 = vmatmul.f32.vlgmr.msrb.gmra.mxu0 %v6101_v18  ;;  %v2572_v18 = vld [vmem:[%s7078_s3 + $0x1530] sm:$0xff] }
 0x3bf   :  { %3253 = vmatpush.msrb.mxu3 %v2346_v31  ;;  %v1348_v25 = vpop.f32.mrf.mxu2  ;;  %3531 = vmatpush.msrb.mxu1 %v2572_v18  ;;  %v2408_v31 = vld [vmem:[%s7078_s3 + $0x1010] sm:$0xff]  ;;  %v2479_v18 = vld [vmem:[%s7078_s3 + $0x1248] sm:$0xff] }
 0x3c0   :  { %v1547_v35 = vadd.f32 %v1449_v38, %v1348_v25  ;;  %v2591_v38 = vld [vmem:[%s7078_s3 + $0x15c8] sm:$0xff]  ;;  %3582 = vmatpush.msra.mxu0 %v2629_v17  ;;  %v2545_v17 = vld [vmem:[%s7078_s3 + $0x1458] sm:$0xff] }
 0x3c1   :  { %3254 = vmatpush.msrb.mxu3 %v2345_v34  ;;  %3532 = vmatpush.msrb.mxu1 %v2571_v43  ;;  %v2406_v34 = vld [vmem:[%s7078_s3 + $0x1000] sm:$0xff]  ;;  %v2623_v25 = vld [vmem:[%s7078_s3 + $0x16c8] sm:$0xff]  ;;  %v2644_v43 = vld [vmem:[%s7078_s3 + $0x1770] sm:$0xff] }
 0x3c2   :  { %v1648_v36 = vadd.f32 %v4042_v51, %v1547_v35  ;;  %3548 = vmatpush.msrb.mxu2 %v2591_v38  ;;  %3583 = vmatpush.msra.mxu0 %v2628_v10  ;;  %v2483_v51 = vld [vmem:[%s7078_s3 + $0x1268] sm:$0xff]  ;;  %v2622_v35 = vld [vmem:[%s7078_s3 + $0x16c0] sm:$0xff] }
 0x3c3   :  { %3255 = vmatpush.msrb.mxu3 %v2344_v41  ;;  %3533 = vmatpush.msrb.mxu1 %v2570_v60  ;;  %v2626_v41 = vld [vmem:[%s7078_s3 + $0x16e0] sm:$0xff]  ;;  %v2476_v60 = vld [vmem:[%s7078_s3 + $0x1230] sm:$0xff]  ;;  %v2615_v38 = vld [vmem:[%s7078_s3 + $0x1688] sm:$0xff] }
 0x3c4   :  { %v1746_v20 = vmax.f32 %v1648_v36, 0.0  ;;  %3549 = vmatpush.msrb.mxu2 %v2590_v63  ;;  %v2620_v36 = vld [vmem:[%s7078_s3 + $0x16b0] sm:$0xff]  ;;  %v2614_v63 = vld [vmem:[%s7078_s3 + $0x1680] sm:$0xff]  ;;  %v2655_v10 = vld [vmem:[%s7078_s3 + $0x17c8] sm:$0xff] }
 0x3c5   :  { %3256 = vmatpush.msrb.mxu3 %v2343_v39  ;;  %3534 = vmatpush.msrb.mxu1 %v2569_v56  ;;  %v2480_v39 = vld [vmem:[%s7078_s3 + $0x1250] sm:$0xff]  ;;  %v2475_v56 = vld [vmem:[%s7078_s3 + $0x1228] sm:$0xff] }
 0x3c6   :  { %v6633_v4 = vmax.f32 %v1745_v42, %v1746_v20  ;;  %3550 = vmatpush.msrb.mxu2 %v2589_v49  ;;  %v2478_v42 = vld [vmem:[%s7078_s3 + $0x1240] sm:$0xff]  ;;  %v2643_v20 = vld [vmem:[%s7078_s3 + $0x1768] sm:$0xff] }
 0x3c7   :  { %3257 = vmatpush.msrb.mxu3 %v2342_v58  ;;  %3535 = vmatpush.msrb.mxu1 %v2568_v1  ;;  %v2645_v58 = vld [vmem:[%s7078_s3 + $0x1778] sm:$0xff]  ;;  %v2474_v1 = vld [vmem:[%s7078_s3 + $0x1220] sm:$0xff]  ;;  %v2471_v49 = vld [vmem:[%s7078_s3 + $0x1208] sm:$0xff] }
 0x3c8   :  { %3258 = vmatmul.f32.vlgmr.msrb.gmra.mxu3 %v5360_v45  ;;  %v2419_v45 = vld [vmem:[%s7078_s3 + $0x1068] sm:$0xff]  ;;  %3551 = vmatpush.msrb.mxu2 %v2588_v26  ;;  %v2661_v26 = vld [vmem:[%s7078_s3 + $0x17f8] sm:$0xff] }
 0x3c9   :  { %3322 = vmatpush.msra.mxu3 %v2421_v44  ;;  %3536 = vmatpush.msrb.mxu1 %v2567_v19  ;;  %v2619_v44 = vld [vmem:[%s7078_s3 + $0x16a8] sm:$0xff]  ;;  %v2473_v19 = vld [vmem:[%s7078_s3 + $0x1218] sm:$0xff] }
 0x3cb   :  { %3323 = vmatpush.msra.mxu3 %v2420_v47  ;;  %3537 = vmatpush.msrb.mxu1 %v2566_v8  ;;  %v2642_v47 = vld [vmem:[%s7078_s3 + $0x1760] sm:$0xff]  ;;  %v2472_v8 = vld [vmem:[%s7078_s3 + $0x1210] sm:$0xff] }
 0x3cc   :  { %3538 = vmatmul.f32.vlgmr.msrb.gmra.mxu1 %v6197_v33  ;;  %v2587_v33 = vld [vmem:[%s7078_s3 + $0x15a8] sm:$0xff] }
 0x3cd   :  { %3324 = vmatpush.msra.mxu3 %v2419_v45  ;;  %3552 = vmatpush.msrb.mxu2 %v2587_v33  ;;  %v2641_v45 = vld [vmem:[%s7078_s3 + $0x1758] sm:$0xff]  ;;  %v2636_v33 = vld [vmem:[%s7078_s3 + $0x1730] sm:$0xff] }
 0x3ce   :  { %3602 = vmatpush.msra.mxu1 %v2645_v58  ;;  %v2647_v58 = vld [vmem:[%s7078_s3 + $0x1788] sm:$0xff] }
 0x3cf   :  { %3325 = vmatpush.msra.mxu3 %v2418_v52  ;;  %3553 = vmatpush.msrb.mxu2 %v2586_v11  ;;  %v2640_v52 = vld [vmem:[%s7078_s3 + $0x1750] sm:$0xff]  ;;  %v2635_v11 = vld [vmem:[%s7078_s3 + $0x1728] sm:$0xff] }
 0x3d0   :  { %3603 = vmatpush.msra.mxu1 %v2644_v43  ;;  %v2535_v43 = vld [vmem:[%s7078_s3 + $0x1408] sm:$0xff] }
 0x3d1   :  { %3326 = vmatpush.msra.mxu3 %v2417_v6  ;;  %3554 = vmatpush.msrb.mxu2 %v2585_v59  ;;  %v2639_v6 = vld [vmem:[%s7078_s3 + $0x1748] sm:$0xff]  ;;  %v2548_v59 = vld [vmem:[%s7078_s3 + $0x1470] sm:$0xff] }
 0x3d2   :  { %3604 = vmatpush.msra.mxu1 %v2643_v20  ;;  %v2612_v20 = vld [vmem:[%s7078_s3 + $0x1670] sm:$0xff] }
 0x3d3   :  { %3327 = vmatpush.msra.mxu3 %v2416_v7  ;;  %3555 = vmatpush.msrb.mxu2 %v2584_v27  ;;  %v2638_v7 = vld [vmem:[%s7078_s3 + $0x1740] sm:$0xff] }
 0x3d4   :  { %3605 = vmatpush.msra.mxu1 %v2642_v47  ;;  %v2658_v27 = vld [vmem:[%s7078_s3 + $0x17e0] sm:$0xff]  ;;  %v2607_v47 = vld [vmem:[%s7078_s3 + $0x1648] sm:$0xff] }
 0x3d5   :  { %3328 = vmatpush.msra.mxu3 %v2415_v62  ;;  %3556 = vmatpush.msrb.mxu2 %v2583_v61  ;;  %v2637_v62 = vld [vmem:[%s7078_s3 + $0x1738] sm:$0xff] }
 0x3d6   :  { %3606 = vmatpush.msra.mxu1 %v2641_v45  ;;  %v2657_v61 = vld [vmem:[%s7078_s3 + $0x17d8] sm:$0xff]  ;;  %v2604_v45 = vld [vmem:[%s7078_s3 + $0x1630] sm:$0xff] }
 0x3d7   :  { %3329 = vmatpush.msra.mxu3 %v2414_v5  ;;  %3557 = vmatpush.msrb.mxu2 %v2582_v29  ;;  %v2470_v5 = vld [vmem:[%s7078_s3 + $0x1200] sm:$0xff]  ;;  %v2632_v29 = vld [vmem:[%s7078_s3 + $0x1710] sm:$0xff] }
 0x3d8   :  { %3558 = vmatmul.f32.vlgmr.msrb.gmra.mxu2 %v6271_v24  ;;  %v2627_v24 = vld [vmem:[%s7078_s3 + $0x16e8] sm:$0xff]  ;;  %3607 = vmatpush.msra.mxu1 %v2640_v52  ;;  %v2601_v52 = vld [vmem:[%s7078_s3 + $0x1618] sm:$0xff] }
 0x3d9   :  { %3330 = vmatpush.msra.mxu3 %v2413_v3  ;;  %3584 = vmatpush.msra.mxu0 %v2627_v24  ;;  %v2549_v3 = vld [vmem:[%s7078_s3 + $0x1478] sm:$0xff]  ;;  %v2630_v24 = vld [vmem:[%s7078_s3 + $0x1700] sm:$0xff] }
 0x3da   :  { %3608 = vmatpush.msra.mxu1 %v2639_v6  ;;  %3622 = vmatpush.msra.mxu2 %v2661_v26  ;;  %v2598_v6 = vld [vmem:[%s7078_s3 + $0x1600] sm:$0xff] }
 0x3db   :  { %3331 = vmatpush.msra.mxu3 %v2412_v23  ;;  %3585 = vmatpush.msra.mxu0 %v2626_v41  ;;  %v2659_v23 = vld [vmem:[%s7078_s3 + $0x17e8] sm:$0xff]  ;;  %v2653_v41 = vld [vmem:[%s7078_s3 + $0x17b8] sm:$0xff] }
 0x3dc   :  { %3609 = vmatpush.msra.mxu1 %v2638_v7  ;;  %v2676_v7 = vld [vmem:[%s7078_s3 + $0x1870] sm:$0xff] }
 0x3dd   :  { %3332 = vmatpush.msra.mxu3 %v2411_v21  ;;  %3586 = vmatpush.msra.mxu0 %v2625_v57  ;;  %v2634_v21 = vld [vmem:[%s7078_s3 + $0x1720] sm:$0xff]  ;;  %v2652_v57 = vld [vmem:[%s7078_s3 + $0x17b0] sm:$0xff] }
 0x3de   :  { %3610 = vmatpush.msra.mxu1 %v2637_v62  ;;  %v2674_v62 = vld [vmem:[%s7078_s3 + $0x1860] sm:$0xff] }
 0x3df   :  { %3333 = vmatpush.msra.mxu3 %v2410_v28  ;;  %3587 = vmatpush.msra.mxu0 %v2624_v46  ;;  %v2547_v28 = vld [vmem:[%s7078_s3 + $0x1468] sm:$0xff]  ;;  %v2540_v46 = vld [vmem:[%s7078_s3 + $0x1430] sm:$0xff] }
 0x3e0   :  { %3611 = vmatpush.msra.mxu1 %v2636_v33  ;;  %v2671_v33 = vld [vmem:[%s7078_s3 + $0x1848] sm:$0xff] }
 0x3e1   :  { %3334 = vmatpush.msra.mxu3 %v2409_v30  ;;  %3588 = vmatpush.msra.mxu0 %v2623_v25  ;;  %v2546_v30 = vld [vmem:[%s7078_s3 + $0x1460] sm:$0xff]  ;;  %v2539_v25 = vld [vmem:[%s7078_s3 + $0x1428] sm:$0xff] }
 0x3e2   :  { %3612 = vmatpush.msra.mxu1 %v2635_v11  ;;  %v2669_v11 = vld [vmem:[%s7078_s3 + $0x1838] sm:$0xff] }
 0x3e3   :  { %3335 = vmatpush.msra.mxu3 %v2408_v31  ;;  %3589 = vmatpush.msra.mxu0 %v2622_v35  ;;  %v2656_v31 = vld [vmem:[%s7078_s3 + $0x17d0] sm:$0xff]  ;;  %v2538_v35 = vld [vmem:[%s7078_s3 + $0x1420] sm:$0xff] }
 0x3e4   :  { %3613 = vmatpush.msra.mxu1 %v2634_v21  ;;  %v2666_v21 = vld [vmem:[%s7078_s3 + $0x1820] sm:$0xff] }
 0x3e5   :  { %3336 = vmatpush.msra.mxu3 %v2407_v40  ;;  %3590 = vmatpush.msra.mxu0 %v2621_v16  ;;  %v2631_v40 = vld [vmem:[%s7078_s3 + $0x1708] sm:$0xff]  ;;  %v2537_v16 = vld [vmem:[%s7078_s3 + $0x1418] sm:$0xff] }
 0x3e7   :  { %3337 = vmatpush.msra.mxu3 %v2406_v34  ;;  %3591 = vmatpush.msra.mxu0 %v2620_v36  ;;  %v2544_v34 = vld [vmem:[%s7078_s3 + $0x1450] sm:$0xff]  ;;  %v2646_v36 = vld [vmem:[%s7078_s3 + $0x1780] sm:$0xff] }
 0x3e8   :  { %3338 = vmatmul.f32.vlgmr.msra.gmra.mxu3 %v5504_v55  ;;  %v2482_v55 = vld [vmem:[%s7078_s3 + $0x1260] sm:$0xff] }
 0x3e9   :  { %3402 = vmatpush.msrb.mxu3 %v2485_v9  ;;  %3592 = vmatpush.msra.mxu0 %v2619_v44  ;;  %v2654_v9 = vld [vmem:[%s7078_s3 + $0x17c0] sm:$0xff]  ;;  %v2613_v44 = vld [vmem:[%s7078_s3 + $0x1678] sm:$0xff] }
 0x3eb   :  { %3403 = vmatpush.msrb.mxu3 %v2484_v14  ;;  %3593 = vmatpush.msra.mxu0 %v2618_v54  ;;  %v2543_v14 = vld [vmem:[%s7078_s3 + $0x1448] sm:$0xff]  ;;  %v2609_v54 = vld [vmem:[%s7078_s3 + $0x1658] sm:$0xff] }
 0x3ed   :  { %3404 = vmatpush.msrb.mxu3 %v2483_v51  ;;  %3594 = vmatpush.msra.mxu0 %v2617_v48  ;;  %v2542_v51 = vld [vmem:[%s7078_s3 + $0x1440] sm:$0xff]  ;;  %v2605_v48 = vld [vmem:[%s7078_s3 + $0x1638] sm:$0xff] }
 0x3ef   :  { %3405 = vmatpush.msrb.mxu3 %v2482_v55  ;;  %3595 = vmatpush.msra.mxu0 %v2616_v22  ;;  %v2541_v55 = vld [vmem:[%s7078_s3 + $0x1438] sm:$0xff]  ;;  %v2602_v22 = vld [vmem:[%s7078_s3 + $0x1620] sm:$0xff] }
 0x3f1   :  { %3406 = vmatpush.msrb.mxu3 %v2481_v2  ;;  %3596 = vmatpush.msra.mxu0 %v2615_v38  ;;  %v2650_v2 = vld [vmem:[%s7078_s3 + $0x17a0] sm:$0xff]  ;;  %v2599_v38 = vld [vmem:[%s7078_s3 + $0x1608] sm:$0xff] }
 0x3f3   :  { %3407 = vmatpush.msrb.mxu3 %v2480_v39  ;;  %3597 = vmatpush.msra.mxu0 %v2614_v63  ;;  %v2649_v39 = vld [vmem:[%s7078_s3 + $0x1798] sm:$0xff] }
 0x3f4   :  { %3598 = vmatmul.f32.vlgmr.msra.gmra.mxu0 %v6439_v13  ;;  %v2660_v13 = vld [vmem:[%s7078_s3 + $0x17f0] sm:$0xff]  ;;  %v2677_v63 = vld [vmem:[%s7078_s3 + $0x1878] sm:$0xff] }
 0x3f5   :  { %3408 = vmatpush.msrb.mxu3 %v2479_v18  ;;  %3623 = vmatpush.msra.mxu2 %v2660_v13  ;;  %v2648_v18 = vld [vmem:[%s7078_s3 + $0x1790] sm:$0xff]  ;;  %v2670_v13 = vld [vmem:[%s7078_s3 + $0x1840] sm:$0xff] }
 0x3f7   :  { %3409 = vmatpush.msrb.mxu3 %v2478_v42  ;;  %3624 = vmatpush.msra.mxu2 %v2659_v23  ;;  %v2536_v42 = vld [vmem:[%s7078_s3 + $0x1410] sm:$0xff] }
 0x3f8   :  { %v2668_v23 = vld [vmem:[%s7078_s3 + $0x1830] sm:$0xff] }
 0x3f9   :  { %3410 = vmatpush.msrb.mxu3 %v2477_v53  ;;  %3625 = vmatpush.msra.mxu2 %v2658_v27  ;;  %v2534_v53 = vld [vmem:[%s7078_s3 + $0x1400] sm:$0xff] }
 0x3fb   :  { %3411 = vmatpush.msrb.mxu3 %v2476_v60  ;;  %3626 = vmatpush.msra.mxu2 %v2657_v61  ;;  %v2610_v60 = vld [vmem:[%s7078_s3 + $0x1660] sm:$0xff]  ;;  %v2663_v61 = vld [vmem:[%s7078_s3 + $0x1808] sm:$0xff] }
 0x3fd   :  { %3412 = vmatpush.msrb.mxu3 %v2475_v56  ;;  %3627 = vmatpush.msra.mxu2 %v2656_v31  ;;  %v2606_v56 = vld [vmem:[%s7078_s3 + $0x1640] sm:$0xff] }
 0x3ff   :  { %3413 = vmatpush.msrb.mxu3 %v2474_v1  ;;  %3628 = vmatpush.msra.mxu2 %v2655_v10  ;;  %v2603_v1 = vld [vmem:[%s7078_s3 + $0x1628] sm:$0xff] }
 0x401   :  { %3414 = vmatpush.msrb.mxu3 %v2473_v19  ;;  %3629 = vmatpush.msra.mxu2 %v2654_v9  ;;  %v2600_v19 = vld [vmem:[%s7078_s3 + $0x1610] sm:$0xff] }
 0x403   :  { %3415 = vmatpush.msrb.mxu3 %v2472_v8  ;;  %3630 = vmatpush.msra.mxu2 %v2653_v41  ;;  %v2979_v8 = vpop.f32.mrf.mxu3 }
 0x404   :  { %v2980_v10 = vadd.f32 %v2979_v8, %v5519_v50 }
 0x405   :  { %3416 = vmatpush.msrb.mxu3 %v2471_v49  ;;  %3631 = vmatpush.msra.mxu2 %v2652_v57  ;;  %v2675_v49 = vld [vmem:[%s7078_s3 + $0x1868] sm:$0xff] }
 0x407   :  { %3417 = vmatpush.msrb.mxu3 %v2470_v5  ;;  %v2672_v5 = vld [vmem:[%s7078_s3 + $0x1850] sm:$0xff] }
 0x408   :  { %3418 = vmatmul.f32.vlgmr.msrb.gmra.mxu3 %v5650_v0  ;;  %v2633_v0 = vld [vmem:[%s7078_s3 + $0x1718] sm:$0xff] }
 0x409   :  { %3482 = vmatpush.msra.mxu3 %v2549_v3  ;;  %3614 = vmatpush.msra.mxu1 %v2633_v0  ;;  %v2664_v0 = vld [vmem:[%s7078_s3 + $0x1810] sm:$0xff] }
 0x40b   :  { %3483 = vmatpush.msra.mxu3 %v2548_v59  ;;  %3615 = vmatpush.msra.mxu1 %v2632_v29  ;;  %v2999_v26 = vpop.f32.mrf.mxu3  ;;  %v2667_v59 = vld [vmem:[%s7078_s3 + $0x1828] sm:$0xff] }
 0x40d   :  { %3484 = vmatpush.msra.mxu3 %v2547_v28  ;;  %3616 = vmatpush.msra.mxu1 %v2631_v40  ;;  %v2665_v28 = vld [vmem:[%s7078_s3 + $0x1818] sm:$0xff] }
 0x40f   :  { %3485 = vmatpush.msra.mxu3 %v2546_v30  ;;  %3617 = vmatpush.msra.mxu1 %v2630_v24  ;;  %v2662_v30 = vld [vmem:[%s7078_s3 + $0x1800] sm:$0xff]  ;;  %v3000_v24 = vadd.f32 %v2999_v26, %v2980_v10 }
 0x410   :  { %3618 = vmatmul.f32.vlgmr.msra.gmra.mxu1 %v6490_v37  ;;  %v2651_v37 = vld [vmem:[%s7078_s3 + $0x17a8] sm:$0xff] }
 0x411   :  { %3486 = vmatpush.msra.mxu3 %v2545_v17  ;;  %3632 = vmatpush.msra.mxu2 %v2651_v37 }
 0x413   :  { %3487 = vmatpush.msra.mxu3 %v2544_v34  ;;  %3633 = vmatpush.msra.mxu2 %v2650_v2  ;;  %v3019_v3 = vpop.f32.mrf.mxu3 }
 0x414   :  { %v3020_v9 = vadd.f32 %v3019_v3, %v3000_v24 }
 0x415   :  { %3488 = vmatpush.msra.mxu3 %v2543_v14  ;;  %3634 = vmatpush.msra.mxu2 %v2649_v39 }
 0x417   :  { %3489 = vmatpush.msra.mxu3 %v2542_v51  ;;  %3635 = vmatpush.msra.mxu2 %v2648_v18  ;;  %v3219_v18 = vpop.f32.mrf.mxu1 }
 0x419   :  { %3490 = vmatpush.msra.mxu3 %v2541_v55  ;;  %3636 = vmatpush.msra.mxu2 %v2647_v58  ;;  %v3239_v58 = vpop.f32.mrf.mxu2 }
 0x41b   :  { %3491 = vmatpush.msra.mxu3 %v2540_v46  ;;  %3637 = vmatpush.msra.mxu2 %v2646_v36  ;;  %v3039_v27 = vpop.f32.mrf.mxu3 }
 0x41c   :  { %3638 = vmatmul.f32.vlgmr.msra.gmra.mxu2 %v6554_v15  ;;  %v2611_v15 = vld [vmem:[%s7078_s3 + $0x1668] sm:$0xff]  ;;  %v3040_v14 = vadd.f32 %v3039_v27, %v3020_v9 }
 0x41d   :  { %3492 = vmatpush.msra.mxu3 %v2539_v25 }
 0x41f   :  { %3493 = vmatpush.msra.mxu3 %v2538_v35  ;;  %v3199_v35 = vpop.f32.mrf.mxu0 }
 0x421   :  { %3494 = vmatpush.msra.mxu3 %v2537_v16 }
 0x423   :  { %3495 = vmatpush.msra.mxu3 %v2536_v42  ;;  %v3059_v29 = vpop.f32.mrf.mxu3 }
 0x424   :  { %v3060_v41 = vadd.f32 %v3059_v29, %v3040_v14 }
 0x425   :  { %3496 = vmatpush.msra.mxu3 %v2535_v43 }
 0x427   :  { %3497 = vmatpush.msra.mxu3 %v2534_v53  ;;  %v3279_v43 = vpop.f32.mrf.mxu0 }
 0x428   :  { %3498 = vmatmul.f32.vlgmr.msra.gmra.mxu3 %v6001_v32  ;;  %v2608_v32 = vld [vmem:[%s7078_s3 + $0x1650] sm:$0xff] }
 0x429   :  { %3562 = vmatpush.msrb.mxu3 %v2613_v44  ;;  %v3299_v44 = vpop.f32.mrf.mxu1 }
 0x42b   :  { %3563 = vmatpush.msrb.mxu3 %v2612_v20  ;;  %v3079_v31 = vpop.f32.mrf.mxu3 }
 0x42c   :  { %v3080_v57 = vadd.f32 %v3079_v31, %v3060_v41 }
 0x42d   :  { %3564 = vmatpush.msrb.mxu3 %v2611_v15  ;;  %v3319_v15 = vpop.f32.mrf.mxu2 }
 0x42f   :  { %3565 = vmatpush.msrb.mxu3 %v2610_v60 }
 0x431   :  { %3566 = vmatpush.msrb.mxu3 %v2609_v54 }
 0x433   :  { %3567 = vmatpush.msrb.mxu3 %v2608_v32  ;;  %v3099_v17 = vpop.f32.mrf.mxu3 }
 0x434   :  { %v3100_v55 = vadd.f32 %v3099_v17, %v3080_v57 }
 0x435   :  { %3568 = vmatpush.msrb.mxu3 %v2607_v47  ;;  %v3359_v47 = vpop.f32.mrf.mxu0 }
 0x437   :  { %3569 = vmatpush.msrb.mxu3 %v2606_v56 }
 0x439   :  { %3570 = vmatpush.msrb.mxu3 %v2605_v48  ;;  %v3379_v48 = vpop.f32.mrf.mxu1 }
 0x43b   :  { %3571 = vmatpush.msrb.mxu3 %v2604_v45  ;;  %v3119_v40 = vpop.f32.mrf.mxu3 }
 0x43c   :  { %v3120_v37 = vadd.f32 %v3119_v40, %v3100_v55 }
 0x43d   :  { %3572 = vmatpush.msrb.mxu3 %v2603_v1  ;;  %v3399_v1 = vpop.f32.mrf.mxu2 }
 0x43f   :  { %3573 = vmatpush.msrb.mxu3 %v2602_v22 }
 0x441   :  { %3574 = vmatpush.msrb.mxu3 %v2601_v52  ;;  %v3459_v8 = vpop.f32.mrf.mxu1 }
 0x443   :  { %3575 = vmatpush.msrb.mxu3 %v2600_v19  ;;  %v3139_v34 = vpop.f32.mrf.mxu3 }
 0x444   :  { %v3140_v46 = vadd.f32 %v3139_v34, %v3120_v37 }
 0x445   :  { %3576 = vmatpush.msrb.mxu3 %v2599_v38  ;;  %v3439_v38 = vpop.f32.mrf.mxu0 }
 0x447   :  { %3577 = vmatpush.msrb.mxu3 %v2598_v6 }
 0x448   :  { %3578 = vmatmul.f32.vlgmr.msrb.gmra.mxu3 %v6364_v12  ;;  %v2673_v12 = vld [vmem:[%s7078_s3 + $0x1858] sm:$0xff] }
 0x449   :  { %3642 = vmatpush.msra.mxu3 %v2677_v63 }
 0x44b   :  { %3643 = vmatpush.msra.mxu3 %v2676_v7  ;;  %v3159_v51 = vpop.f32.mrf.mxu3  ;;  %v3479_v7 = vpop.f32.mrf.mxu2 }
 0x44c   :  { %v3160_v25 = vadd.f32 %v3159_v51, %v3140_v46 }
 0x44d   :  { %3644 = vmatpush.msra.mxu3 %v2675_v49 }
 0x44f   :  { %3645 = vmatpush.msra.mxu3 %v2674_v62 }
 0x451   :  { %3646 = vmatpush.msra.mxu3 %v2673_v12  ;;  %v3519_v12 = vpop.f32.mrf.mxu0 }
 0x453   :  { %3647 = vmatpush.msra.mxu3 %v2672_v5  ;;  %v3179_v2 = vpop.f32.mrf.mxu3 }
 0x454   :  { %v3180_v39 = vadd.f32 %v3179_v2, %v3160_v25 }
 0x455   :  { %3648 = vmatpush.msra.mxu3 %v2671_v33  ;;  %v3539_v33 = vpop.f32.mrf.mxu1 }
 0x457   :  { %3649 = vmatpush.msra.mxu3 %v2670_v13 }
 0x459   :  { %3650 = vmatpush.msra.mxu3 %v2669_v11 }
 0x45b   :  { %3651 = vmatpush.msra.mxu3 %v2668_v23  ;;  %v3259_v42 = vpop.f32.mrf.mxu3  ;;  %v3559_v3 = vpop.f32.mrf.mxu2 }
 0x45d   :  { %3652 = vmatpush.msra.mxu3 %v2667_v59 }
 0x45f   :  { %3653 = vmatpush.msra.mxu3 %v2666_v21 }
 0x461   :  { %3654 = vmatpush.msra.mxu3 %v2665_v28 }
 0x463   :  { %3655 = vmatpush.msra.mxu3 %v2664_v0 }
 0x465   :  { %3656 = vmatpush.msra.mxu3 %v2663_v61 }
 0x467   :  { %3657 = vmatpush.msra.mxu3 %v2662_v30 }
 0x468   :  { %3658 = vmatmul.f32.vlgmr.msra.gmra.mxu3 %v6633_v4  ;;  %v3200_v4 = vadd.f32 %v3199_v35, %v3180_v39 }
 0x46a   :  { %v3220_v16 = vadd.f32 %v3219_v18, %v3200_v4 }
 0x46b   :  { %v3339_v60 = vpop.f32.mrf.mxu3 }
 0x46c   :  { %v3240_v50 = vadd.f32 %v3239_v58, %v3220_v16 }
 0x46e   :  { %v3260_v36 = vadd.f32 %v3259_v42, %v3240_v50 }
 0x470   :  { %v3280_v53 = vadd.f32 %v3279_v43, %v3260_v36 }
 0x471   :  { %v3599_v21 = vpop.f32.mrf.mxu0 }
 0x472   :  { %v3300_v20 = vadd.f32 %v3299_v44, %v3280_v53 }
 0x474   :  { %v3320_v54 = vadd.f32 %v3319_v15, %v3300_v20 }
 0x476   :  { %v3340_v32 = vadd.f32 %v3339_v60, %v3320_v54 }
 0x478   :  { %v3360_v56 = vadd.f32 %v3359_v47, %v3340_v32 }
 0x47a   :  { %v3380_v45 = vadd.f32 %v3379_v48, %v3360_v56 }
 0x47c   :  { %v3400_v52 = vadd.f32 %v3399_v1, %v3380_v45 }
 0x48b   :  { %v3419_v22 = vpop.f32.mrf.mxu3 }
 0x48c   :  { %v3420_v19 = vadd.f32 %v3419_v22, %v3400_v52 }
 0x48d   :  { %v3619_v28 = vpop.f32.mrf.mxu1 }
 0x48e   :  { %v3440_v6 = vadd.f32 %v3439_v38, %v3420_v19 }
 0x490   :  { %v3460_v63 = vadd.f32 %v3459_v8, %v3440_v6 }
 0x492   :  { %v3480_v62 = vadd.f32 %v3479_v7, %v3460_v63 }
 0x49f   :  { %v3639_v61 = vpop.f32.mrf.mxu2 }
 0x4ab   :  { %v3499_v49 = vpop.f32.mrf.mxu3 }
 0x4ac   :  { %v3500_v26 = vadd.f32 %v3499_v49, %v3480_v62 }
 0x4ae   :  { %v3520_v5 = vadd.f32 %v3519_v12, %v3500_v26 }
 0x4b0   :  { %v3540_v13 = vadd.f32 %v3539_v33, %v3520_v5 }
 0x4b2   :  { %v3560_v23 = vadd.f32 %v3559_v3, %v3540_v13 }
 0x4cb   :  { %v3579_v11 = vpop.f32.mrf.mxu3 }
 0x4cc   :  { %v3580_v59 = vadd.f32 %v3579_v11, %v3560_v23 }
 0x4ce   :  { %v3600_v27 = vadd.f32 %v3599_v21, %v3580_v59 }
 0x4d0   :  { %v3620_v0 = vadd.f32 %v3619_v28, %v3600_v27 }
 0x4d2   :  { %v3640_v30 = vadd.f32 %v3639_v61, %v3620_v0 }
 0x4eb   :  { %v3659_v29 = vpop.f32.mrf.mxu3 }
 0x4ec   :  { %v3660_v31 = vadd.f32 %v3659_v29, %v3640_v30 }
 0x4ee   :  { %3662 = vst [vmem:[%s7080_s5] sm:$0xff] %v3660_v31 }

</bundles_post_ra>
